<compile_context>
chip_gen: v5e
topology: v5e:2x2
jax: 0.10.0
libtpu: 0.0.40
codegen_flags: <defaults>
</compile_context>

<pallas_src>
import functools

import jax
import jax.numpy as jnp
from jax import lax
from jax.experimental import pallas as pl
from jax.experimental.pallas import tpu as pltpu


# ----------------------------- pltpu.roll capability probe -----------------------------

_ROLL_MODE = None  # "pos" | "neg" | "concat"


def _roll_mode():
    """Probe pltpu.roll once (direction convention + lowering support)."""
    global _ROLL_MODE
    if _ROLL_MODE is not None:
        return _ROLL_MODE
    try:
        def _k(x_ref, o_ref):
            o_ref[...] = pltpu.roll(x_ref[...], 1, axis=1)

        x = jnp.broadcast_to(jnp.arange(24, dtype=jnp.float32)[None, :, None],
                             (8, 24, 128))
        y = pl.pallas_call(_k, out_shape=jax.ShapeDtypeStruct((8, 24, 128),
                                                              jnp.float32))(x)
        y = jax.block_until_ready(y)
        if bool(jnp.allclose(y, jnp.roll(x, 1, axis=1))):
            _ROLL_MODE = "pos"
        elif bool(jnp.allclose(y, jnp.roll(x, -1, axis=1))):
            _ROLL_MODE = "neg"
        else:
            _ROLL_MODE = "concat"
    except Exception:
        _ROLL_MODE = "concat"
    return _ROLL_MODE


# ----------------------------------- kernel -----------------------------------

def _residual_block_kernel(x_ref, w1_ref, b1_ref, w2_ref, wd_ref, b2d_ref,
                           out_ref, hpad_ref, *, h_total, roll_mode):
    # x_ref   : (1, 1, TH+4, Wp, Ci) bf16   input stripe + 2-row halo each side
    # w1_ref  : (3, Ci, 3*Co) bf16          conv1 taps (dy-major, dx concat on lanes)
    # w2_ref  : (3, Co, 3*Co) bf16          conv2 taps
    # wd_ref  : (Ci, Co) bf16               1x1 shortcut (BN scale folded)
    # b1_ref  : (1, 1, Co) f32              folded BN1 shift
    # b2d_ref : (1, 1, Co) f32              folded BN2 + BNd shift
    # out_ref : (1, TH, W, Co)              output stripe
    # hpad_ref: (TH+2, Wp, Co) bf16         conv1 output (relu'd, halo-masked)
    th = out_ref.shape[1]
    wout = out_ref.shape[2]
    co = out_ref.shape[3]
    wp = hpad_ref.shape[1]
    ci = x_ref.shape[4]
    rows1 = th + 2
    h_idx = pl.program_id(1)

    def shift_w(v, k):
        # jnp.roll(v, k, axis=1): out[:, c] = v[:, c - k]
        n = v.shape[1]
        k = k % n
        if k == 0:
            return v
        if roll_mode == "pos":
            return pltpu.roll(v, k, axis=1)
        if roll_mode == "neg":
            return pltpu.roll(v, n - k, axis=1)
        return jnp.concatenate([v[:, n - k:, :], v[:, :n - k, :]], axis=1)

    # ---- conv1 (3x3) + fused 1x1 shortcut: 3 aligned full-width matmuls ----
    acc1 = None
    res = None
    for dy in range(3):
        lhs = x_ref[0, 0, pl.ds(dy, rows1), :, :].reshape(rows1 * wp, ci)
        t = jnp.dot(lhs, w1_ref[dy], preferred_element_type=jnp.float32)
        acc1 = t if acc1 is None else acc1 + t
        if dy == 1:  # centre-row slab doubles as the 1x1 shortcut input
            res = jnp.dot(lhs[wp:(th + 1) * wp, :], wd_ref[...],
                          preferred_element_type=jnp.float32)
    acc1 = acc1.reshape(rows1, wp, 3 * co)
    s1 = (acc1[:, :, :co]
          + shift_w(acc1[:, :, co:2 * co], -1)
          + shift_w(acc1[:, :, 2 * co:], -2))
    h1 = jnp.maximum(s1 + b1_ref[...], 0.0)

    # Zero the halo: columns >= W (right pad + alignment pad) and rows whose global
    # conv1-output row falls outside [0, H) (top/bottom padding and the ragged tail
    # of the last stripe).  One mask -> one aligned, unmasked full-width store.
    col = lax.broadcasted_iota(jnp.int32, (rows1, wp, co), 1)
    row = lax.broadcasted_iota(jnp.int32, (rows1, wp, co), 0)
    g = row + (h_idx * th - 1)
    keep = (col < wout) & (g >= 0) & (g < h_total)
    hpad_ref[...] = jnp.where(keep, h1, 0.0).astype(hpad_ref.dtype)

    # ---- conv2 (3x3): 3 aligned full-width matmuls on the scratch ----
    acc2 = None
    for dy in range(3):
        lhs = hpad_ref[pl.ds(dy, th), :, :].reshape(th * wp, co)
        t = jnp.dot(lhs, w2_ref[dy], preferred_element_type=jnp.float32)
        acc2 = t if acc2 is None else acc2 + t
    acc2 = acc2.reshape(th, wp, 3 * co)
    main = (shift_w(acc2[:, :, :co], 1)
            + acc2[:, :, co:2 * co]
            + shift_w(acc2[:, :, 2 * co:], -1))

    res = shift_w(res.reshape(th, wp, co), -1)  # align img col j at array col j
    out = jnp.maximum(main + res + b2d_ref[...], 0.0)
    out_ref[...] = out[:, :wout, :].reshape(1, th, wout, co).astype(out_ref.dtype)


# ----------------------------- host-side preparation -----------------------------

def _round_up(x, m):
    return (x + m - 1) // m * m


def _fold_bn(gamma, beta, mean, var, eps=1e-5):
    scale = (gamma / jnp.sqrt(var + eps)).astype(jnp.float32)
    shift = (beta - mean * scale).astype(jnp.float32)
    return scale, shift


def _prep_taps3x3(w_oihw, scale, ci_p, co_p):
    # OIHW (Cout, Cin, 3, 3) -> (3, Ci_p, 3*Co_p): per dy, the 3 dx taps are
    # concatenated along the output (lane) dim so one matmul per dy covers them.
    cout, cin = w_oihw.shape[0], w_oihw.shape[1]
    t = jnp.transpose(w_oihw, (2, 3, 1, 0)) * scale[None, None, None, :]  # (dy,dx,ci,co)
    t = jnp.pad(t, ((0, 0), (0, 0), (0, ci_p - cin), (0, co_p - cout)))
    t = jnp.transpose(t, (0, 2, 1, 3)).reshape(3, ci_p, 3 * co_p)
    return t.astype(jnp.bfloat16)


def _prep_1x1(w_oihw, scale, ci_p, co_p):
    cout, cin = w_oihw.shape[0], w_oihw.shape[1]
    w = jnp.transpose(w_oihw[:, :, 0, 0], (1, 0)) * scale[None, :]
    w = jnp.pad(w, ((0, ci_p - cin), (0, co_p - cout)))
    return w.astype(jnp.bfloat16)


def _prep_shift(shift, co_p):
    return jnp.pad(shift, (0, co_p - shift.shape[0])).reshape(1, 1, co_p).astype(
        jnp.float32)


def _vmem_capacity_bytes():
    try:
        return int(pltpu.get_tpu_info().vmem_capacity_bytes)
    except Exception:
        return 64 << 20  # conservative fallback (v7x physical VMEM per core)


def _vmem_estimate(th, w, wp, ci, co, out_itemsize):
    rows1 = th + 2
    inp = 2 * (th + 4) * wp * ci * 2                              # dbl-buffered stripe
    wgt = 2 * (3 * ci * 3 * co + 3 * co * 3 * co + ci * co) * 2   # dbl-buffered weights
    outb = 2 * th * w * co * out_itemsize                         # dbl-buffered output
    hpad = rows1 * wp * co * 2                                    # scratch
    tmp = (rows1 * 5 * co + th * 7 * co) * wp * 4                 # f32 accs/temporaries
    return inp + wgt + outb + hpad + tmp


def _pick_stripe(h, w, wp, ci, co, out_itemsize, budget):
    hi = max(8, min(_round_up(h, 8), 256))
    for t in range(hi, 7, -8):
        if _vmem_estimate(t, w, wp, ci, co, out_itemsize) <= budget:
            return t
    return 8


def residual_block(x_nchw, params, th=None, out_dtype=jnp.float32):
    """x_nchw: (N, Cin, H, W) float32; params: dict of PyTorch-shaped tensors."""
    N, Cin, H, W = x_nchw.shape
    Cout = params["w1"].shape[0]
    Ci = _round_up(Cin, 128)          # lane-dense channel padding
    Co = _round_up(Cout, 128)
    Wp = _round_up(W + 2, 8)          # sublane-aligned padded width

    s1, b1 = _fold_bn(params["g1"], params["be1"], params["m1"], params["v1"])
    s2, b2 = _fold_bn(params["g2"], params["be2"], params["m2"], params["v2"])
    if "wd" in params:                # projection shortcut
        sd, bd = _fold_bn(params["gd"], params["bed"], params["md"], params["vd"])
        wd = _prep_1x1(params["wd"], sd, Ci, Co)
    else:                             # identity shortcut (in_ch == out_ch, stride 1)
        bd = jnp.zeros((Cout,), jnp.float32)
        wd = jnp.pad(jnp.eye(Cin, dtype=jnp.float32),
                     ((0, Ci - Cin), (0, Co - Cin))).astype(jnp.bfloat16)

    w1 = _prep_taps3x3(params["w1"], s1, Ci, Co)
    w2 = _prep_taps3x3(params["w2"], s2, Co, Co)
    b1p = _prep_shift(b1, Co)
    b2dp = _prep_shift(b2 + bd, Co)

    out_itemsize = jnp.dtype(out_dtype).itemsize
    cap = _vmem_capacity_bytes()
    if th is None:
        th = _pick_stripe(H, W, Wp, Ci, Co, out_itemsize, budget=cap // 2)
    th = max(1, int(th))
    n_stripes = -(-H // th)           # cdiv: ragged last stripe is masked in-kernel
    h_pad = n_stripes * th

    # NHWC, zero-padded: rows (2 top, 2 + ragged-tail bottom), cols (1 left,
    # Wp-1-W right), channels to Ci; bf16 for the MXU.
    x = jnp.transpose(x_nchw, (0, 2, 3, 1))
    x = jnp.pad(x, ((0, 0), (2, 2 + h_pad - H), (1, Wp - 1 - W), (0, Ci - Cin)))
    x = x.astype(jnp.bfloat16)
    # Pre-striped halo windows: each grid step DMAs only its (TH+4)-row window.
    xs = jnp.stack([x[:, h * th:h * th + th + 4] for h in range(n_stripes)], axis=1)

    est = _vmem_estimate(th, W, Wp, Ci, Co, out_itemsize)
    vmem_limit = int(min(cap - (1 << 20), max(2 * est, 16 << 20)))

    kernel = functools.partial(_residual_block_kernel,
                               h_total=H, roll_mode=_roll_mode())

    out_nhwc = pl.pallas_call(
        kernel,
        out_shape=jax.ShapeDtypeStruct((N, h_pad, W, Co), out_dtype),
        grid_spec=pltpu.PrefetchScalarGridSpec(
            num_scalar_prefetch=0,
            grid=(N, n_stripes),
            in_specs=[
                pl.BlockSpec((1, 1, th + 4, Wp, Ci), lambda n, h: (n, h, 0, 0, 0)),
                pl.BlockSpec((3, Ci, 3 * Co), lambda n, h: (0, 0, 0)),
                pl.BlockSpec((1, 1, Co), lambda n, h: (0, 0, 0)),
                pl.BlockSpec((3, Co, 3 * Co), lambda n, h: (0, 0, 0)),
                pl.BlockSpec((Ci, Co), lambda n, h: (0, 0)),
                pl.BlockSpec((1, 1, Co), lambda n, h: (0, 0, 0)),
            ],
            out_specs=pl.BlockSpec((1, th, W, Co), lambda n, h: (n, h, 0, 0)),
            scratch_shapes=[pltpu.VMEM((th + 2, Wp, Co), jnp.bfloat16)],
        ),
        compiler_params=pltpu.CompilerParams(
            dimension_semantics=("parallel", "parallel"),
            vmem_limit_bytes=vmem_limit,
        ),
    )(xs, w1, b1p, w2, wd, b2dp)

    # drop ragged rows and zero-padded output channels; back to NCHW
    return jnp.transpose(out_nhwc[:, :H, :, :Cout], (0, 3, 1, 2))


# ----------------------------- pure-JAX reference -----------------------------

def _reference(x_nchw, params):
    x = jnp.transpose(x_nchw, (0, 2, 3, 1))
    dn = ("NHWC", "OIHW", "NHWC")

    def conv(inp, w):
        return lax.conv_general_dilated(inp, w, (1, 1), "SAME",
                                        dimension_numbers=dn)

    def bn(inp, g, b, m, v, eps=1e-5):
        return (inp - m) / jnp.sqrt(v + eps) * g + b

    res = bn(conv(x, params["wd"]), params["gd"], params["bed"],
             params["md"], params["vd"])
    out = jnp.maximum(bn(conv(x, params["w1"]), params["g1"], params["be1"],
                         params["m1"], params["v1"]), 0.0)
    out = bn(conv(out, params["w2"]), params["g2"], params["be2"],
             params["m2"], params["v2"])
    out = jnp.maximum(out + res, 0.0)
    return jnp.transpose(out, (0, 3, 1, 2))


if __name__ == "__main__":
    N, Cin, Cout, H, W = 2, 4, 8, 16, 16
    key = jax.random.PRNGKey(0)
    ks = jax.random.split(key, 16)

    params = {
        # conv weights, PyTorch OIHW shapes
        "w1": jax.random.normal(ks[0], (Cout, Cin, 3, 3), jnp.float32) * 0.1,
        "w2": jax.random.normal(ks[1], (Cout, Cout, 3, 3), jnp.float32) * 0.1,
        "wd": jax.random.normal(ks[2], (Cout, Cin, 1, 1), jnp.float32) * 0.1,
        # bn1
        "g1": 1.0 + 0.1 * jax.random.normal(ks[3], (Cout,), jnp.float32),
        "be1": 0.1 * jax.random.normal(ks[4], (Cout,), jnp.float32),
        "m1": 0.1 * jax.random.normal(ks[5], (Cout,), jnp.float32),
        "v1": 1.0 + 0.1 * jax.random.uniform(ks[6], (Cout,), jnp.float32),
        # bn2
        "g2": 1.0 + 0.1 * jax.random.normal(ks[7], (Cout,), jnp.float32),
        "be2": 0.1 * jax.random.normal(ks[8], (Cout,), jnp.float32),
        "m2": 0.1 * jax.random.normal(ks[9], (Cout,), jnp.float32),
        "v2": 1.0 + 0.1 * jax.random.uniform(ks[10], (Cout,), jnp.float32),
        # downsample bn
        "gd": 1.0 + 0.1 * jax.random.normal(ks[11], (Cout,), jnp.float32),
        "bed": 0.1 * jax.random.normal(ks[12], (Cout,), jnp.float32),
        "md": 0.1 * jax.random.normal(ks[13], (Cout,), jnp.float32),
        "vd": 1.0 + 0.1 * jax.random.uniform(ks[14], (Cout,), jnp.float32),
    }

    x = jax.random.normal(ks[15], (N, Cin, H, W), jnp.float32)
    ref = _reference(x, params)

    # th=8: two even stripes (interior halo path); th=6: three stripes with a ragged,
    # mask-handled final stripe (H % th != 0 path).
    for th in (8, 6):
        out = jax.block_until_ready(residual_block(x, params, th=th))
        assert out.shape == (N, Cout, H, W)
        # bf16 MXU inputs (f32 accumulation): compare against the f32 reference loosely.
        assert jnp.allclose(out, ref, rtol=5e-2, atol=5e-2), f"mismatch (th={th})"

    print("KERNEL_OK")
</pallas_src>

<mosaic_0001>
module attributes {stable_mosaic.version = 11 : i64} {
  func.func @_k(%arg0: memref<8x24x128xf32, #tpu.memory_space<vmem>>, %arg1: memref<8x24x128xf32, #tpu.memory_space<vmem>>) attributes {dimension_semantics = [], scalar_prefetch = 0 : i64, scratch_operands = 0 : i64, tpu.core_type = #tpu.core_type<tc>} {
    %c0 = arith.constant 0 : index
    %c0_0 = arith.constant 0 : index
    %c0_1 = arith.constant 0 : index
    %0 = vector.load %arg0[%c0, %c0_0, %c0_1] : memref<8x24x128xf32, #tpu.memory_space<vmem>>, vector<8x24x128xf32>
    %c1_i32 = arith.constant 1 : i32
    %1 = tpu.dynamic_rotate %0 by %c1_i32 dim 1 : vector<8x24x128xf32>, i32 -> vector<8x24x128xf32>
    %c0_2 = arith.constant 0 : index
    %c0_3 = arith.constant 0 : index
    %c0_4 = arith.constant 0 : index
    %2 = vector.load %arg1[%c0_2, %c0_3, %c0_4] : memref<8x24x128xf32, #tpu.memory_space<vmem>>, vector<8x24x128xf32>
    tpu.vector_store %arg1[%c0_2, %c0_3, %c0_4], %1 {strides = array<i32>} : memref<8x24x128xf32, #tpu.memory_space<vmem>>, vector<8x24x128xf32>,
    return
  }
}

module attributes {stable_mosaic.version = 11 : i64} {
  func.func @_residual_block_kernel(%arg0: i32, %arg1: i32, %arg2: memref<1x1x12x24x128xbf16, #tpu.memory_space<vmem>>, %arg3: memref<3x128x384xbf16, #tpu.memory_space<vmem>>, %arg4: memref<1x1x128xf32, #tpu.memory_space<vmem>>, %arg5: memref<3x128x384xbf16, #tpu.memory_space<vmem>>, %arg6: memref<128x128xbf16, #tpu.memory_space<vmem>>, %arg7: memref<1x1x128xf32, #tpu.memory_space<vmem>>, %arg8: memref<1x8x16x128xf32, #tpu.memory_space<vmem>>, %arg9: memref<10x24x128xbf16, #tpu.memory_space<vmem>>) attributes {dimension_semantics = [#tpu.dimension_semantics<parallel>, #tpu.dimension_semantics<parallel>], iteration_bounds = array<i64: 2, 2>, scalar_prefetch = 0 : i64, scratch_operands = 1 : i64, tpu.core_type = #tpu.core_type<tc>, window_params = [{transform_indices = @transform_0, window_bounds = array<i64: 1, 1, 12, 24, 128>}, {pipeline_mode = #tpu.pipeline_mode<synchronous>, transform_indices = @transform_1, window_bounds = array<i64: 3, 128, 384>}, {pipeline_mode = #tpu.pipeline_mode<synchronous>, transform_indices = @transform_2, window_bounds = array<i64: 1, 1, 128>}, {pipeline_mode = #tpu.pipeline_mode<synchronous>, transform_indices = @transform_3, window_bounds = array<i64: 3, 128, 384>}, {pipeline_mode = #tpu.pipeline_mode<synchronous>, transform_indices = @transform_4, window_bounds = array<i64: 128, 128>}, {pipeline_mode = #tpu.pipeline_mode<synchronous>, transform_indices = @transform_5, window_bounds = array<i64: 1, 1, 128>}, {transform_indices = @transform_6, window_bounds = array<i64: 1, 8, 16, 128>}]} {
    %c0 = arith.constant 0 : index
    %c0_0 = arith.constant 0 : index
    %c0_1 = arith.constant 0 : index
    %c0_2 = arith.constant 0 : index
    %c0_3 = arith.constant 0 : index
    %0 = vector.load %arg2[%c0, %c0_0, %c0_1, %c0_2, %c0_3] : memref<1x1x12x24x128xbf16, #tpu.memory_space<vmem>>, vector<1x1x10x24x128xbf16>
    %1 = vector.shape_cast %0 : vector<1x1x10x24x128xbf16> to vector<10x24x128xbf16>
    %2 = vector.shape_cast %1 : vector<10x24x128xbf16> to vector<240x128xbf16>
    %c0_4 = arith.constant 0 : index
    %c0_5 = arith.constant 0 : index
    %c0_6 = arith.constant 0 : index
    %3 = vector.load %arg3[%c0_4, %c0_5, %c0_6] : memref<3x128x384xbf16, #tpu.memory_space<vmem>>, vector<1x128x384xbf16>
    %4 = vector.shape_cast %3 : vector<1x128x384xbf16> to vector<128x384xbf16>
    %cst = arith.constant dense<0.000000e+00> : vector<240x384xf32>
    %5 = tpu.matmul %2, %4, %cst {dimension_numbers = #tpu.dot_dimension_numbers<[1], [0], [0], [1], [0, 0, 1, 1], [], []>} : vector<240x128xbf16>, vector<128x384xbf16>, vector<240x384xf32> -> vector<240x384xf32>
    %c0_7 = arith.constant 0 : index
    %c0_8 = arith.constant 0 : index
    %c1 = arith.constant 1 : index
    %c0_9 = arith.constant 0 : index
    %c0_10 = arith.constant 0 : index
    %6 = vector.load %arg2[%c0_7, %c0_8, %c1, %c0_9, %c0_10] : memref<1x1x12x24x128xbf16, #tpu.memory_space<vmem>>, vector<1x1x10x24x128xbf16>
    %7 = vector.shape_cast %6 : vector<1x1x10x24x128xbf16> to vector<10x24x128xbf16>
    %8 = vector.shape_cast %7 : vector<10x24x128xbf16> to vector<240x128xbf16>
    %c1_11 = arith.constant 1 : index
    %c0_12 = arith.constant 0 : index
    %c0_13 = arith.constant 0 : index
    %9 = vector.load %arg3[%c1_11, %c0_12, %c0_13] : memref<3x128x384xbf16, #tpu.memory_space<vmem>>, vector<1x128x384xbf16>
    %10 = vector.shape_cast %9 : vector<1x128x384xbf16> to vector<128x384xbf16>
    %cst_14 = arith.constant dense<0.000000e+00> : vector<240x384xf32>
    %11 = tpu.matmul %8, %10, %cst_14 {dimension_numbers = #tpu.dot_dimension_numbers<[1], [0], [0], [1], [0, 0, 1, 1], [], []>} : vector<240x128xbf16>, vector<128x384xbf16>, vector<240x384xf32> -> vector<240x384xf32>
    %12 = arith.addf %5, %11 : vector<240x384xf32>
    %13 = vector.extract_strided_slice %8 {offsets = [24, 0], sizes = [192, 128], strides = [1, 1]} : vector<240x128xbf16> to vector<192x128xbf16>
    %c0_15 = arith.constant 0 : index
    %c0_16 = arith.constant 0 : index
    %14 = vector.load %arg6[%c0_15, %c0_16] : memref<128x128xbf16, #tpu.memory_space<vmem>>, vector<128x128xbf16>
    %cst_17 = arith.constant dense<0.000000e+00> : vector<192x128xf32>
    %15 = tpu.matmul %13, %14, %cst_17 {dimension_numbers = #tpu.dot_dimension_numbers<[1], [0], [0], [1], [0, 0, 1, 1], [], []>} : vector<192x128xbf16>, vector<128x128xbf16>, vector<192x128xf32> -> vector<192x128xf32>
    %c0_18 = arith.constant 0 : index
    %c0_19 = arith.constant 0 : index
    %c2 = arith.constant 2 : index
    %c0_20 = arith.constant 0 : index
    %c0_21 = arith.constant 0 : index
    %16 = vector.load %arg2[%c0_18, %c0_19, %c2, %c0_20, %c0_21] : memref<1x1x12x24x128xbf16, #tpu.memory_space<vmem>>, vector<1x1x10x24x128xbf16>
    %17 = vector.shape_cast %16 : vector<1x1x10x24x128xbf16> to vector<10x24x128xbf16>
    %18 = vector.shape_cast %17 : vector<10x24x128xbf16> to vector<240x128xbf16>
    %c2_22 = arith.constant 2 : index
    %c0_23 = arith.constant 0 : index
    %c0_24 = arith.constant 0 : index
    %19 = vector.load %arg3[%c2_22, %c0_23, %c0_24] : memref<3x128x384xbf16, #tpu.memory_space<vmem>>, vector<1x128x384xbf16>
    %20 = vector.shape_cast %19 : vector<1x128x384xbf16> to vector<128x384xbf16>
    %cst_25 = arith.constant dense<0.000000e+00> : vector<240x384xf32>
    %21 = tpu.matmul %18, %20, %cst_25 {dimension_numbers = #tpu.dot_dimension_numbers<[1], [0], [0], [1], [0, 0, 1, 1], [], []>} : vector<240x128xbf16>, vector<128x384xbf16>, vector<240x384xf32> -> vector<240x384xf32>
    %22 = arith.addf %12, %21 : vector<240x384xf32>
    %23 = vector.shape_cast %22 : vector<240x384xf32> to vector<10x24x384xf32>
    %24 = vector.extract_strided_slice %23 {offsets = [0, 0, 0], sizes = [10, 24, 128], strides = [1, 1, 1]} : vector<10x24x384xf32> to vector<10x24x128xf32>
    %25 = vector.extract_strided_slice %23 {offsets = [0, 0, 128], sizes = [10, 24, 128], strides = [1, 1, 1]} : vector<10x24x384xf32> to vector<10x24x128xf32>
    %26 = vector.extract_strided_slice %25 {offsets = [0, 1, 0], sizes = [10, 23, 128], strides = [1, 1, 1]} : vector<10x24x128xf32> to vector<10x23x128xf32>
    %27 = vector.extract_strided_slice %25 {offsets = [0, 0, 0], sizes = [10, 1, 128], strides = [1, 1, 1]} : vector<10x24x128xf32> to vector<10x1x128xf32>
    %28 = tpu.concatenate %26, %27 in 1 : vector<10x23x128xf32>, vector<10x1x128xf32> -> vector<10x24x128xf32>
    %29 = arith.addf %24, %28 : vector<10x24x128xf32>
    %30 = vector.extract_strided_slice %23 {offsets = [0, 0, 256], sizes = [10, 24, 128], strides = [1, 1, 1]} : vector<10x24x384xf32> to vector<10x24x128xf32>
    %31 = vector.extract_strided_slice %30 {offsets = [0, 2, 0], sizes = [10, 22, 128], strides = [1, 1, 1]} : vector<10x24x128xf32> to vector<10x22x128xf32>
    %32 = vector.extract_strided_slice %30 {offsets = [0, 0, 0], sizes = [10, 2, 128], strides = [1, 1, 1]} : vector<10x24x128xf32> to vector<10x2x128xf32>
    %33 = tpu.concatenate %31, %32 in 1 : vector<10x22x128xf32>, vector<10x2x128xf32> -> vector<10x24x128xf32>
    %34 = arith.addf %29, %33 : vector<10x24x128xf32>
    %c0_26 = arith.constant 0 : index
    %c0_27 = arith.constant 0 : index
    %c0_28 = arith.constant 0 : index
    %35 = vector.load %arg4[%c0_26, %c0_27, %c0_28] : memref<1x1x128xf32, #tpu.memory_space<vmem>>, vector<1x1x128xf32>
    %36 = vector.broadcast %35 : vector<1x1x128xf32> to vector<10x24x128xf32>
    %37 = arith.addf %34, %36 : vector<10x24x128xf32>
    %cst_29 = arith.constant 0.000000e+00 : f32
    %38 = vector.broadcast %cst_29 : f32 to vector<10x24x128xf32>
    %39 = arith.maximumf %37, %38 : vector<10x24x128xf32>
    %40 = tpu.iota {dimensions = array<i32: 1>} : vector<10x24x128xi32>
    %41 = tpu.iota {dimensions = array<i32: 0>} : vector<10x24x128xi32>
    %c8_i32 = arith.constant 8 : i32
    %42 = arith.muli %arg1, %c8_i32 : i32
    %c1_i32 = arith.constant 1 : i32
    %43 = arith.subi %42, %c1_i32 : i32
    %44 = vector.broadcast %43 : i32 to vector<10x24x128xi32>
    %45 = arith.addi %41, %44 : vector<10x24x128xi32>
    %c16_i32 = arith.constant 16 : i32
    %46 = vector.broadcast %c16_i32 : i32 to vector<10x24x128xi32>
    %47 = arith.cmpi slt, %40, %46 : vector<10x24x128xi32>
    %c0_i32 = arith.constant 0 : i32
    %48 = vector.broadcast %c0_i32 : i32 to vector<10x24x128xi32>
    %49 = arith.cmpi sge, %45, %48 : vector<10x24x128xi32>
    %50 = arith.andi %47, %49 : vector<10x24x128xi1>
    %c16_i32_30 = arith.constant 16 : i32
    %51 = vector.broadcast %c16_i32_30 : i32 to vector<10x24x128xi32>
    %52 = arith.cmpi slt, %45, %51 : vector<10x24x128xi32>
    %53 = arith.andi %50, %52 : vector<10x24x128xi1>
    %cst_31 = arith.constant 0.000000e+00 : f32
    %54 = vector.broadcast %cst_31 : f32 to vector<10x24x128xf32>
    %55 = arith.select %53, %39, %54 : vector<10x24x128xi1>, vector<10x24x128xf32>
    %56 = arith.truncf %55 : vector<10x24x128xf32> to vector<10x24x128xbf16>
    %c0_32 = arith.constant 0 : index
    %c0_33 = arith.constant 0 : index
    %c0_34 = arith.constant 0 : index
    %57 = vector.load %arg9[%c0_32, %c0_33, %c0_34] : memref<10x24x128xbf16, #tpu.memory_space<vmem>>, vector<10x24x128xbf16>
    tpu.vector_store %arg9[%c0_32, %c0_33, %c0_34], %56 {strides = array<i32>} : memref<10x24x128xbf16, #tpu.memory_space<vmem>>, vector<10x24x128xbf16>,
    %c0_35 = arith.constant 0 : index
    %c0_36 = arith.constant 0 : index
    %c0_37 = arith.constant 0 : index
    %58 = vector.load %arg9[%c0_35, %c0_36, %c0_37] : memref<10x24x128xbf16, #tpu.memory_space<vmem>>, vector<8x24x128xbf16>
    %59 = vector.shape_cast %58 : vector<8x24x128xbf16> to vector<192x128xbf16>
    %c0_38 = arith.constant 0 : index
    %c0_39 = arith.constant 0 : index
    %c0_40 = arith.constant 0 : index
    %60 = vector.load %arg5[%c0_38, %c0_39, %c0_40] : memref<3x128x384xbf16, #tpu.memory_space<vmem>>, vector<1x128x384xbf16>
    %61 = vector.shape_cast %60 : vector<1x128x384xbf16> to vector<128x384xbf16>
    %cst_41 = arith.constant dense<0.000000e+00> : vector<192x384xf32>
    %62 = tpu.matmul %59, %61, %cst_41 {dimension_numbers = #tpu.dot_dimension_numbers<[1], [0], [0], [1], [0, 0, 1, 1], [], []>} : vector<192x128xbf16>, vector<128x384xbf16>, vector<192x384xf32> -> vector<192x384xf32>
    %c1_42 = arith.constant 1 : index
    %c0_43 = arith.constant 0 : index
    %c0_44 = arith.constant 0 : index
    %63 = vector.load %arg9[%c1_42, %c0_43, %c0_44] : memref<10x24x128xbf16, #tpu.memory_space<vmem>>, vector<8x24x128xbf16>
    %64 = vector.shape_cast %63 : vector<8x24x128xbf16> to vector<192x128xbf16>
    %c1_45 = arith.constant 1 : index
    %c0_46 = arith.constant 0 : index
    %c0_47 = arith.constant 0 : index
    %65 = vector.load %arg5[%c1_45, %c0_46, %c0_47] : memref<3x128x384xbf16, #tpu.memory_space<vmem>>, vector<1x128x384xbf16>
    %66 = vector.shape_cast %65 : vector<1x128x384xbf16> to vector<128x384xbf16>
    %cst_48 = arith.constant dense<0.000000e+00> : vector<192x384xf32>
    %67 = tpu.matmul %64, %66, %cst_48 {dimension_numbers = #tpu.dot_dimension_numbers<[1], [0], [0], [1], [0, 0, 1, 1], [], []>} : vector<192x128xbf16>, vector<128x384xbf16>, vector<192x384xf32> -> vector<192x384xf32>
    %68 = arith.addf %62, %67 : vector<192x384xf32>
    %c2_49 = arith.constant 2 : index
    %c0_50 = arith.constant 0 : index
    %c0_51 = arith.constant 0 : index
    %69 = vector.load %arg9[%c2_49, %c0_50, %c0_51] : memref<10x24x128xbf16, #tpu.memory_space<vmem>>, vector<8x24x128xbf16>
    %70 = vector.shape_cast %69 : vector<8x24x128xbf16> to vector<192x128xbf16>
    %c2_52 = arith.constant 2 : index
    %c0_53 = arith.constant 0 : index
    %c0_54 = arith.constant 0 : index
    %71 = vector.load %arg5[%c2_52, %c0_53, %c0_54] : memref<3x128x384xbf16, #tpu.memory_space<vmem>>, vector<1x128x384xbf16>
    %72 = vector.shape_cast %71 : vector<1x128x384xbf16> to vector<128x384xbf16>
    %cst_55 = arith.constant dense<0.000000e+00> : vector<192x384xf32>
    %73 = tpu.matmul %70, %72, %cst_55 {dimension_numbers = #tpu.dot_dimension_numbers<[1], [0], [0], [1], [0, 0, 1, 1], [], []>} : vector<192x128xbf16>, vector<128x384xbf16>, vector<192x384xf32> -> vector<192x384xf32>
    %74 = arith.addf %68, %73 : vector<192x384xf32>
    %75 = vector.shape_cast %74 : vector<192x384xf32> to vector<8x24x384xf32>
    %76 = vector.extract_strided_slice %75 {offsets = [0, 0, 0], sizes = [8, 24, 128], strides = [1, 1, 1]} : vector<8x24x384xf32> to vector<8x24x128xf32>
    %77 = vector.extract_strided_slice %76 {offsets = [0, 23, 0], sizes = [8, 1, 128], strides = [1, 1, 1]} : vector<8x24x128xf32> to vector<8x1x128xf32>
    %78 = vector.extract_strided_slice %76 {offsets = [0, 0, 0], sizes = [8, 23, 128], strides = [1, 1, 1]} : vector<8x24x128xf32> to vector<8x23x128xf32>
    %79 = tpu.concatenate %77, %78 in 1 : vector<8x1x128xf32>, vector<8x23x128xf32> -> vector<8x24x128xf32>
    %80 = vector.extract_strided_slice %75 {offsets = [0, 0, 128], sizes = [8, 24, 128], strides = [1, 1, 1]} : vector<8x24x384xf32> to vector<8x24x128xf32>
    %81 = arith.addf %79, %80 : vector<8x24x128xf32>
    %82 = vector.extract_strided_slice %75 {offsets = [0, 0, 256], sizes = [8, 24, 128], strides = [1, 1, 1]} : vector<8x24x384xf32> to vector<8x24x128xf32>
    %83 = vector.extract_strided_slice %82 {offsets = [0, 1, 0], sizes = [8, 23, 128], strides = [1, 1, 1]} : vector<8x24x128xf32> to vector<8x23x128xf32>
    %84 = vector.extract_strided_slice %82 {offsets = [0, 0, 0], sizes = [8, 1, 128], strides = [1, 1, 1]} : vector<8x24x128xf32> to vector<8x1x128xf32>
    %85 = tpu.concatenate %83, %84 in 1 : vector<8x23x128xf32>, vector<8x1x128xf32> -> vector<8x24x128xf32>
    %86 = arith.addf %81, %85 : vector<8x24x128xf32>
    %87 = vector.shape_cast %15 : vector<192x128xf32> to vector<8x24x128xf32>
    %88 = vector.extract_strided_slice %87 {offsets = [0, 1, 0], sizes = [8, 23, 128], strides = [1, 1, 1]} : vector<8x24x128xf32> to vector<8x23x128xf32>
    %89 = vector.extract_strided_slice %87 {offsets = [0, 0, 0], sizes = [8, 1, 128], strides = [1, 1, 1]} : vector<8x24x128xf32> to vector<8x1x128xf32>
    %90 = tpu.concatenate %88, %89 in 1 : vector<8x23x128xf32>, vector<8x1x128xf32> -> vector<8x24x128xf32>
    %91 = arith.addf %86, %90 : vector<8x24x128xf32>
    %c0_56 = arith.constant 0 : index
    %c0_57 = arith.constant 0 : index
    %c0_58 = arith.constant 0 : index
    %92 = vector.load %arg7[%c0_56, %c0_57, %c0_58] : memref<1x1x128xf32, #tpu.memory_space<vmem>>, vector<1x1x128xf32>
    %93 = vector.broadcast %92 : vector<1x1x128xf32> to vector<8x24x128xf32>
    %94 = arith.addf %91, %93 : vector<8x24x128xf32>
    %cst_59 = arith.constant 0.000000e+00 : f32
    %95 = vector.broadcast %cst_59 : f32 to vector<8x24x128xf32>
    %96 = arith.maximumf %94, %95 : vector<8x24x128xf32>
    %97 = vector.extract_strided_slice %96 {offsets = [0, 0, 0], sizes = [8, 16, 128], strides = [1, 1, 1]} : vector<8x24x128xf32> to vector<8x16x128xf32>
    %98 = vector.shape_cast %97 : vector<8x16x128xf32> to vector<1x8x16x128xf32>
    %c0_60 = arith.constant 0 : index
    %c0_61 = arith.constant 0 : index
    %c0_62 = arith.constant 0 : index
    %c0_63 = arith.constant 0 : index
    %99 = vector.load %arg8[%c0_60, %c0_61, %c0_62, %c0_63] : memref<1x8x16x128xf32, #tpu.memory_space<vmem>>, vector<1x8x16x128xf32>
    tpu.vector_store %arg8[%c0_60, %c0_61, %c0_62, %c0_63], %98 {strides = array<i32>} : memref<1x8x16x128xf32, #tpu.memory_space<vmem>>, vector<1x8x16x128xf32>,
    return
  }
  func.func @transform_0(%arg0: i32, %arg1: i32) -> (i32, i32, i32, i32, i32) {
    %c0_i32 = arith.constant 0 : i32
    %c0_i32_0 = arith.constant 0 : i32
    %c0_i32_1 = arith.constant 0 : i32
    %c0_i32_2 = arith.constant 0 : i32
    return %arg0, %arg1, %c0_i32, %c0_i32_0, %c0_i32_1 : i32, i32, i32, i32, i32
  }
  func.func @transform_1(%arg0: i32, %arg1: i32) -> (i32, i32, i32) {
    %c0_i32 = arith.constant 0 : i32
    %c0_i32_0 = arith.constant 0 : i32
    %c0_i32_1 = arith.constant 0 : i32
    %c0_i32_2 = arith.constant 0 : i32
    return %c0_i32, %c0_i32_0, %c0_i32_1 : i32, i32, i32
  }
  func.func @transform_2(%arg0: i32, %arg1: i32) -> (i32, i32, i32) {
    %c0_i32 = arith.constant 0 : i32
    %c0_i32_0 = arith.constant 0 : i32
    %c0_i32_1 = arith.constant 0 : i32
    %c0_i32_2 = arith.constant 0 : i32
    return %c0_i32, %c0_i32_0, %c0_i32_1 : i32, i32, i32
  }
  func.func @transform_3(%arg0: i32, %arg1: i32) -> (i32, i32, i32) {
    %c0_i32 = arith.constant 0 : i32
    %c0_i32_0 = arith.constant 0 : i32
    %c0_i32_1 = arith.constant 0 : i32
    %c0_i32_2 = arith.constant 0 : i32
    return %c0_i32, %c0_i32_0, %c0_i32_1 : i32, i32, i32
  }
  func.func @transform_4(%arg0: i32, %arg1: i32) -> (i32, i32) {
    %c0_i32 = arith.constant 0 : i32
    %c0_i32_0 = arith.constant 0 : i32
    %c0_i32_1 = arith.constant 0 : i32
    return %c0_i32, %c0_i32_0 : i32, i32
  }
  func.func @transform_5(%arg0: i32, %arg1: i32) -> (i32, i32, i32) {
    %c0_i32 = arith.constant 0 : i32
    %c0_i32_0 = arith.constant 0 : i32
    %c0_i32_1 = arith.constant 0 : i32
    %c0_i32_2 = arith.constant 0 : i32
    return %c0_i32, %c0_i32_0, %c0_i32_1 : i32, i32, i32
  }
  func.func @transform_6(%arg0: i32, %arg1: i32) -> (i32, i32, i32, i32) {
    %c0_i32 = arith.constant 0 : i32
    %c0_i32_0 = arith.constant 0 : i32
    %c0_i32_1 = arith.constant 0 : i32
    return %arg0, %arg1, %c0_i32, %c0_i32_0 : i32, i32, i32, i32
  }
}

</mosaic_0001>

<bundles_post_ra>
// kernel: tpu_custom_call.1
= control target key start
LH: loop header
LB: loop body
LE: loop exit
PB: predicated region body
PF: predicated region fallthrough
CT: control target
= control target key end

     0   :  { %6 = vsyncpa [#allocation3], 0  ;;  %s276_s0 = inlined_call_operand.hbm [shape: f32[8,24,128], index: 0, kind: input, shape index: {}]   ;;  %s277_s1 = inlined_call_operand.hbm [shape: f32[8,24,128], index: 1, kind: output, shape index: {}]  }
   0x1   :  { %7 = vsyncpa [#allocation4], 0  ;;  %s12_s8 = sshll.u32 %s276_s0, 4  ;;  %s199_s9 = smov [#allocation2]   ;;  %s13_s8 = int_to_ptr.hbm [resolvable:$true] %s12_s8 }
   0x2   :  { %s14_s10 = sshll.u32 %s199_s9, 4  ;;  %s200_s11 = smov 128   ;;  %s15_s10 = int_to_ptr.vmem [resolvable:$true] %s14_s10 }
   0x3   :  { %s201_s12 = smov 8  }
   0x4   :  { %20 = dma.hbm_to_vmem [thread:$0]  %s13_s8, 3072, %s15_s10, [#allocation3], %s200_s11, %s200_s11, %s201_s12  }
   0x5   :  { %195 = dma.done.wait [#allocation3], 3072  }
   0x6   :  { %196 = vsyncadd [#allocation3], 4294964224  ;;  %v73_v0 = vlaneseq  ;;  %v25_v2 = vld [vmem:[#allocation2] sm:$0xff]  ;;  %v27_v3 = vld [vmem:[#allocation2 + $0x10] sm:$0xff]  ;;  %s202_s0 = smov [#allocation5]   ;;  %s130_s16 = sshll.u32 %s277_s1, 4  ;;  %s131_s16 = int_to_ptr.hbm [resolvable:$true] %s130_s16 }
   0x7   :  { %v26_v4 = vld [vmem:[#allocation2 + $0x8] sm:$0xff]  ;;  %v49_v5 = vrot.slane %v25_v2, 7  ;;  %v65_v6 = vrot.slane %v27_v3, 7  ;;  %v28_v8 = vld [vmem:[#allocation2 + $0x18] sm:$0xff]  ;;  %v29_v10 = vld [vmem:[#allocation2 + $0x20] sm:$0xff]  ;;  %s128_s13 = sshll.u32 %s202_s0, 4  ;;  %s129_s13 = int_to_ptr.vmem [resolvable:$true] %s128_s13 }
   0x8   :  { %v219_v1 = vshrl.u32 %v73_v0, 7  ;;  %v57_v7 = vrot.slane %v26_v4, 7  ;;  %v30_v9 = vld [vmem:[#allocation2 + $0x28] sm:$0xff]  ;;  %v50_v11 = vrot.slane %v28_v8, 7  ;;  %v58_v13 = vrot.slane %v29_v10, 7  ;;  %v31_v14 = vld [vmem:[#allocation2 + $0x30] sm:$0xff] }
   0x9   :  { %v66_v12 = vrot.slane %v30_v9, 7  ;;  %v33_v15 = vld [vmem:[#allocation2 + $0x40] sm:$0xff]  ;;  %v32_v16 = vld [vmem:[#allocation2 + $0x38] sm:$0xff]  ;;  %v51_v20 = vrot.slane %v31_v14, 7  ;;  %v34_v21 = vld [vmem:[#allocation2 + $0x48] sm:$0xff] }
   0xa   :  { %vm75_vm0 = vcmp.lt.s32.totalorder %v219_v1, 1  ;;  %v36_v22 = vld [vmem:[#allocation2 + $0x58] sm:$0xff]  ;;  %v67_v24 = vrot.slane %v33_v15, 7  ;;  %v35_v25 = vld [vmem:[#allocation2 + $0x50] sm:$0xff]  ;;  %v59_v27 = vrot.slane %v32_v16, 7  ;;  %v52_v29 = vrot.slane %v34_v21, 7 }
   0xb   :  { %v92_v17 = vsel %vm75_vm0, %v65_v6, %v49_v5  ;;  %v84_v18 = vsel %vm75_vm0, %v49_v5, %v57_v7  ;;  %v76_v19 = vsel %vm75_vm0, %v57_v7, %v65_v6  ;;  %v93_v23 = vsel %vm75_vm0, %v66_v12, %v50_v11  ;;  %v37_v31 = vld [vmem:[#allocation2 + $0x60] sm:$0xff]  ;;  %v39_v32 = vld [vmem:[#allocation2 + $0x70] sm:$0xff]  ;;  %v38_v35 = vld [vmem:[#allocation2 + $0x68] sm:$0xff] }
   0xc   :  { %100 = vst [vmem:[#allocation5] sm:$0xff] %v92_v17  ;;  %v85_v26 = vsel %vm75_vm0, %v50_v11, %v58_v13  ;;  %v77_v28 = vsel %vm75_vm0, %v58_v13, %v66_v12  ;;  %v68_v30 = vrot.slane %v36_v22, 7  ;;  %v94_v33 = vsel %vm75_vm0, %v67_v24, %v51_v20  ;;  %v40_v40 = vld [vmem:[#allocation2 + $0x78] sm:$0xff]  ;;  %v42_v41 = vld [vmem:[#allocation2 + $0x88] sm:$0xff]  ;;  %v41_v44 = vld [vmem:[#allocation2 + $0x80] sm:$0xff] }
   0xd   :  { %101 = vst [vmem:[#allocation5 + $0x8] sm:$0xff] %v84_v18  ;;  %v60_v34 = vrot.slane %v35_v25, 7  ;;  %v86_v36 = vsel %vm75_vm0, %v51_v20, %v59_v27  ;;  %v78_v37 = vsel %vm75_vm0, %v59_v27, %v67_v24  ;;  %v53_v38 = vrot.slane %v37_v31, 7  ;;  %v43_v49 = vld [vmem:[#allocation2 + $0x90] sm:$0xff]  ;;  %v45_v50 = vld [vmem:[#allocation2 + $0xa0] sm:$0xff]  ;;  %v44_v53 = vld [vmem:[#allocation2 + $0x98] sm:$0xff] }
   0xe   :  { %102 = vst [vmem:[#allocation5 + $0x10] sm:$0xff] %v76_v19  ;;  %v69_v39 = vrot.slane %v39_v32, 7  ;;  %v95_v42 = vsel %vm75_vm0, %v68_v30, %v52_v29  ;;  %v61_v43 = vrot.slane %v38_v35, 7  ;;  %v54_v47 = vrot.slane %v40_v40, 7  ;;  %v46_v58 = vld [vmem:[#allocation2 + $0xa8] sm:$0xff]  ;;  %v48_v59 = vld [vmem:[#allocation2 + $0xb8] sm:$0xff] }
   0xf   :  { %103 = vst [vmem:[#allocation5 + $0x18] sm:$0xff] %v93_v23  ;;  %v87_v45 = vsel %vm75_vm0, %v52_v29, %v60_v34  ;;  %v79_v46 = vsel %vm75_vm0, %v60_v34, %v68_v30  ;;  %v70_v48 = vrot.slane %v42_v41, 7  ;;  %v62_v52 = vrot.slane %v41_v44, 7  ;;  %v47_v62 = vld [vmem:[#allocation2 + $0xb0] sm:$0xff] }
  0x10   :  { %104 = vst [vmem:[#allocation5 + $0x20] sm:$0xff] %v85_v26  ;;  %v96_v51 = vsel %vm75_vm0, %v69_v39, %v53_v38  ;;  %v88_v54 = vsel %vm75_vm0, %v53_v38, %v61_v43  ;;  %v80_v55 = vsel %vm75_vm0, %v61_v43, %v69_v39  ;;  %v55_v56 = vrot.slane %v43_v49, 7 }
  0x11   :  { %105 = vst [vmem:[#allocation5 + $0x28] sm:$0xff] %v77_v28  ;;  %v71_v57 = vrot.slane %v45_v50, 7  ;;  %v97_v60 = vsel %vm75_vm0, %v70_v48, %v54_v47  ;;  %v63_v61 = vrot.slane %v44_v53, 7  ;;  %v89_v63 = vsel %vm75_vm0, %v54_v47, %v62_v52 }
  0x12   :  { %106 = vst [vmem:[#allocation5 + $0x30] sm:$0xff] %v94_v33  ;;  %v81_v0 = vsel %vm75_vm0, %v62_v52, %v70_v48  ;;  %v56_v2 = vrot.slane %v46_v58, 7  ;;  %v72_v3 = vrot.slane %v48_v59, 7  ;;  %v64_v5 = vrot.slane %v47_v62, 7 }
  0x13   :  { %107 = vst [vmem:[#allocation5 + $0x38] sm:$0xff] %v86_v36  ;;  %v98_v4 = vsel %vm75_vm0, %v71_v57, %v55_v56  ;;  %v90_v6 = vsel %vm75_vm0, %v55_v56, %v63_v61  ;;  %v82_v7 = vsel %vm75_vm0, %v63_v61, %v71_v57 }
  0x14   :  { %108 = vst [vmem:[#allocation5 + $0x40] sm:$0xff] %v78_v37  ;;  %v99_v8 = vsel %vm75_vm0, %v72_v3, %v56_v2  ;;  %v91_v9 = vsel %vm75_vm0, %v56_v2, %v64_v5  ;;  %v83_v10 = vsel %vm75_vm0, %v64_v5, %v72_v3 }
  0x15   :  { %109 = vst [vmem:[#allocation5 + $0x48] sm:$0xff] %v95_v42 }
  0x16   :  { %110 = vst [vmem:[#allocation5 + $0x50] sm:$0xff] %v87_v45 }
  0x17   :  { %111 = vst [vmem:[#allocation5 + $0x58] sm:$0xff] %v79_v46 }
  0x18   :  { %112 = vst [vmem:[#allocation5 + $0x60] sm:$0xff] %v96_v51 }
  0x19   :  { %113 = vst [vmem:[#allocation5 + $0x68] sm:$0xff] %v88_v54 }
  0x1a   :  { %114 = vst [vmem:[#allocation5 + $0x70] sm:$0xff] %v80_v55 }
  0x1b   :  { %115 = vst [vmem:[#allocation5 + $0x78] sm:$0xff] %v97_v60 }
  0x1c   :  { %116 = vst [vmem:[#allocation5 + $0x80] sm:$0xff] %v89_v63 }
  0x1d   :  { %117 = vst [vmem:[#allocation5 + $0x88] sm:$0xff] %v81_v0 }
  0x1e   :  { %118 = vst [vmem:[#allocation5 + $0x90] sm:$0xff] %v98_v4 }
  0x1f   :  { %119 = vst [vmem:[#allocation5 + $0x98] sm:$0xff] %v90_v6 }
  0x20   :  { %120 = vst [vmem:[#allocation5 + $0xa0] sm:$0xff] %v82_v7 }
  0x21   :  { %121 = vst [vmem:[#allocation5 + $0xa8] sm:$0xff] %v99_v8 }
  0x22   :  { %122 = vst [vmem:[#allocation5 + $0xb0] sm:$0xff] %v91_v9 }
  0x23   :  { %123 = vst [vmem:[#allocation5 + $0xb8] sm:$0xff] %v83_v10 }
  0x24   :  { %136 = dma.vmem_to_hbm [thread:$0]  %s129_s13, 3072, %s131_s16, [#allocation4], %s200_s11, %s200_s11, %s201_s12  }
  0x25   :  { %197 = dma.done.wait [#allocation4], 3072  }
  0x26   :  { %198 = vsyncadd [#allocation4], 4294964224 }
  0x27   :  { %141 = vsyncpa [#allocation3], 1 }
  0x28   :  { %142 = vsyncpa [#allocation4], 1 }

// kernel: tpu_custom_call.1
= control target key start
LH: loop header
LB: loop body
LE: loop exit
PB: predicated region body
PF: predicated region fallthrough
CT: control target
= control target key end

     0   :  { %s8288_s0 = inlined_call_operand.hbm [shape: bf16[2,2,12,24,128], index: 0, kind: input, shape index: {}]   ;;  %s8289_s1 = inlined_call_operand.hbm [shape: bf16[3,128,384], index: 1, kind: input, shape index: {}]   ;;  %s8290_s2 = inlined_call_operand.vmem [shape: f32[1,1,128], index: 2, kind: input, shape index: {}]   ;;  %s8291_s3 = inlined_call_operand.hbm [shape: bf16[3,128,384], index: 3, kind: input, shape index: {}]   ;;  %s8292_s4 = inlined_call_operand.hbm [shape: bf16[128,128], index: 4, kind: input, shape index: {}]   ;;  %s8293_s5 = inlined_call_operand.vmem [shape: f32[1,1,128], index: 5, kind: input, shape index: {}]   ;;  %s8294_s6 = inlined_call_operand.hbm [shape: f32[2,16,16,128], index: 6, kind: output, shape index: {}]  }
   0x1   :  { %8309 = sst [smem:[#allocation110_spill]] %s8289_s1 }
   0x2   :  { %8310 = sst [smem:[#allocation111_spill]] %s8291_s3 }
   0x3   :  { %8311 = sst [smem:[#allocation112_spill]] %s8292_s4 }
   0x4   :  { %11 = vsyncpa [#allocation4], 0 }
   0x5   :  { %13 = vsyncpa [#allocation4 + $0x1], 0 }
   0x6   :  { %14 = vsyncpa [#allocation7], 0 }
   0x7   :  { %15 = vsyncpa [#allocation10], 0 }
   0x8   :  { %16 = vsyncpa [#allocation5], 0 }
   0x9   :  { %18 = vsyncpa [#allocation5 + $0x1], 0  ;;  %s6535_s21 = smov 0   ;;  %s6537_s22 = smov 0  }
   0xa   :  { %s6539_s23 = smov 0   ;;  %s6541_s24 = smov 0  }
   0xb   :  { %s6543_s25 = smov 0   ;;  %s6545_s26 = smov 0  }
   0xc   :  { %s6547_s27 = smov 0   ;;  %s6549_s28 = smov 0  }
   0xd LB: > { %8312 = sst [smem:[#allocation16_spill]] %s6460_s21  ;;  %s4683_s29 = sadd.s32 4294967295, %s6488_s28   ;;  %s6488_s28 = sphi %s6549_s28, %s24_s28   ;;  %s6484_s27 = sphi %s6547_s27, %s8574_s27   ;;  %s6480_s26 = sphi %s6545_s26, %s8568_s26   ;;  %s6476_s25 = sphi %s6543_s25, %s8573_s25   ;;  %s6472_s24 = sphi %s6541_s24, %s8567_s24   ;;  %s6468_s23 = sphi %s6539_s23, %s8572_s23   ;;  %s6464_s22 = sphi %s6537_s22, %s8571_s22   ;;  %s6460_s21 = sphi %s6535_s21, %s8570_s21  }
   0xe   : > { %8313 = sst [smem:[#allocation17_spill]] %s6480_s26  ;;  %s4684_s30 = sadd.s32 4294967294, %s6488_s28  }
   0xf   : > { %8314 = sst [smem:[#allocation18_spill]] %s6488_s28  ;;  %p58_p0 = scmp.ne.s32.totalorder %s6464_s22, %s6460_s21 }
  0x10   : > { %p6579_p1 = scmp.eq.s32.totalorder %s4683_s29, 0  ;;  %p6583_p2 = scmp.eq.s32.totalorder %s4683_s29, 3 }
  0x11   : > { %p195_p3 = scmp.eq.s32.totalorder %s4684_s30, 3  ;;  %p4685_p5 = scmp.ge.s32.totalorder %s6488_s28, 1 }
  0x12   : > { %p6589_p4 = por %p6579_p1, %p58_p0  ;;  %p202_p7 = scmp.lt.s32.totalorder %s6488_s28, 5 }
  0x13   : > { %p6594_p6 = por %p195_p3, %p58_p0  ;;  %s8320_s1 = sld [smem:[#allocation110_spill]] }
  0x14   : > { %p6602_p8 = pnand %p4685_p5, %p202_p7  ;;  %s6490_s15 = smov [#allocation6]  }
  0x15   : > { %s8318_s10 = scalar_select %p6594_p6, 1, 0 }
  0x16   : > { %p6148_p9 = pneg %p6602_p8  ;;  %s215_s16 = sshll.u32 %s6490_s15, 4  ;;  %s216_s16 = int_to_ptr.vmem [resolvable:$true] %s215_s16 }
  0x17   : > { %8319 = sst [smem:[#allocation19_spill]] %s8318_s10  ;;  %s6491_s29 = smov 192  }
  0x18   : > { %p6610_p10 = pnand %p6148_p9, %p6579_p1  ;;  %s8323_s3 = sld [smem:[#allocation111_spill]] }
  0x19   : > { %s213_s13 = sshll.u32 %s8320_s1, 4  ;;  %s6492_s30 = smov 12   ;;  %s214_s13 = int_to_ptr.hbm [resolvable:$true] %s213_s13 }
  0x1a   : > { %6151 = dma.hbm_to_vmem [thread:$0]  (!%p6610_p10), %s214_s13, 9216, %s216_s16, [#allocation7], %s6491_s29, %s6491_s29, %s6492_s30  }
  0x1b   : > { %s6493_s11 = smov [#allocation8]   ;;  %s8324_s4 = sld [smem:[#allocation112_spill]] }
  0x1c   : > { %s232_s12 = sshll.u32 %s6493_s11, 4  ;;  %s6494_s19 = smov [#allocation9]   ;;  %s233_s12 = int_to_ptr.vmem [resolvable:$true] %s232_s12 }
  0x1d   : > { %s8295_s13 = smov 64   ;;  %s8296_s16 = smov 4  }
  0x1e   : > { %s230_s20 = sshll.u32 %s8323_s3, 4  ;;  %s246_s3 = sshll.u32 %s6494_s19, 4  ;;  %s231_s20 = int_to_ptr.hbm [resolvable:$true] %s230_s20  ;;  %s247_s3 = int_to_ptr.vmem [resolvable:$true] %s246_s3 }
  0x1f   : > { %6154 = dma.hbm_to_vmem [thread:$0]  (!%p6610_p10), %s231_s20, 9216, %s233_s12, [#allocation7], %s6491_s29, %s6491_s29, %s6492_s30  }
  0x20   : > { %s33_s1 = sadd.s32 1, %s6480_s26  ;;  %s36_s11 = sadd.s32 1, %s6484_s27 }
  0x21   : > { %s244_s18 = sshll.u32 %s8324_s4, 4  ;;  %p34_p11 = scmp.ge.s32.totalorder %s33_s1, 2  ;;  %s245_s18 = int_to_ptr.hbm [resolvable:$true] %s244_s18 }
  0x22   : > { %6157 = dma.hbm_to_vmem [thread:$0]  (!%p6610_p10), %s245_s18, 1024, %s247_s3, [#allocation10], %s8295_s13, %s8295_s13, %s8296_s16  }
  0x23   : > { %s45_s15 = sadd.s32 1, %s6468_s23  ;;  %p52_p12 = scmp.ne.s32.totalorder %s6468_s23, %s6464_s22 }
  0x24   : > { %s8576_s1 = smov (%p34_p11, %s33_s1), 0  ;;  %s8578_s11 = smov (!%p34_p11, %s36_s11), %s6484_s27 }
  0x25   : > { %8325 = sst [smem:[#allocation20_spill]] %s8576_s1  ;;  %s41_s20 = ssub.s32 %s6480_s26, %s8576_s1 }
  0x26   : > { %p53_p13 = scmp.eq.s32.totalorder %s6488_s28, 0  ;;  %p38_p0 = scmp.ge.s32.totalorder %s8578_s11, 2 }
  0x27   : > { %p6642_p3 = por %p6583_p2, %p52_p12  ;;  %p6169_p7 = scmp.lt.s32.totalorder %s6488_s28, 4 }
  0x28   : > { %p54_p5 = por %p53_p13, %p52_p12  ;;  %s8580_s11 = smov (%p38_p0, %s8578_s11), 0 }
  0x29   : > { %s8326_s17 = scalar_select %p6642_p3, 1, 0 }
  0x2a   : > { %8328 = sst [smem:[#allocation22_spill]] %s8580_s11  ;;  %s263_s3 = sand.u32 1, %s6468_s23  }
  0x2b   : > { %8327 = sst [smem:[#allocation21_spill]] %s8326_s17  ;;  %s6129_s29 = smul.u32 36, %s6480_s26 }
  0x2c   : > { %s40_s30 = ssub.s32 %s6484_s27, %s8580_s11  ;;  %s6128_s18 = smul.u32 144, %s263_s3 }
  0x2d   : > { %s42_s12 = sor.u32 %s41_s20, %s40_s30  ;;  %s6130_s19 = smul.u32 72, %s6484_s27 }
  0x2e   : > { %p43_p9 = scmp.eq.s32.totalorder %s42_s12, 0  ;;  %p6159_p10 = pnand %p6169_p7, %p54_p5 }
  0x2f   : > { %s272_s8 = sadd.s32 %s6130_s19, %s6129_s29  ;;  %s267_s16 = scalar_lea.vmem [#allocation3], %s6128_s18 }
  0x30   : > { %s6655_s13 = scalar_select %p43_p9, %s6468_s23, %s45_s15  }
  0x31   : > { %s277_s4 = sshll.u32 %s267_s16, 4  ;;  %s4690_s1 = sshll.u32 %s272_s8, 2  ;;  %s278_s4 = int_to_ptr.vmem [resolvable:$true] %s277_s4 }
  0x32   : > { %s274_s28 = scalar_lea.hbm %s8288_s0, %s4690_s1  ;;  %s264_s26 = scalar_lea.sflag [#allocation4], %s263_s3 }
  0x33   : > { %s275_s17 = sshll.u32 %s274_s28, 4  ;;  %s8329_s11 = smov 4   ;;  %s276_s17 = int_to_ptr.hbm [resolvable:$true] %s275_s17 }
  0x34   : > { %s8330_s20 = smov 64   ;;  %289 = sbr.rel (%p6602_p8) target bundleno = 1590 (0x636), region = 44 }
  0x35   : > { %6161 = dma.hbm_to_vmem [thread:$0]  (!%p6159_p10), %s276_s17, 2304, %s278_s4, %s264_s26, %s8330_s20, %s8330_s20, %s8329_s11  }
  0x39   : > { %s6666_s15 = sand.u32 1, %s6464_s22  }
  0x3a   : > { %s6131_s16 = smul.u32 144, %s6666_s15  ;;  %s292_s29 = scalar_lea.sflag [#allocation4], %s6666_s15 }
  0x3c   : > { %s6670_s21 = scalar_lea.vmem [#allocation3], %s6131_s16 }
  0x3d   : > { %6443 = dma.done.wait (%p6589_p4), %s292_s29, 2304  }
  0x3e   : > { %6445 = vsyncadd (%p6589_p4), %s292_s29, 4294964992 }
  0x3f   : > { %6447 = dma.done.wait (%p6579_p1), [#allocation7], 18432  }
  0x40   : > { %6449 = vsyncadd (%p6579_p1), [#allocation7], 4294948864 }
  0x41   : > { %6451 = dma.done.wait (%p6579_p1), [#allocation10], 1024  }
  0x42   : > { %6453 = vsyncadd (%p6579_p1), [#allocation10], 4294966272  ;;  %v4820_v0 = vld [vmem:[#allocation6 + $0x168] sm:$0xf]  ;;  %v5708_v1 = vld [vmem:[#allocation6 + $0x170] sm:$0xf0] }
  0x43   : > { %v5707_v2 = vld [vmem:[#allocation6 + $0x16c] sm:$0xf]  ;;  %v4821_v3 = vor.u32 %v5708_v1, %v4820_v0  ;;  %v4822_v4 = vld [vmem:[#allocation6 + $0x174] sm:$0xf0]  ;;  %v4828_v5 = vld [vmem:[#allocation6 + $0x170] sm:$0xf] }
  0x44   : > { %v5709_v6 = vld [vmem:[#allocation6 + $0x178] sm:$0xf0]  ;;  %v6684_v7 = vor.u32 %v5707_v2, %v4822_v4  ;;  %v4976_v9 = vld [vmem:[#allocation6 + $0xa8] sm:$0xf]  ;;  %v5682_v10 = vld [vmem:[#allocation6 + $0xb0] sm:$0xf0] }
  0x45   : > { %v6686_v8 = vor.u32 %v5709_v6, %v4828_v5  ;;  %v4808_v11 = vld [vmem:[#allocation6 + $0x150] sm:$0xf]  ;;  %685 = vmatpush.bf16.msra.mxu0 %v4821_v3  ;;  %v6688_v12 = vor.u32 %v5682_v10, %v4976_v9  ;;  %v5705_v13 = vld [vmem:[#allocation6 + $0x158] sm:$0xf0]  ;;  %v5704_v14 = vld [vmem:[#allocation6 + $0x154] sm:$0xf] }
  0x46   : > { %v4810_v15 = vld [vmem:[#allocation6 + $0x15c] sm:$0xf0]  ;;  %6079 = vmatpush.bf16.msra.mxu1 %v6684_v7  ;;  %v4809_v16 = vor.u32 %v5705_v13, %v4808_v11  ;;  %v4816_v18 = vld [vmem:[#allocation6 + $0x158] sm:$0xf]  ;;  %v5706_v19 = vld [vmem:[#allocation6 + $0x160] sm:$0xf0] }
  0x47   : > { %6087 = vmatpush.bf16.msra.mxu2 %v6686_v8  ;;  %v6692_v17 = vor.u32 %v5704_v14, %v4810_v15  ;;  %v4964_v20 = vld [vmem:[#allocation6 + $0x90] sm:$0xf]  ;;  %6095 = vmatpush.bf16.msra.mxu3 %v6688_v12  ;;  %v6695_v21 = vor.u32 %v5706_v19, %v4816_v18  ;;  %v5679_v22 = vld [vmem:[#allocation6 + $0x98] sm:$0xf0]  ;;  %v4796_v23 = vld [vmem:[#allocation6 + $0x138] sm:$0xf] }
  0x48   : > { %v5702_v24 = vld [vmem:[#allocation6 + $0x140] sm:$0xf0]  ;;  %v6697_v25 = vor.u32 %v5679_v22, %v4964_v20  ;;  %v5701_v26 = vld [vmem:[#allocation6 + $0x13c] sm:$0xf]  ;;  %v4798_v27 = vld [vmem:[#allocation6 + $0x144] sm:$0xf0] }
  0x49   : > { %v4804_v28 = vld [vmem:[#allocation6 + $0x140] sm:$0xf]  ;;  %686 = vmatpush.bf16.msra.mxu0 %v4809_v16  ;;  %v4797_v29 = vor.u32 %v5702_v24, %v4796_v23  ;;  %v5703_v30 = vld [vmem:[#allocation6 + $0x148] sm:$0xf0]  ;;  %v4952_v31 = vld [vmem:[#allocation6 + $0x78] sm:$0xf]  ;;  %v6701_v33 = vor.u32 %v5701_v26, %v4798_v27 }
  0x4a   : > { %v5676_v32 = vld [vmem:[#allocation6 + $0x80] sm:$0xf0]  ;;  %6080 = vmatpush.bf16.msra.mxu1 %v6692_v17  ;;  %v6703_v34 = vor.u32 %v5703_v30, %v4804_v28  ;;  %v4784_v35 = vld [vmem:[#allocation6 + $0x120] sm:$0xf]  ;;  %v5699_v36 = vld [vmem:[#allocation6 + $0x128] sm:$0xf0] }
  0x4b   : > { %6088 = vmatpush.bf16.msra.mxu2 %v6695_v21  ;;  %v5698_v37 = vld [vmem:[#allocation6 + $0x124] sm:$0xf]  ;;  %6096 = vmatpush.bf16.msra.mxu3 %v6697_v25  ;;  %v6706_v38 = vor.u32 %v5676_v32, %v4952_v31  ;;  %v4786_v39 = vld [vmem:[#allocation6 + $0x12c] sm:$0xf0]  ;;  %v4792_v40 = vld [vmem:[#allocation6 + $0x128] sm:$0xf]  ;;  %v4785_v44 = vor.u32 %v5699_v36, %v4784_v35 }
  0x4c   : > { %v5700_v41 = vld [vmem:[#allocation6 + $0x130] sm:$0xf0]  ;;  %v4940_v42 = vld [vmem:[#allocation6 + $0x60] sm:$0xf]  ;;  %v5673_v43 = vld [vmem:[#allocation6 + $0x68] sm:$0xf0]  ;;  %v6710_v45 = vor.u32 %v5698_v37, %v4786_v39 }
  0x4d   : > { %687 = vmatpush.bf16.msra.mxu0 %v4797_v29  ;;  %v6712_v46 = vor.u32 %v5700_v41, %v4792_v40  ;;  %v4772_v47 = vld [vmem:[#allocation6 + $0x108] sm:$0xf]  ;;  %v5696_v48 = vld [vmem:[#allocation6 + $0x110] sm:$0xf0]  ;;  %v5695_v49 = vld [vmem:[#allocation6 + $0x10c] sm:$0xf]  ;;  %v6715_v50 = vor.u32 %v5673_v43, %v4940_v42 }
  0x4e   : > { %6081 = vmatpush.bf16.msra.mxu1 %v6701_v33  ;;  %v4774_v51 = vld [vmem:[#allocation6 + $0x114] sm:$0xf0]  ;;  %v4780_v52 = vld [vmem:[#allocation6 + $0x110] sm:$0xf]  ;;  %v5697_v53 = vld [vmem:[#allocation6 + $0x118] sm:$0xf0]  ;;  %v4773_v56 = vor.u32 %v5696_v48, %v4772_v47 }
  0x4f   : > { %6089 = vmatpush.bf16.msra.mxu2 %v6703_v34  ;;  %6097 = vmatpush.bf16.msra.mxu3 %v6706_v38  ;;  %v4928_v54 = vld [vmem:[#allocation6 + $0x48] sm:$0xf]  ;;  %v5670_v55 = vld [vmem:[#allocation6 + $0x50] sm:$0xf0]  ;;  %v6719_v57 = vor.u32 %v5695_v49, %v4774_v51  ;;  %v6721_v58 = vor.u32 %v5697_v53, %v4780_v52  ;;  %v4760_v59 = vld [vmem:[#allocation6 + $0xf0] sm:$0xf] }
  0x50   : > { %v5693_v60 = vld [vmem:[#allocation6 + $0xf8] sm:$0xf0]  ;;  %v5692_v61 = vld [vmem:[#allocation6 + $0xf4] sm:$0xf]  ;;  %v6724_v62 = vor.u32 %v5670_v55, %v4928_v54  ;;  %v4762_v63 = vld [vmem:[#allocation6 + $0xfc] sm:$0xf0] }
  0x51   : > { %688 = vmatpush.bf16.msra.mxu0 %v4785_v44  ;;  %v4768_v0 = vld [vmem:[#allocation6 + $0xf8] sm:$0xf]  ;;  %v5694_v1 = vld [vmem:[#allocation6 + $0x100] sm:$0xf0]  ;;  %v4916_v2 = vld [vmem:[#allocation6 + $0x30] sm:$0xf]  ;;  %v4761_v4 = vor.u32 %v5693_v60, %v4760_v59  ;;  %v4765_v5 = vor.u32 %v5692_v61, %v4762_v63 }
  0x52   : > { %6082 = vmatpush.bf16.msra.mxu1 %v6710_v45  ;;  %v5667_v3 = vld [vmem:[#allocation6 + $0x38] sm:$0xf0]  ;;  %v6728_v6 = vor.u32 %v5694_v1, %v4768_v0  ;;  %v4748_v9 = vld [vmem:[#allocation6 + $0xd8] sm:$0xf]  ;;  %v5690_v10 = vld [vmem:[#allocation6 + $0xe0] sm:$0xf0] }
  0x53   : > { %6090 = vmatpush.bf16.msra.mxu2 %v6712_v46  ;;  %6098 = vmatpush.bf16.msra.mxu3 %v6715_v50  ;;  %v5689_v11 = vld [vmem:[#allocation6 + $0xdc] sm:$0xf]  ;;  %v6731_v13 = vor.u32 %v5667_v3, %v4916_v2  ;;  %v4750_v14 = vld [vmem:[#allocation6 + $0xe4] sm:$0xf0]  ;;  %v4756_v15 = vld [vmem:[#allocation6 + $0xe0] sm:$0xf]  ;;  %v4749_v20 = vor.u32 %v5690_v10, %v4748_v9 }
  0x54   : > { %v5691_v16 = vld [vmem:[#allocation6 + $0xe8] sm:$0xf0]  ;;  %v4904_v18 = vld [vmem:[#allocation6 + $0x18] sm:$0xf]  ;;  %v5664_v19 = vld [vmem:[#allocation6 + $0x20] sm:$0xf0]  ;;  %v4753_v22 = vor.u32 %v5689_v11, %v4750_v14 }
  0x55   : > { %689 = vmatpush.bf16.msra.mxu0 %v4773_v56  ;;  %v4757_v23 = vor.u32 %v5691_v16, %v4756_v15  ;;  %v4736_v24 = vld [vmem:[#allocation6 + $0xc0] sm:$0xf]  ;;  %v5687_v26 = vld [vmem:[#allocation6 + $0xc8] sm:$0xf0]  ;;  %v5686_v27 = vld [vmem:[#allocation6 + $0xc4] sm:$0xf]  ;;  %v6735_v28 = vor.u32 %v5664_v19, %v4904_v18 }
  0x56   : > { %6083 = vmatpush.bf16.msra.mxu1 %v6719_v57  ;;  %v4738_v29 = vld [vmem:[#allocation6 + $0xcc] sm:$0xf0]  ;;  %v4744_v30 = vld [vmem:[#allocation6 + $0xc8] sm:$0xf]  ;;  %v5688_v31 = vld [vmem:[#allocation6 + $0xd0] sm:$0xf0]  ;;  %v4737_v36 = vor.u32 %v5687_v26, %v4736_v24 }
  0x57   : > { %6091 = vmatpush.bf16.msra.mxu2 %v6721_v58  ;;  %6099 = vmatpush.bf16.msra.mxu3 %v6724_v62  ;;  %v4892_v32 = vld [vmem:[#allocation6] sm:$0xf]  ;;  %v5661_v35 = vld [vmem:[#allocation6 + $0x8] sm:$0xf0]  ;;  %v4741_v37 = vor.u32 %v5686_v27, %v4738_v29  ;;  %v4745_v39 = vor.u32 %v5688_v31, %v4744_v30  ;;  %v6755_v44 = vld [vmem:[%s6670_s21 + $0x14] sm:$0xff]   ;;  %vm2218_vm0 = vcmask 1046528  }
  0x58   : > { %v6738_v40 = vor.u32 %v5661_v35, %v4892_v32  ;;  %v6741_v41 = vld [vmem:[%s6670_s21 + $0xc] sm:$0xff]  ;;  %v6106_v42 = vld [vmem:[%s6670_s21 + $0x1c] sm:$0xff]   ;;  %v6108_v47 = vld [vmem:[%s6670_s21 + $0x24] sm:$0xff]   ;;  %vm2379_vm1 = vcmask 1045504   ;;  %s5204_s4 = sshll.u32 %s6472_s24, 3  ;;  %s4695_s11 = sshll.u32 %s6666_s15, 7 }
  0x59   : > { %690 = vmatpush.bf16.msra.mxu0 %v4761_v4  ;;  %v6745_v43 = vld [vmem:[%s6670_s21 + $0x10] sm:$0xff]  ;;  %v6759_v48 = vld [vmem:[%s6670_s21 + $0x18] sm:$0xff]  ;;  %v6792_v51 = vld [vmem:[%s6670_s21 + $0x40] sm:$0xff]  ;;  %s5205_s7 = sadd.s32 4294967295, %s5204_s4  ;;  %s8107_s17 = scalar_lea.vmem [#allocation11], %s4695_s11 }
  0x5a   : > { %6084 = vmatpush.bf16.msra.mxu1 %v4765_v5  ;;  %v6118_v49 = vld [vmem:[%s6670_s21 + $0x4c] sm:$0xff]   ;;  %v6120_v52 = vld [vmem:[%s6670_s21 + $0x54] sm:$0xff]   ;;  %v6803_v55 = vld [vmem:[%s6670_s21 + $0x5c] sm:$0xff]   ;;  %s5865_s3 = sshll.u32 %s6472_s24, 4  ;;  %s5641_s30 = sshll.u32 %s6476_s25, 5 }
  0x5b   : > { %6092 = vmatpush.bf16.msra.mxu2 %v6728_v6  ;;  %6100 = vmatpush.bf16.msra.mxu3 %v6731_v13  ;;  %v6797_v53 = vld [vmem:[%s6670_s21 + $0x48] sm:$0xff]  ;;  %v5755_v11 = vld [vmem:[#allocation6 + $0x230] sm:$0xf0]  ;;  %v5680_v19 = vld [vmem:[#allocation6 + $0xa0] sm:$0xf0]  ;;  %s4558_s12 = sadd.s32 %s5865_s3, %s5641_s30  ;;  %s4561_s20 = sshll.u32 %s8107_s17, 4  ;;  %s4562_s20 = int_to_ptr.vmem [resolvable:$true] %s4561_s20 }
  0x5c   : > { %v5717_v63 = vld [vmem:[#allocation9 + $0x38] sm:$0xff]  ;;  %v5194_v10 = vld [vmem:[#allocation6 + $0x228] sm:$0xf]  ;;  %v5716_v26 = vld [vmem:[#allocation9 + $0x30] sm:$0xff]  ;;  %s5642_s18 = sshll.u32 %s4558_s12, 3  ;;  %s4546_s29 = scalar_lea.sflag [#allocation5], %s6666_s15 }
  0x5d   : > { %691 = vmatpush.bf16.msra.mxu0 %v4749_v20  ;;  %v6822_v3 = vld [vmem:[%s6670_s21 + $0x64] sm:$0xff]   ;;  %v5683_v9 = vld [vmem:[#allocation6 + $0xb8] sm:$0xf0]  ;;  %v5195_v15 = vor.u32 %v5755_v11, %v5194_v10  ;;  %v5182_v20 = vld [vmem:[#allocation6 + $0x210] sm:$0xf]  ;;  %s4560_s19 = scalar_lea.hbm %s8294_s6, %s5642_s18 }
  0x5e   : > { %6085 = vmatpush.bf16.msra.mxu1 %v4753_v22  ;;  %v4972_v18 = vld [vmem:[#allocation6 + $0x98] sm:$0xf]  ;;  %v5752_v27 = vld [vmem:[#allocation6 + $0x218] sm:$0xf0]  ;;  %v4960_v30 = vld [vmem:[#allocation6 + $0x80] sm:$0xf] }
  0x5f   : > { %6093 = vmatpush.bf16.msra.mxu2 %v4757_v23  ;;  %6101 = vmatpush.bf16.msra.mxu3 %v6735_v28  ;;  %v4973_v24 = vor.u32 %v5680_v19, %v4972_v18  ;;  %v5183_v29 = vor.u32 %v5752_v27, %v5182_v20  ;;  %v5677_v31 = vld [vmem:[#allocation6 + $0x88] sm:$0xf0]  ;;  %v5170_v35 = vld [vmem:[#allocation6 + $0x1f8] sm:$0xf]  ;;  %v4936_v11 = vld [vmem:[#allocation6 + $0x50] sm:$0xf] }
  0x60   : > { %v5715_v32 = vld [vmem:[#allocation9 + $0x28] sm:$0xff]  ;;  %v5743_v20 = vld [vmem:[#allocation6 + $0x1d0] sm:$0xf0]  ;;  %v5668_v27 = vld [vmem:[#allocation6 + $0x40] sm:$0xf0]  ;;  %s4563_s16 = sshll.u32 %s4560_s19, 4  ;;  %s4564_s16 = int_to_ptr.hbm [resolvable:$true] %s4563_s16 }
  0x61   : > { %692 = vmatpush.bf16.msra.mxu0 %v4737_v36  ;;  %v5749_v36 = vld [vmem:[#allocation6 + $0x200] sm:$0xf0]  ;;  %v5146_v18 = vld [vmem:[#allocation6 + $0x1c8] sm:$0xf] }
  0x62   : > { %6086 = vmatpush.bf16.msra.mxu1 %v4741_v37 }
  0x63   : > { %6094 = vmatpush.bf16.msra.mxu2 %v4745_v39  ;;  %6102 = vmatpush.bf16.msra.mxu3 %v6738_v40 }
  0x64   : > { %693 = vmatmul.bf16.vlgmr.msra.gmra.mxu0 %v6741_v41 }
  0x65   : > { %769 = vmatpush.bf16.msrb.mxu0 %v6684_v7  ;;  %787 = vmatmul.bf16.vlgmr.msra.gmra.mxu1 %v6106_v42  ;;  %v6110_v7 = vld [vmem:[%s6670_s21 + $0x2c] sm:$0xff]  }
  0x66   : > { %871 = vmatmul.bf16.vlgmr.msra.gmra.mxu2 %v6106_v42  ;;  %1173 = vmatmul.bf16.vlgmr.msra.gmra.mxu3 %v6745_v43 }
  0x67   : > { %1495 = vmatpush.bf16.msrb.mxu2 %v5717_v63  ;;  %1846 = vmatpush.bf16.msrb.mxu3 %v5195_v15  ;;  %v5713_v15 = vld [vmem:[#allocation9 + $0x18] sm:$0xff] }
  0x69   : > { %770 = vmatpush.bf16.msrb.mxu0 %v6692_v17  ;;  %v6767_v17 = vld [vmem:[%s6670_s21 + $0x20] sm:$0xff] }
  0x6b   : > { %1496 = vmatpush.bf16.msrb.mxu2 %v5716_v26  ;;  %1847 = vmatpush.bf16.msrb.mxu3 %v5183_v29  ;;  %v5134_v29 = vld [vmem:[#allocation6 + $0x1b0] sm:$0xf] }
  0x6d   : > { %771 = vmatpush.bf16.msrb.mxu0 %v6701_v33  ;;  %v6112_v33 = vld [vmem:[%s6670_s21 + $0x34] sm:$0xff]  }
  0x6f   : > { %1497 = vmatpush.bf16.msrb.mxu2 %v5715_v32 }
  0x71   : > { %772 = vmatpush.bf16.msrb.mxu0 %v6710_v45  ;;  %v6775_v45 = vld [vmem:[%s6670_s21 + $0x28] sm:$0xff] }
  0x74   : > { %698 = vmatmul.bf16.gmra.mxu0 %v6755_v44 }
  0x75   : > { %773 = vmatpush.bf16.msrb.mxu0 %v6719_v57  ;;  %792 = vmatmul.bf16.gmra.mxu1 %v6108_v47  ;;  %v6808_v57 = vld [vmem:[%s6670_s21 + $0x50] sm:$0xff] }
  0x76   : > { %876 = vmatmul.bf16.gmra.mxu2 %v6108_v47  ;;  %1178 = vmatmul.bf16.gmra.mxu3 %v6759_v48 }
  0x79   : > { %774 = vmatpush.bf16.msrb.mxu0 %v4765_v5  ;;  %v6827_v5 = vld [vmem:[%s6670_s21 + $0x58] sm:$0xff] }
  0x7d   : > { %775 = vmatpush.bf16.msrb.mxu0 %v4753_v22 }
  0x81   : > { %776 = vmatpush.bf16.msrb.mxu0 %v4741_v37 }
  0x84   : > { %703 = vmatmul.bf16.gmra.mxu0 %v6106_v42  ;;  %v5171_v42 = vor.u32 %v5749_v36, %v5170_v35  ;;  %v5712_v35 = vld [vmem:[#allocation9 + $0x10] sm:$0xff]  ;;  %v5740_v36 = vld [vmem:[#allocation6 + $0x1b8] sm:$0xf0] }
  0x85   : > { %853 = vmatpush.bf16.msra.mxu0 %v6686_v8  ;;  %797 = vmatmul.bf16.gmra.mxu1 %v6110_v7  ;;  %v6114_v8 = vld [vmem:[%s6670_s21 + $0x3c] sm:$0xff]  }
  0x86   : > { %881 = vmatmul.bf16.gmra.mxu2 %v6110_v7  ;;  %1183 = vmatmul.bf16.gmra.mxu3 %v6767_v17 }
  0x87   : > { %1848 = vmatpush.bf16.msrb.mxu3 %v5171_v42  ;;  %v5665_v42 = vld [vmem:[#allocation6 + $0x28] sm:$0xf0] }
  0x89   : > { %854 = vmatpush.bf16.msra.mxu0 %v6695_v21  ;;  %v6782_v21 = vld [vmem:[%s6670_s21 + $0x30] sm:$0xff] }
  0x8d   : > { %855 = vmatpush.bf16.msra.mxu0 %v6703_v34  ;;  %v6116_v34 = vld [vmem:[%s6670_s21 + $0x44] sm:$0xff]  }
  0x91   : > { %856 = vmatpush.bf16.msra.mxu0 %v6712_v46  ;;  %v6787_v46 = vld [vmem:[%s6670_s21 + $0x38] sm:$0xff] }
  0x94   : > { %708 = vmatmul.bf16.gmra.mxu0 %v6108_v47 }
  0x95   : > { %857 = vmatpush.bf16.msra.mxu0 %v6721_v58  ;;  %802 = vmatmul.bf16.gmra.mxu1 %v6112_v33 }
  0x96   : > { %886 = vmatmul.bf16.gmra.mxu2 %v6112_v33  ;;  %1188 = vmatmul.bf16.gmra.mxu3 %v6775_v45 }
  0x99   : > { %858 = vmatpush.bf16.msra.mxu0 %v6728_v6  ;;  %v4984_v6 = vld [vmem:[#allocation6 + $0xb0] sm:$0xf] }
  0x9a   : > { %v4985_v14 = vor.u32 %v5683_v9, %v4984_v6  ;;  %v6850_v9 = vld [vmem:[%s6670_s21 + $0x60] sm:$0xff] }
  0x9c   : > { %1323 = vmatpush.bf16.msrb.mxu1 %v4985_v14  ;;  %v5671_v14 = vld [vmem:[#allocation6 + $0x58] sm:$0xf0] }
  0x9d   : > { %859 = vmatpush.bf16.msra.mxu0 %v4757_v23 }
  0xa0   : > { %1324 = vmatpush.bf16.msrb.mxu1 %v4973_v24  ;;  %v5147_v24 = vor.u32 %v5743_v20, %v5146_v18  ;;  %v6127_v20 = vld [vmem:[%s6670_s21 + $0x74] sm:$0xff] }
  0xa1   : > { %860 = vmatpush.bf16.msra.mxu0 %v4745_v39  ;;  %v4961_v39 = vor.u32 %v5677_v31, %v4960_v30 }
  0xa4   : > { %713 = vmatmul.bf16.gmra.mxu0 %v6110_v7  ;;  %1325 = vmatpush.bf16.msrb.mxu1 %v4961_v39  ;;  %v4948_v7 = vld [vmem:[#allocation6 + $0x68] sm:$0xf]  ;;  %v4912_v39 = vld [vmem:[#allocation6 + $0x20] sm:$0xf] }
  0xa5   : > { %807 = vmatmul.bf16.gmra.mxu1 %v6114_v8 }
  0xa6   : > { %891 = vmatmul.bf16.gmra.mxu2 %v6114_v8  ;;  %1193 = vmatmul.bf16.gmra.mxu3 %v6782_v21 }
  0xb4   : > { %718 = vmatmul.bf16.gmra.mxu0 %v6112_v33  ;;  %v5674_v33 = vld [vmem:[#allocation6 + $0x70] sm:$0xf0] }
  0xb5   : > { %812 = vmatmul.bf16.gmra.mxu1 %v6116_v34  ;;  %v4949_v63 = vor.u32 %v5674_v33, %v4948_v7  ;;  %v5135_v7 = vor.u32 %v5740_v36, %v5134_v29  ;;  %v5711_v33 = vld [vmem:[#allocation9 + $0x8] sm:$0xff] }
  0xb6   : > { %896 = vmatmul.bf16.gmra.mxu2 %v6116_v34  ;;  %1198 = vmatmul.bf16.gmra.mxu3 %v6787_v46 }
  0xb7   : > { %1326 = vmatpush.bf16.msrb.mxu1 %v4949_v63  ;;  %v5737_v63 = vld [vmem:[#allocation6 + $0x1a0] sm:$0xf0] }
  0xc4   : > { %723 = vmatmul.bf16.gmra.mxu0 %v6114_v8  ;;  %v5158_v8 = vld [vmem:[#allocation6 + $0x1e0] sm:$0xf] }
  0xc5   : > { %817 = vmatmul.bf16.gmra.mxu1 %v6118_v49 }
  0xc6   : > { %901 = vmatmul.bf16.gmra.mxu2 %v6118_v49  ;;  %1203 = vmatmul.bf16.gmra.mxu3 %v6792_v51 }
  0xd4   : > { %728 = vmatmul.bf16.gmra.mxu0 %v6116_v34 }
  0xd5   : > { %822 = vmatmul.bf16.gmra.mxu1 %v6120_v52 }
  0xd6   : > { %906 = vmatmul.bf16.gmra.mxu2 %v6120_v52  ;;  %1208 = vmatmul.bf16.gmra.mxu3 %v6797_v53 }
  0xe1   : > { %v6800_v54 = vpop.f32.mrf.mxu0 }
  0xe2   : > { %v6805_v56 = vpop.f32.mrf.mxu1 }
  0xe4   : > { %733 = vmatmul.bf16.gmra.mxu0 %v6118_v49 }
  0xe5   : > { %827 = vmatmul.bf16.gmra.mxu1 %v6803_v55 }
  0xe6   : > { %911 = vmatmul.bf16.gmra.mxu2 %v6803_v55  ;;  %1213 = vmatmul.bf16.gmra.mxu3 %v6808_v57 }
  0xe9   : > { %v6813_v58 = vpop.f32.mrf.mxu2  ;;  %v1174_v59 = vpop.f32.mrf.mxu3 }
  0xea   : > { %8331 = vst [vmem:[#allocation23_spill] sm:$0xff] %v6813_v58  ;;  %v6815_v60 = vpop.f32.mrf.mxu0  ;;  %v6817_v61 = vpop.f32.mrf.mxu1 }
  0xf1   : > { %v6819_v0 = vpop.f32.mrf.mxu2  ;;  %v1176_v1 = vpop.f32.mrf.mxu3 }
  0xf2   : > { %8332 = vst [vmem:[#allocation24_spill] sm:$0xff] %v6819_v0  ;;  %v699_v2 = vpop.f32.mrf.mxu0  ;;  %v6824_v4 = vpop.f32.mrf.mxu1  ;;  %v5714_v1 = vld [vmem:[#allocation9 + $0x20] sm:$0xff] }
  0xf3   : > { %v5746_v2 = vld [vmem:[#allocation6 + $0x1e8] sm:$0xf0]  ;;  %1498 = vmatpush.bf16.msrb.mxu2 %v5714_v1  ;;  %v5992_v0 = vld [vmem:[%s6670_s21 + $0x30] sm:$0xff]  }
  0xf4   : > { %738 = vmatmul.bf16.gmra.mxu0 %v6120_v52  ;;  %v6845_v52 = vld [vmem:[%s6670_s21 + $0x6c] sm:$0xff]   ;;  %v5159_v10 = vor.u32 %v5746_v2, %v5158_v8  ;;  %v4913_v8 = vor.u32 %v5665_v42, %v4912_v39 }
  0xf5   : > { %832 = vmatmul.bf16.gmra.mxu1 %v6822_v3 }
  0xf6   : > { %916 = vmatmul.bf16.gmra.mxu2 %v6822_v3  ;;  %1218 = vmatmul.bf16.gmra.mxu3 %v6827_v5 }
  0xf7   : > { %1849 = vmatpush.bf16.msrb.mxu3 %v5159_v10  ;;  %1499 = vmatpush.bf16.msrb.mxu2 %v5713_v15  ;;  %v5110_v15 = vld [vmem:[#allocation6 + $0x180] sm:$0xf] }
  0xf9   : > { %v6832_v16 = vpop.f32.mrf.mxu2  ;;  %v6834_v22 = vpop.f32.mrf.mxu3 }
  0xfa   : > { %8333 = vst [vmem:[#allocation25_spill] sm:$0xff] %v6832_v16  ;;  %v6836_v23 = vpop.f32.mrf.mxu0  ;;  %v6838_v37 = vpop.f32.mrf.mxu1 }
  0xfb   : > { %1850 = vmatpush.bf16.msrb.mxu3 %v5147_v24  ;;  %1500 = vmatpush.bf16.msrb.mxu2 %v5712_v35 }
  0xff   : > { %1851 = vmatpush.bf16.msrb.mxu3 %v5135_v7  ;;  %1501 = vmatpush.bf16.msrb.mxu2 %v5711_v33 }
 0x101   : > { %v6840_v47 = vpop.f32.mrf.mxu2  ;;  %v6842_v34 = vpop.f32.mrf.mxu3 }
 0x102   : > { %8334 = vst [vmem:[#allocation26_spill] sm:$0xff] %v6840_v47  ;;  %v704_v49 = vpop.f32.mrf.mxu0  ;;  %v6855_v19 = vpop.f32.mrf.mxu1  ;;  %v6938_v47 = vld [vmem:[%s6670_s21 + $0x28] sm:$0xff] }
 0x103   : > { %v6847_v6 = vadd.f32 %v1174_v59, %v704_v49  ;;  %v4937_v59 = vor.u32 %v5671_v14, %v4936_v11  ;;  %v5122_v49 = vld [vmem:[#allocation6 + $0x198] sm:$0xf]  ;;  %v4900_v11 = vld [vmem:[#allocation6 + $0x8] sm:$0xf]  ;;  %v5662_v14 = vld [vmem:[#allocation6 + $0x10] sm:$0xf0] }
 0x104   : > { %743 = vmatmul.bf16.gmra.mxu0 %v6803_v55  ;;  %v4924_v55 = vld [vmem:[#allocation6 + $0x38] sm:$0xf]  ;;  %v5123_v1 = vor.u32 %v5737_v63, %v5122_v49  ;;  %v4901_v24 = vor.u32 %v5662_v14, %v4900_v11 }
 0x105   : > { %837 = vmatmul.bf16.gmra.mxu1 %v6845_v52  ;;  %v4925_v32 = vor.u32 %v5668_v27, %v4924_v55  ;;  %v5710_v55 = vld [vmem:[#allocation9] sm:$0xff]  ;;  %v5734_v27 = vld [vmem:[#allocation6 + $0x188] sm:$0xf0] }
 0x106   : > { %921 = vmatmul.bf16.gmra.mxu2 %v6845_v52  ;;  %1223 = vmatmul.bf16.gmra.mxu3 %v6850_v9 }
 0x107   : > { %1327 = vmatpush.bf16.msrb.mxu1 %v4937_v59  ;;  %1852 = vmatpush.bf16.msrb.mxu3 %v5123_v1 }
 0x108   : > { %1502 = vmatpush.bf16.msrb.mxu2 %v5710_v55  ;;  %v6899_v55 = vld [vmem:[%s6670_s21] sm:$0xff] }
 0x109   : > { %v6858_v26 = vpop.f32.mrf.mxu2  ;;  %v1184_v30 = vpop.f32.mrf.mxu3 }
 0x10a   : > { %8335 = vst [vmem:[#allocation27_spill] sm:$0xff] %v6858_v26  ;;  %v706_v31 = vpop.f32.mrf.mxu0  ;;  %v6860_v2 = vpop.f32.mrf.mxu1  ;;  %v6869_v30 = vld [vmem:[%s6670_s21 + $0x68] sm:$0xff] }
 0x10b   : > { %1328 = vmatpush.bf16.msrb.mxu1 %v4925_v32  ;;  %v5111_v31 = vor.u32 %v5734_v27, %v5110_v15  ;;  %v5989_v27 = vld [vmem:[%s6670_s21 + $0x18] sm:$0xff]   ;;  %v5991_v26 = vld [vmem:[%s6670_s21 + $0x28] sm:$0xff]  }
 0x10d   : > { %1853 = vmatpush.bf16.msrb.mxu3 %v5111_v31  ;;  %v6905_v31 = vld [vmem:[%s6670_s21 + $0x18] sm:$0xff] }
 0x10f   : > { %1329 = vmatpush.bf16.msrb.mxu1 %v4913_v8  ;;  %v6884_v8 = vld [vmem:[%s6670_s21 + $0x70] sm:$0xff] }
 0x111   : > { %v6862_v10 = vpop.f32.mrf.mxu2  ;;  %v1186_v18 = vpop.f32.mrf.mxu3 }
 0x112   : > { %8336 = vst [vmem:[#allocation28_spill] sm:$0xff] %v6862_v10  ;;  %v709_v59 = vpop.f32.mrf.mxu0  ;;  %v6875_v36 = vpop.f32.mrf.mxu1 }
 0x113   : > { %v6866_v29 = vadd.f32 %v6834_v22, %v709_v59  ;;  %1330 = vmatpush.bf16.msrb.mxu1 %v4901_v24 }
 0x114   : > { %748 = vmatmul.bf16.gmra.mxu0 %v6822_v3  ;;  %v5685_v3 = vld [vmem:[%s6670_s21 + $0x7c] sm:$0xff] }
 0x115   : > { %842 = vmatmul.bf16.gmra.mxu1 %v6127_v20 }
 0x116   : > { %926 = vmatmul.bf16.gmra.mxu2 %v6127_v20  ;;  %1228 = vmatmul.bf16.gmra.mxu3 %v6869_v30 }
 0x119   : > { %v6873_v32 = vpop.f32.mrf.mxu2  ;;  %v1189_v35 = vpop.f32.mrf.mxu3 }
 0x11a   : > { %8337 = vst [vmem:[#allocation29_spill] sm:$0xff] %v6873_v32  ;;  %v711_v22 = vpop.f32.mrf.mxu0  ;;  %v6886_v49 = vpop.f32.mrf.mxu1 }
 0x11b   : > { %v6878_v39 = vadd.f32 %v6842_v34, %v711_v22  ;;  %8339 = vst [vmem:[#allocation31_spill] sm:$0xff] %v6886_v49 }
 0x121   : > { %v6880_v42 = vpop.f32.mrf.mxu2  ;;  %v1191_v7 = vpop.f32.mrf.mxu3 }
 0x122   : > { %8338 = vst [vmem:[#allocation30_spill] sm:$0xff] %v6880_v42  ;;  %v714_v33 = vpop.f32.mrf.mxu0  ;;  %v6894_v14 = vpop.f32.mrf.mxu1  ;;  %v6924_v42 = vld [vmem:[%s6670_s21 + $0x20] sm:$0xff] }
 0x123   : > { %8342 = vst [vmem:[#allocation34_spill] sm:$0xff] %v6894_v14 }
 0x124   : > { %753 = vmatmul.bf16.gmra.mxu0 %v6845_v52 }
 0x125   : > { %847 = vmatmul.bf16.gmra.mxu1 %v5685_v3 }
 0x126   : > { %931 = vmatmul.bf16.gmra.mxu2 %v5685_v3  ;;  %1233 = vmatmul.bf16.gmra.mxu3 %v6884_v8 }
 0x129   : > { %v6890_v34 = vpop.f32.mrf.mxu2  ;;  %v1194_v63 = vpop.f32.mrf.mxu3 }
 0x12a   : > { %8340 = vst [vmem:[#allocation32_spill] sm:$0xff] %v6890_v34  ;;  %v716_v1 = vpop.f32.mrf.mxu0 }
 0x12b   : > { %v6892_v11 = vadd.f32 %v1186_v18, %v716_v1  ;;  %v6909_v18 = vpop.f32.mrf.mxu1 }
 0x12c   : > { %8344 = vst [vmem:[#allocation36_spill] sm:$0xff] %v6909_v18  ;;  %v7123_v18 = vld [vmem:[%s6670_s21 + $0x78] sm:$0xff] }
 0x12d   : > { %8341 = vst [vmem:[#allocation33_spill] sm:$0xff] %v6892_v11  ;;  %v7161_v11 = vld [vmem:[%s6670_s21 + $0x88] sm:$0xff] }
 0x131   : > { %v6896_v15 = vpop.f32.mrf.mxu2  ;;  %v1196_v59 = vpop.f32.mrf.mxu3 }
 0x132   : > { %8343 = vst [vmem:[#allocation35_spill] sm:$0xff] %v6896_v15  ;;  %v719_v24 = vpop.f32.mrf.mxu0  ;;  %v6916_v15 = vld [vmem:[%s6670_s21 + $0x8] sm:$0xff] }
 0x133   : > { %v6901_v52 = vadd.f32 %v1189_v35, %v719_v24  ;;  %v6918_v34 = vpop.f32.mrf.mxu1 }
 0x134   : > { %758 = vmatmul.bf16.gmra.mxu0 %v6127_v20  ;;  %8347 = vst [vmem:[#allocation39_spill] sm:$0xff] %v6918_v34 }
 0x135   : > { %1331 = vmatmul.bf16.vlgmr.msrb.gmra.mxu1 %v6899_v55 }
 0x136   : > { %1503 = vmatmul.bf16.vlgmr.msrb.gmra.mxu2 %v5989_v27  ;;  %1854 = vmatmul.bf16.vlgmr.msrb.gmra.mxu3 %v6905_v31  ;;  %v5990_v27 = vld [vmem:[%s6670_s21 + $0x20] sm:$0xff]  }
 0x139   : > { %v6911_v22 = vpop.f32.mrf.mxu2  ;;  %v1199_v7 = vpop.f32.mrf.mxu3 }
 0x13a   : > { %8345 = vst [vmem:[#allocation37_spill] sm:$0xff] %v6911_v22  ;;  %v721_v33 = vpop.f32.mrf.mxu0 }
 0x13b   : > { %v6932_v32 = vpop.f32.mrf.mxu1 }
 0x13c   : > { %8350 = vst [vmem:[#allocation42_spill] sm:$0xff] %v6932_v32  ;;  %v6997_v32 = vld [vmem:[%s6670_s21 + $0x40] sm:$0xff] }
 0x13d   : > { %8366 = vst [vmem:[#allocation58_spill] sm:$0xff] %v6997_v32 }
 0x141   : > { %v6913_v1 = vpop.f32.mrf.mxu2  ;;  %v1201_v35 = vpop.f32.mrf.mxu3 }
 0x142   : > { %8346 = vst [vmem:[#allocation38_spill] sm:$0xff] %v6913_v1  ;;  %v724_v24 = vpop.f32.mrf.mxu0 }
 0x143   : > { %v6920_v20 = vadd.f32 %v1194_v63, %v724_v24 }
 0x144   : > { %763 = vmatmul.bf16.gmra.mxu0 %v5685_v3  ;;  %v6942_v3 = vpop.f32.mrf.mxu1 }
 0x145   : > { %1336 = vmatmul.bf16.gmra.mxu1 %v6916_v15  ;;  %8352 = vst [vmem:[#allocation44_spill] sm:$0xff] %v6942_v3  ;;  %v5994_v3 = vld [vmem:[%s6670_s21 + $0x40] sm:$0xff]  }
 0x146   : > { %1508 = vmatmul.bf16.gmra.mxu2 %v5990_v27  ;;  %1859 = vmatmul.bf16.gmra.mxu3 %v6924_v42 }
 0x149   : > { %v6928_v7 = vpop.f32.mrf.mxu2  ;;  %v1204_v33 = vpop.f32.mrf.mxu3 }
 0x14a   : > { %8348 = vst [vmem:[#allocation40_spill] sm:$0xff] %v6928_v7  ;;  %v726_v1 = vpop.f32.mrf.mxu0 }
 0x14b   : > { %v6930_v22 = vadd.f32 %v1196_v59, %v726_v1 }
 0x14d   : > { %8349 = vst [vmem:[#allocation41_spill] sm:$0xff] %v6930_v22 }
 0x151   : > { %v6934_v63 = vpop.f32.mrf.mxu2  ;;  %v1206_v24 = vpop.f32.mrf.mxu3 }
 0x152   : > { %8351 = vst [vmem:[#allocation43_spill] sm:$0xff] %v6934_v63  ;;  %v729_v10 = vpop.f32.mrf.mxu0  ;;  %v6952_v24 = vpop.f32.mrf.mxu1 }
 0x153   : > { %8355 = vst [vmem:[#allocation47_spill] sm:$0xff] %v6952_v24 }
 0x154   : > { %777 = vmatmul.bf16.vlgmr.msrb.gmra.mxu0 %v6741_v41 }
 0x155   : > { %1341 = vmatmul.bf16.gmra.mxu1 %v6745_v43  ;;  %1155 = vmatpush.bf16.msrb.mxu0 %v6688_v12  ;;  %v6960_v12 = vld [vmem:[%s6670_s21 + $0x30] sm:$0xff] }
 0x156   : > { %1513 = vmatmul.bf16.gmra.mxu2 %v5991_v26  ;;  %1864 = vmatmul.bf16.gmra.mxu3 %v6938_v47 }
 0x159   : > { %v6946_v59 = vpop.f32.mrf.mxu2  ;;  %v1209_v1 = vpop.f32.mrf.mxu3  ;;  %1156 = vmatpush.bf16.msrb.mxu0 %v6697_v25 }
 0x15a   : > { %8353 = vst [vmem:[#allocation45_spill] sm:$0xff] %v6946_v59  ;;  %v731_v10 = vpop.f32.mrf.mxu0  ;;  %v6979_v59 = vld [vmem:[%s6670_s21 + $0x38] sm:$0xff] }
 0x15b   : > { %v6948_v27 = vadd.f32 %v1201_v35, %v731_v10  ;;  %8360 = vst [vmem:[#allocation52_spill] sm:$0xff] %v6979_v59 }
 0x15d   : > { %8354 = vst [vmem:[#allocation46_spill] sm:$0xff] %v6948_v27  ;;  %1157 = vmatpush.bf16.msrb.mxu0 %v6706_v38 }
 0x161   : > { %v6954_v26 = vpop.f32.mrf.mxu2  ;;  %v1211_v63 = vpop.f32.mrf.mxu3  ;;  %1158 = vmatpush.bf16.msrb.mxu0 %v6715_v50 }
 0x162   : > { %8356 = vst [vmem:[#allocation48_spill] sm:$0xff] %v6954_v26  ;;  %v734_v7 = vpop.f32.mrf.mxu0 }
 0x163   : > { %v6956_v16 = vadd.f32 %v1204_v33, %v734_v7  ;;  %v6969_v7 = vpop.f32.mrf.mxu1 }
 0x164   : > { %782 = vmatmul.bf16.gmra.mxu0 %v6755_v44  ;;  %8358 = vst [vmem:[#allocation50_spill] sm:$0xff] %v6969_v7 }
 0x165   : > { %1346 = vmatmul.bf16.gmra.mxu1 %v6759_v48  ;;  %1159 = vmatpush.bf16.msrb.mxu0 %v6724_v62 }
 0x166   : > { %1518 = vmatmul.bf16.gmra.mxu2 %v5992_v0  ;;  %1869 = vmatmul.bf16.gmra.mxu3 %v6960_v12  ;;  %v5993_v0 = vld [vmem:[%s6670_s21 + $0x38] sm:$0xff]  }
 0x169   : > { %v6967_v25 = vpop.f32.mrf.mxu2  ;;  %v1214_v38 = vpop.f32.mrf.mxu3  ;;  %1160 = vmatpush.bf16.msrb.mxu0 %v6731_v13 }
 0x16a   : > { %8357 = vst [vmem:[#allocation49_spill] sm:$0xff] %v6967_v25  ;;  %v736_v35 = vpop.f32.mrf.mxu0  ;;  %v5681_v38 = vld [vmem:[#allocation6 + $0xac] sm:$0xf] }
 0x16b   : > { %v6982_v62 = vpop.f32.mrf.mxu1  ;;  %v4978_v35 = vld [vmem:[#allocation6 + $0xb4] sm:$0xf0] }
 0x16c   : > { %8361 = vst [vmem:[#allocation53_spill] sm:$0xff] %v6982_v62  ;;  %v4981_v13 = vor.u32 %v5681_v38, %v4978_v35  ;;  %v4954_v62 = vld [vmem:[#allocation6 + $0x84] sm:$0xf0]  ;;  %v5672_v35 = vld [vmem:[#allocation6 + $0x64] sm:$0xf] }
 0x16d   : > { %1161 = vmatpush.bf16.msrb.mxu0 %v6735_v28 }
 0x171   : > { %v6973_v50 = vpop.f32.mrf.mxu2  ;;  %v1216_v33 = vpop.f32.mrf.mxu3  ;;  %1162 = vmatpush.bf16.msrb.mxu0 %v6738_v40 }
 0x172   : > { %8359 = vst [vmem:[#allocation51_spill] sm:$0xff] %v6973_v50  ;;  %v739_v10 = vpop.f32.mrf.mxu0 }
 0x173   : > { %v6975_v26 = vadd.f32 %v1209_v1, %v739_v10  ;;  %v5678_v1 = vld [vmem:[#allocation6 + $0x94] sm:$0xf]  ;;  %v4966_v10 = vld [vmem:[#allocation6 + $0x9c] sm:$0xf0] }
 0x174   : > { %861 = vmatmul.bf16.vlgmr.msra.gmra.mxu0 %v6741_v41  ;;  %v4969_v25 = vor.u32 %v5678_v1, %v4966_v10  ;;  %v5675_v41 = vld [vmem:[#allocation6 + $0x7c] sm:$0xf]  ;;  %v4930_v1 = vld [vmem:[#allocation6 + $0x54] sm:$0xf0] }
 0x175   : > { %1351 = vmatmul.bf16.gmra.mxu1 %v6767_v17  ;;  %1239 = vmatpush.bf16.msra.mxu0 %v4981_v13  ;;  %v4957_v7 = vor.u32 %v5675_v41, %v4954_v62  ;;  %v4942_v13 = vld [vmem:[#allocation6 + $0x6c] sm:$0xf0]  ;;  %v5663_v41 = vld [vmem:[#allocation6 + $0x1c] sm:$0xf] }
 0x176   : > { %1523 = vmatmul.bf16.gmra.mxu2 %v5993_v0  ;;  %1874 = vmatmul.bf16.gmra.mxu3 %v6979_v59  ;;  %v6991_v0 = vpop.f32.mrf.mxu1  ;;  %v4945_v27 = vor.u32 %v5672_v35, %v4942_v13  ;;  %v4906_v35 = vld [vmem:[#allocation6 + $0x24] sm:$0xf0] }
 0x177   : > { %8364 = vst [vmem:[#allocation56_spill] sm:$0xff] %v6991_v0  ;;  %v5754_v0 = vld [vmem:[#allocation6 + $0x22c] sm:$0xf] }
 0x179   : > { %v6987_v28 = vpop.f32.mrf.mxu2  ;;  %v1219_v50 = vpop.f32.mrf.mxu3  ;;  %1240 = vmatpush.bf16.msra.mxu0 %v4969_v25 }
 0x17a   : > { %8362 = vst [vmem:[#allocation54_spill] sm:$0xff] %v6987_v28  ;;  %v741_v40 = vpop.f32.mrf.mxu0 }
 0x17b   : > { %v6989_v58 = vadd.f32 %v1211_v63, %v741_v40  ;;  %v5669_v63 = vld [vmem:[#allocation6 + $0x4c] sm:$0xf] }
 0x17c   : > { %v4933_v25 = vor.u32 %v5669_v63, %v4930_v1  ;;  %v5660_v63 = vld [vmem:[#allocation6 + $0x4] sm:$0xf]  ;;  %v4894_v1 = vld [vmem:[#allocation6 + $0xc] sm:$0xf0] }
 0x17d   : > { %8363 = vst [vmem:[#allocation55_spill] sm:$0xff] %v6989_v58  ;;  %1241 = vmatpush.bf16.msra.mxu0 %v4957_v7 }
 0x17e   : > { %v7002_v7 = vpop.f32.mrf.mxu1 }
 0x17f   : > { %8367 = vst [vmem:[#allocation59_spill] sm:$0xff] %v7002_v7 }
 0x181   : > { %v6993_v38 = vpop.f32.mrf.mxu2  ;;  %v1221_v28 = vpop.f32.mrf.mxu3  ;;  %1242 = vmatpush.bf16.msra.mxu0 %v4945_v27 }
 0x182   : > { %8365 = vst [vmem:[#allocation57_spill] sm:$0xff] %v6993_v38  ;;  %v744_v24 = vpop.f32.mrf.mxu0  ;;  %v4918_v28 = vld [vmem:[#allocation6 + $0x3c] sm:$0xf0]  ;;  %v4897_v38 = vor.u32 %v5660_v63, %v4894_v1 }
 0x183   : > { %v5666_v24 = vld [vmem:[#allocation6 + $0x34] sm:$0xf] }
 0x184   : > { %866 = vmatmul.bf16.gmra.mxu0 %v6755_v44  ;;  %v4921_v27 = vor.u32 %v5666_v24, %v4918_v28  ;;  %v5995_v24 = vld [vmem:[%s6670_s21 + $0x48] sm:$0xff]  }
 0x185   : > { %1356 = vmatmul.bf16.gmra.mxu1 %v6775_v45  ;;  %1243 = vmatpush.bf16.msra.mxu0 %v4933_v25  ;;  %v7016_v28 = vld [vmem:[%s6670_s21 + $0x48] sm:$0xff] }
 0x186   : > { %1528 = vmatmul.bf16.gmra.mxu2 %v5994_v3  ;;  %1879 = vmatmul.bf16.gmra.mxu3 %v6997_v32  ;;  %v4909_v3 = vor.u32 %v5663_v41, %v4906_v35  ;;  %v7010_v7 = vpop.f32.mrf.mxu1  ;;  %8372 = vst [vmem:[#allocation64_spill] sm:$0xff] %v7016_v28 }
 0x187   : > { %8371 = vst [vmem:[#allocation63_spill] sm:$0xff] %v7010_v7  ;;  %v5753_v7 = vld [vmem:[#allocation6 + $0x220] sm:$0xf0] }
 0x189   : > { %v7004_v62 = vpop.f32.mrf.mxu2  ;;  %v1224_v10 = vpop.f32.mrf.mxu3  ;;  %1244 = vmatpush.bf16.msra.mxu0 %v4921_v27 }
 0x18a   : > { %8368 = vst [vmem:[#allocation60_spill] sm:$0xff] %v7004_v62  ;;  %v746_v40 = vpop.f32.mrf.mxu0 }
 0x18b   : > { %v7006_v44 = vadd.f32 %v1216_v33, %v746_v40  ;;  %v5202_v33 = vld [vmem:[#allocation6 + $0x230] sm:$0xf]  ;;  %v5756_v40 = vld [vmem:[#allocation6 + $0x238] sm:$0xf0] }
 0x18c   : > { %v5203_v27 = vor.u32 %v5756_v40, %v5202_v33 }
 0x18d   : > { %8369 = vst [vmem:[#allocation61_spill] sm:$0xff] %v7006_v44  ;;  %1245 = vmatpush.bf16.msra.mxu0 %v4909_v3  ;;  %v7048_v44 = vld [vmem:[%s6670_s21 + $0x58] sm:$0xff] }
 0x18e   : > { %v7023_v35 = vpop.f32.mrf.mxu1 }
 0x18f   : > { %8374 = vst [vmem:[#allocation66_spill] sm:$0xff] %v7023_v35  ;;  %v5997_v35 = vld [vmem:[%s6670_s21 + $0x58] sm:$0xff]  }
 0x191   : > { %v7008_v13 = vpop.f32.mrf.mxu2  ;;  %v1226_v25 = vpop.f32.mrf.mxu3  ;;  %1246 = vmatpush.bf16.msra.mxu0 %v4897_v38 }
 0x192   : > { %8370 = vst [vmem:[#allocation62_spill] sm:$0xff] %v7008_v13  ;;  %v749_v62 = vpop.f32.mrf.mxu0  ;;  %v7031_v13 = vld [vmem:[%s6670_s21 + $0x50] sm:$0xff] }
 0x193   : > { %v7012_v58 = vadd.f32 %v1219_v50, %v749_v62 }
 0x194   : > { %1163 = vmatmul.bf16.vlgmr.msrb.gmra.mxu0 %v6899_v55 }
 0x195   : > { %1361 = vmatmul.bf16.gmra.mxu1 %v6782_v21  ;;  %2014 = vmatpush.bf16.msrb.mxu0 %v5203_v27 }
 0x196   : > { %1533 = vmatmul.bf16.gmra.mxu2 %v5995_v24  ;;  %1884 = vmatmul.bf16.gmra.mxu3 %v7016_v28  ;;  %v5996_v24 = vld [vmem:[%s6670_s21 + $0x50] sm:$0xff]   ;;  %v7035_v33 = vpop.f32.mrf.mxu1 }
 0x197   : > { %8376 = vst [vmem:[#allocation68_spill] sm:$0xff] %v7035_v33 }
 0x199   : > { %v7021_v41 = vpop.f32.mrf.mxu2  ;;  %v1229_v50 = vpop.f32.mrf.mxu3 }
 0x19a   : > { %8373 = vst [vmem:[#allocation65_spill] sm:$0xff] %v7021_v41  ;;  %v751_v62 = vpop.f32.mrf.mxu0 }
 0x19e   : > { %v7042_v62 = vpop.f32.mrf.mxu1 }
 0x19f   : > { %8379 = vst [vmem:[#allocation71_spill] sm:$0xff] %v7042_v62 }
 0x1a1   : > { %v7025_v38 = vpop.f32.mrf.mxu2  ;;  %v1231_v3 = vpop.f32.mrf.mxu3 }
 0x1a2   : > { %8375 = vst [vmem:[#allocation67_spill] sm:$0xff] %v7025_v38  ;;  %v754_v63 = vpop.f32.mrf.mxu0 }
 0x1a3   : > { %v7027_v1 = vadd.f32 %v1224_v10, %v754_v63 }
 0x1a4   : > { %1168 = vmatmul.bf16.gmra.mxu0 %v6916_v15 }
 0x1a5   : > { %1366 = vmatmul.bf16.gmra.mxu1 %v6787_v46 }
 0x1a6   : > { %1538 = vmatmul.bf16.gmra.mxu2 %v5996_v24  ;;  %1889 = vmatmul.bf16.gmra.mxu3 %v7031_v13  ;;  %v5190_v24 = vld [vmem:[#allocation6 + $0x218] sm:$0xf]  ;;  %v7055_v22 = vpop.f32.mrf.mxu1 }
 0x1a7   : > { %v5191_v33 = vor.u32 %v5753_v7, %v5190_v24  ;;  %8381 = vst [vmem:[#allocation73_spill] sm:$0xff] %v7055_v22  ;;  %v5160_v24 = vld [vmem:[#allocation6 + $0x1ec] sm:$0xf0] }
 0x1a9   : > { %v7038_v40 = vpop.f32.mrf.mxu2  ;;  %v1234_v27 = vpop.f32.mrf.mxu3  ;;  %2015 = vmatpush.bf16.msrb.mxu0 %v5191_v33 }
 0x1aa   : > { %8377 = vst [vmem:[#allocation69_spill] sm:$0xff] %v7038_v40  ;;  %v756_v50 = vpop.f32.mrf.mxu0  ;;  %v5196_v40 = vld [vmem:[#allocation6 + $0x234] sm:$0xf0] }
 0x1ab   : > { %v7040_v10 = vadd.f32 %v1226_v25, %v756_v50  ;;  %v5199_v25 = vor.u32 %v5754_v0, %v5196_v40  ;;  %v5184_v50 = vld [vmem:[#allocation6 + $0x21c] sm:$0xf0]  ;;  %v5172_v0 = vld [vmem:[#allocation6 + $0x204] sm:$0xf0]  ;;  %v5745_v40 = vld [vmem:[#allocation6 + $0x1e4] sm:$0xf] }
 0x1ad   : > { %8378 = vst [vmem:[#allocation70_spill] sm:$0xff] %v7040_v10  ;;  %1930 = vmatpush.bf16.msra.mxu2 %v5199_v25 }
 0x1b1   : > { %v7044_v63 = vpop.f32.mrf.mxu2  ;;  %v1236_v38 = vpop.f32.mrf.mxu3 }
 0x1b2   : > { %8380 = vst [vmem:[#allocation72_spill] sm:$0xff] %v7044_v63  ;;  %v759_v41 = vpop.f32.mrf.mxu0 }
 0x1b3   : > { %v5751_v41 = vld [vmem:[#allocation6 + $0x214] sm:$0xf] }
 0x1b4   : > { %1247 = vmatmul.bf16.vlgmr.msra.gmra.mxu0 %v6899_v55  ;;  %v5187_v62 = vor.u32 %v5751_v41, %v5184_v50  ;;  %v5163_v50 = vor.u32 %v5745_v40, %v5160_v24  ;;  %v5136_v40 = vld [vmem:[#allocation6 + $0x1bc] sm:$0xf0] }
 0x1b5   : > { %1371 = vmatmul.bf16.gmra.mxu1 %v6792_v51  ;;  %v5748_v51 = vld [vmem:[#allocation6 + $0x1fc] sm:$0xf] }
 0x1b6   : > { %1543 = vmatmul.bf16.gmra.mxu2 %v5997_v35  ;;  %1894 = vmatmul.bf16.gmra.mxu3 %v7048_v44  ;;  %v5175_v7 = vor.u32 %v5748_v51, %v5172_v0  ;;  %v5742_v51 = vld [vmem:[#allocation6 + $0x1cc] sm:$0xf]  ;;  %v5148_v0 = vld [vmem:[#allocation6 + $0x1d4] sm:$0xf0] }
 0x1b7   : > { %1931 = vmatpush.bf16.msra.mxu2 %v5187_v62 }
 0x1b9   : > { %v1504_v38 = vpop.f32.mrf.mxu2  ;;  %v7053_v63 = vpop.f32.mrf.mxu3 }
 0x1ba   : > { %v761_v10 = vpop.f32.mrf.mxu0  ;;  %v4421_v35 = vrot.slane %v1504_v38, 1  ;;  %v7070_v38 = vpop.f32.mrf.mxu1 }
 0x1bb   : > { %v7057_v55 = vadd.f32 %v1231_v3, %v761_v10  ;;  %1932 = vmatpush.bf16.msra.mxu2 %v5175_v7  ;;  %v5998_v3 = vld [vmem:[%s6670_s21 + $0x60] sm:$0xff]   ;;  %8384 = vst [vmem:[#allocation76_spill] sm:$0xff] %v7070_v38  ;;  %v5151_v7 = vor.u32 %v5742_v51, %v5148_v0 }
 0x1bc   : > { %v7065_v10 = vld [vmem:[%s6670_s21 + $0x60] sm:$0xff] }
 0x1bd   : > { %8382 = vst [vmem:[#allocation74_spill] sm:$0xff] %v7057_v55  ;;  %v5112_v55 = vld [vmem:[#allocation6 + $0x18c] sm:$0xf0] }
 0x1bf   : > { %1933 = vmatpush.bf16.msra.mxu2 %v5163_v50 }
 0x1c1   : > { %v1506_v33 = vpop.f32.mrf.mxu2  ;;  %v7059_v34 = vpop.f32.mrf.mxu3 }
 0x1c2   : > { %v4422_v25 = vrot.slane %v1506_v33, 1  ;;  %v764_v41 = vpop.f32.mrf.mxu0  ;;  %v5739_v33 = vld [vmem:[#allocation6 + $0x1b4] sm:$0xf]  ;;  %v7078_v51 = vpop.f32.mrf.mxu1 }
 0x1c3   : > { %v7061_v22 = vadd.f32 %v1234_v27, %v764_v41  ;;  %1934 = vmatpush.bf16.msra.mxu2 %v5151_v7  ;;  %v5139_v50 = vor.u32 %v5739_v33, %v5136_v40  ;;  %8386 = vst [vmem:[#allocation78_spill] sm:$0xff] %v7078_v51  ;;  %v5733_v7 = vld [vmem:[#allocation6 + $0x184] sm:$0xf]  ;;  %v7086_v33 = vld [vmem:[%s6670_s21 + $0x68] sm:$0xff] }
 0x1c4   : > { %v7068_v62 = vsel %vm2218_vm0, %v4421_v35, %v4422_v25  ;;  %1252 = vmatmul.bf16.gmra.mxu0 %v6916_v15  ;;  %v5750_v40 = vld [vmem:[#allocation6 + $0x208] sm:$0xf0] }
 0x1c5   : > { %8383 = vst [vmem:[#allocation75_spill] sm:$0xff] %v7068_v62  ;;  %1376 = vmatmul.bf16.gmra.mxu1 %v6797_v53  ;;  %v5736_v62 = vld [vmem:[#allocation6 + $0x19c] sm:$0xf]  ;;  %v5124_v53 = vld [vmem:[#allocation6 + $0x1a4] sm:$0xf0] }
 0x1c6   : > { %1548 = vmatmul.bf16.gmra.mxu2 %v5998_v3  ;;  %1899 = vmatmul.bf16.gmra.mxu3 %v7065_v10  ;;  %v5127_v3 = vor.u32 %v5736_v62, %v5124_v53 }
 0x1c7   : > { %1935 = vmatpush.bf16.msra.mxu2 %v5139_v50 }
 0x1c9   : > { %v1509_v27 = vpop.f32.mrf.mxu2  ;;  %v1860_v35 = vpop.f32.mrf.mxu3 }
 0x1ca   : > { %v4424_v24 = vrot.slane %v1509_v27, 1  ;;  %v766_v41 = vpop.f32.mrf.mxu0  ;;  %v5115_v35 = vor.u32 %v5733_v7, %v5112_v55  ;;  %v7091_v50 = vpop.f32.mrf.mxu1 }
 0x1cb   : > { %1936 = vmatpush.bf16.msra.mxu2 %v5127_v3  ;;  %v5999_v41 = vld [vmem:[%s6670_s21 + $0x68] sm:$0xff]   ;;  %8387 = vst [vmem:[#allocation79_spill] sm:$0xff] %v7091_v50 }
 0x1cc   : > { %v7076_v15 = vsel %vm2218_vm0, %v4422_v25, %v4424_v24  ;;  %v5178_v25 = vld [vmem:[#allocation6 + $0x200] sm:$0xf] }
 0x1cd   : > { %8385 = vst [vmem:[#allocation77_spill] sm:$0xff] %v7076_v15  ;;  %v5179_v62 = vor.u32 %v5750_v40, %v5178_v25  ;;  %v7105_v15 = vld [vmem:[%s6670_s21 + $0x70] sm:$0xff] }
 0x1cf   : > { %1937 = vmatpush.bf16.msra.mxu2 %v5115_v35  ;;  %2016 = vmatpush.bf16.msrb.mxu0 %v5179_v62 }
 0x1d1   : > { %v1511_v0 = vpop.f32.mrf.mxu2  ;;  %v7080_v38 = vpop.f32.mrf.mxu3 }
 0x1d2   : > { %v7082_v27 = vpop.f32.mrf.mxu0  ;;  %v4426_v24 = vrot.slane %v1511_v0, 1  ;;  %v1332_v62 = vpop.f32.mrf.mxu1  ;;  %v6000_v0 = vld [vmem:[%s6670_s21 + $0x70] sm:$0xff]  }
 0x1d4   : > { %1257 = vmatmul.bf16.gmra.mxu0 %v6745_v43 }
 0x1d5   : > { %1381 = vmatmul.bf16.gmra.mxu1 %v6808_v57 }
 0x1d6   : > { %1553 = vmatmul.bf16.gmra.mxu2 %v5999_v41  ;;  %1904 = vmatmul.bf16.gmra.mxu3 %v7086_v33 }
 0x1d9   : > { %v1514_v55 = vpop.f32.mrf.mxu2  ;;  %v1865_v3 = vpop.f32.mrf.mxu3 }
 0x1da   : > { %v4427_v53 = vrot.slane %v1514_v55, 1  ;;  %v7093_v7 = vpop.f32.mrf.mxu0  ;;  %v7096_v35 = vadd.f32 %v1865_v3, %v6847_v6  ;;  %v1334_v50 = vpop.f32.mrf.mxu1 }
 0x1dc   : > { %v7099_v43 = vsel %vm2218_vm0, %v4426_v24, %v4427_v53 }
 0x1dd   : > { %8388 = vst [vmem:[#allocation80_spill] sm:$0xff] %v7099_v43  ;;  %v5747_v43 = vld [vmem:[#allocation6 + $0x1f0] sm:$0xf0] }
 0x1e1   : > { %v1516_v57 = vpop.f32.mrf.mxu2  ;;  %v1867_v25 = vpop.f32.mrf.mxu3 }
 0x1e2   : > { %v4429_v41 = vrot.slane %v1516_v57, 1  ;;  %v7101_v40 = vpop.f32.mrf.mxu0  ;;  %v5166_v25 = vld [vmem:[#allocation6 + $0x1e8] sm:$0xf] }
 0x1e4   : > { %v7108_v55 = vsel %vm2218_vm0, %v4427_v53, %v4429_v41  ;;  %1262 = vmatmul.bf16.gmra.mxu0 %v6759_v48  ;;  %v5167_v53 = vor.u32 %v5747_v43, %v5166_v25 }
 0x1e5   : > { %8389 = vst [vmem:[#allocation81_spill] sm:$0xff] %v7108_v55  ;;  %1386 = vmatmul.bf16.gmra.mxu1 %v6827_v5 }
 0x1e6   : > { %1558 = vmatmul.bf16.gmra.mxu2 %v6000_v0  ;;  %1909 = vmatmul.bf16.gmra.mxu3 %v7105_v15 }
 0x1e7   : > { %2017 = vmatpush.bf16.msrb.mxu0 %v5167_v53 }
 0x1e9   : > { %v1519_v6 = vpop.f32.mrf.mxu2  ;;  %v1870_v24 = vpop.f32.mrf.mxu3 }
 0x1ea   : > { %v7113_v3 = vpop.f32.mrf.mxu0  ;;  %v7116_v57 = vadd.f32 %v1870_v24, %v6866_v29  ;;  %v4431_v41 = vrot.slane %v1519_v6, 1  ;;  %v1337_v29 = vpop.f32.mrf.mxu1 }
 0x1f1   : > { %v1521_v48 = vpop.f32.mrf.mxu2  ;;  %v7118_v5 = vpop.f32.mrf.mxu3 }
 0x1f2   : > { %v4432_v55 = vrot.slane %v1521_v48, 1  ;;  %v862_v0 = vpop.f32.mrf.mxu0 }
 0x1f3   : > { %v7120_v51 = vadd.f32 %v1332_v62, %v862_v0 }
 0x1f4   : > { %v7126_v14 = vsel %vm2218_vm0, %v4431_v41, %v4432_v55  ;;  %1267 = vmatmul.bf16.gmra.mxu0 %v6767_v17  ;;  %v1339_v41 = vpop.f32.mrf.mxu1 }
 0x1f5   : > { %8390 = vst [vmem:[#allocation82_spill] sm:$0xff] %v7120_v51  ;;  %1391 = vmatmul.bf16.gmra.mxu1 %v6850_v9  ;;  %v7142_v51 = vld [vmem:[%s6670_s21 + $0x80] sm:$0xff] }
 0x1f6   : > { %8391 = vst [vmem:[#allocation83_spill] sm:$0xff] %v7126_v14  ;;  %1938 = vmatmul.bf16.vlgmr.msra.gmra.mxu2 %v6905_v31  ;;  %1914 = vmatmul.bf16.gmra.mxu3 %v7123_v18 }
 0x1f9   : > { %v1524_v43 = vpop.f32.mrf.mxu2  ;;  %v1875_v24 = vpop.f32.mrf.mxu3 }
 0x1fa   : > { %v4434_v6 = vrot.slane %v1524_v43, 1  ;;  %v864_v62 = vpop.f32.mrf.mxu0 }
 0x1fb   : > { %v7132_v25 = vadd.f32 %v1334_v50, %v864_v62 }
 0x1fc   : > { %v7135_v53 = vsel %vm2218_vm0, %v4432_v55, %v4434_v6 }
 0x1fd   : > { %8392 = vst [vmem:[#allocation84_spill] sm:$0xff] %v7132_v25 }
 0x1fe   : > { %8393 = vst [vmem:[#allocation85_spill] sm:$0xff] %v7135_v53  ;;  %v5154_v53 = vld [vmem:[#allocation6 + $0x1d0] sm:$0xf] }
 0x201   : > { %v1526_v48 = vpop.f32.mrf.mxu2  ;;  %v7137_v17 = vpop.f32.mrf.mxu3 }
 0x202   : > { %8394 = vst [vmem:[#allocation86_spill] sm:$0xff] %v7137_v17  ;;  %v867_v0 = vpop.f32.mrf.mxu0  ;;  %v4436_v50 = vrot.slane %v1526_v48, 1 }
 0x203   : > { %v7139_v14 = vadd.f32 %v1337_v29, %v867_v0  ;;  %v7153_v0 = vpop.f32.mrf.mxu1 }
 0x204   : > { %1272 = vmatmul.bf16.gmra.mxu0 %v6775_v45  ;;  %8398 = vst [vmem:[#allocation90_spill] sm:$0xff] %v7153_v0 }
 0x205   : > { %8395 = vst [vmem:[#allocation87_spill] sm:$0xff] %v7139_v14  ;;  %1396 = vmatmul.bf16.gmra.mxu1 %v6869_v30  ;;  %v5744_v14 = vld [vmem:[#allocation6 + $0x1d8] sm:$0xf0] }
 0x206   : > { %1943 = vmatmul.bf16.gmra.mxu2 %v6924_v42  ;;  %1919 = vmatmul.bf16.gmra.mxu3 %v7142_v51  ;;  %v5155_v25 = vor.u32 %v5744_v14, %v5154_v53 }
 0x208   : > { %2018 = vmatpush.bf16.msrb.mxu0 %v5155_v25 }
 0x209   : > { %v1529_v55 = vpop.f32.mrf.mxu2  ;;  %v1880_v6 = vpop.f32.mrf.mxu3 }
 0x20a   : > { %v4437_v43 = vrot.slane %v1529_v55, 1  ;;  %v869_v24 = vpop.f32.mrf.mxu0  ;;  %v7149_v62 = vadd.f32 %v1880_v6, %v6901_v52 }
 0x20b   : > { %v7151_v29 = vadd.f32 %v1339_v41, %v869_v24  ;;  %v7167_v41 = vpop.f32.mrf.mxu1 }
 0x20c   : > { %8396 = vst [vmem:[#allocation88_spill] sm:$0xff] %v7149_v62  ;;  %v7156_v45 = vsel %vm2218_vm0, %v4436_v50, %v4437_v43 }
 0x20d   : > { %8397 = vst [vmem:[#allocation89_spill] sm:$0xff] %v7151_v29 }
 0x20e   : > { %8399 = vst [vmem:[#allocation91_spill] sm:$0xff] %v7156_v45 }
 0x20f   : > { %8401 = vst [vmem:[#allocation93_spill] sm:$0xff] %v7167_v41 }
 0x211   : > { %v1531_v48 = vpop.f32.mrf.mxu2  ;;  %v1882_v17 = vpop.f32.mrf.mxu3 }
 0x212   : > { %v4439_v49 = vrot.slane %v1531_v48, 1  ;;  %v7158_v55 = vpop.f32.mrf.mxu0 }
 0x214   : > { %v7164_v52 = vsel %vm2218_vm0, %v4437_v43, %v4439_v49  ;;  %1277 = vmatmul.bf16.gmra.mxu0 %v6782_v21 }
 0x215   : > { %8400 = vst [vmem:[#allocation92_spill] sm:$0xff] %v7164_v52  ;;  %1401 = vmatmul.bf16.gmra.mxu1 %v6884_v8 }
 0x216   : > { %1948 = vmatmul.bf16.gmra.mxu2 %v6938_v47  ;;  %1924 = vmatmul.bf16.gmra.mxu3 %v7161_v11 }
 0x219   : > { %v1534_v14 = vpop.f32.mrf.mxu2  ;;  %v1885_v25 = vpop.f32.mrf.mxu3 }
 0x21a   : > { %v7172_v53 = vpop.f32.mrf.mxu0  ;;  %v7175_v17 = vadd.f32 %v1885_v25, %v6920_v20  ;;  %v4441_v50 = vrot.slane %v1534_v14, 1  ;;  %v5142_v14 = vld [vmem:[#allocation6 + $0x1b8] sm:$0xf]  ;;  %v5741_v25 = vld [vmem:[#allocation6 + $0x1c0] sm:$0xf0] }
 0x21c   : > { %8402 = vst [vmem:[#allocation94_spill] sm:$0xff] %v7175_v17  ;;  %v5827_v17 = vld [vmem:[#allocation8 + $0x170] sm:$0xf0] }
 0x221   : > { %v1536_v49 = vpop.f32.mrf.mxu2  ;;  %v7177_v6 = vpop.f32.mrf.mxu3 }
 0x222   : > { %v4442_v43 = vrot.slane %v1536_v49, 1  ;;  %8403 = vst [vmem:[#allocation95_spill] sm:$0xff] %v7177_v6  ;;  %v1169_v21 = vpop.f32.mrf.mxu0  ;;  %v5143_v49 = vor.u32 %v5741_v25, %v5142_v14 }
 0x224   : > { %v7180_v24 = vsel %vm2218_vm0, %v4441_v50, %v4442_v43  ;;  %1282 = vmatmul.bf16.gmra.mxu0 %v6787_v46  ;;  %v6250_v46 = vld [vmem:[%s6670_s21 + $0x40] sm:$0xff] }
 0x225   : > { %8404 = vst [vmem:[#allocation96_spill] sm:$0xff] %v7180_v24  ;;  %2019 = vmatpush.bf16.msrb.mxu0 %v5143_v49 }
 0x226   : > { %1953 = vmatmul.bf16.gmra.mxu2 %v6960_v12 }
 0x229   : > { %v1539_v48 = vpop.f32.mrf.mxu2  ;;  %v1890_v45 = vpop.f32.mrf.mxu3 }
 0x22a   : > { %v4444_v52 = vrot.slane %v1539_v48, 1  ;;  %v7184_v41 = vpop.f32.mrf.mxu0 }
 0x22c   : > { %v7187_v20 = vsel %vm2218_vm0, %v4442_v43, %v4444_v52 }
 0x22d   : > { %8405 = vst [vmem:[#allocation97_spill] sm:$0xff] %v7187_v20 }
 0x231   : > { %v1541_v21 = vpop.f32.mrf.mxu2  ;;  %v7189_v29 = vpop.f32.mrf.mxu3 }
 0x232   : > { %8406 = vst [vmem:[#allocation98_spill] sm:$0xff] %v7189_v29  ;;  %v7191_v50 = vpop.f32.mrf.mxu0  ;;  %v4446_v45 = vrot.slane %v1541_v21, 1  ;;  %v6251_v21 = vld [vmem:[%s6670_s21 + $0x48] sm:$0xff] }
 0x234   : > { %1287 = vmatmul.bf16.gmra.mxu0 %v6250_v46 }
 0x236   : > { %1958 = vmatmul.bf16.gmra.mxu2 %v6979_v59 }
 0x239   : > { %v1544_v48 = vpop.f32.mrf.mxu2  ;;  %v1895_v0 = vpop.f32.mrf.mxu3 }
 0x23a   : > { %v4447_v24 = vrot.slane %v1544_v48, 1  ;;  %v7195_v52 = vpop.f32.mrf.mxu0  ;;  %v7198_v43 = vadd.f32 %v1895_v0, %v6956_v16 }
 0x23c   : > { %8407 = vst [vmem:[#allocation99_spill] sm:$0xff] %v7198_v43  ;;  %v7201_v14 = vsel %vm2218_vm0, %v4446_v45, %v4447_v24  ;;  %v5130_v45 = vld [vmem:[#allocation6 + $0x1a0] sm:$0xf] }
 0x23d   : > { %8408 = vst [vmem:[#allocation100_spill] sm:$0xff] %v7201_v14 }
 0x241   : > { %v1546_v25 = vpop.f32.mrf.mxu2  ;;  %v1897_v20 = vpop.f32.mrf.mxu3 }
 0x242   : > { %v4449_v49 = vrot.slane %v1546_v25, 1  ;;  %v7203_v29 = vpop.f32.mrf.mxu0  ;;  %v5738_v25 = vld [vmem:[#allocation6 + $0x1a8] sm:$0xf0] }
 0x243   : > { %v5131_v20 = vor.u32 %v5738_v25, %v5130_v45  ;;  %v5342_v25 = vld [vmem:[#allocation8 + $0x174] sm:$0xf0] }
 0x244   : > { %v7206_v46 = vsel %vm2218_vm0, %v4447_v24, %v4449_v49  ;;  %1292 = vmatmul.bf16.gmra.mxu0 %v6251_v21 }
 0x245   : > { %8409 = vst [vmem:[#allocation101_spill] sm:$0xff] %v7206_v46  ;;  %2020 = vmatpush.bf16.msrb.mxu0 %v5131_v20  ;;  %v5340_v20 = vld [vmem:[#allocation8 + $0x168] sm:$0xf] }
 0x246   : > { %1963 = vmatmul.bf16.gmra.mxu2 %v6997_v32  ;;  %v6252_v32 = vld [vmem:[%s6670_s21 + $0x50] sm:$0xff] }
 0x249   : > { %v1549_v48 = vpop.f32.mrf.mxu2  ;;  %v1900_v6 = vpop.f32.mrf.mxu3 }
 0x24a   : > { %v7210_v16 = vpop.f32.mrf.mxu0  ;;  %v7213_v0 = vadd.f32 %v1900_v6, %v6975_v26  ;;  %v4451_v14 = vrot.slane %v1549_v48, 1 }
 0x24c   : > { %8410 = vst [vmem:[#allocation102_spill] sm:$0xff] %v7213_v0 }
 0x251   : > { %v1551_v43 = vpop.f32.mrf.mxu2  ;;  %v7215_v49 = vpop.f32.mrf.mxu3 }
 0x252   : > { %v4452_v24 = vrot.slane %v1551_v43, 1  ;;  %8411 = vst [vmem:[#allocation103_spill] sm:$0xff] %v7215_v49  ;;  %v7217_v21 = vpop.f32.mrf.mxu0  ;;  %v5826_v43 = vld [vmem:[#allocation8 + $0x16c] sm:$0xf] }
 0x253   : > { %v5345_v49 = vor.u32 %v5826_v43, %v5342_v25 }
 0x254   : > { %v7220_v46 = vsel %vm2218_vm0, %v4451_v14, %v4452_v24  ;;  %1297 = vmatmul.bf16.gmra.mxu0 %v6252_v32  ;;  %v5341_v14 = vor.u32 %v5827_v17, %v5340_v20 }
 0x255   : > { %8412 = vst [vmem:[#allocation104_spill] sm:$0xff] %v7220_v46  ;;  %3146 = vmatpush.bf16.msra.mxu3 %v5345_v49 }
 0x256   : > { %1968 = vmatmul.bf16.gmra.mxu2 %v7016_v28  ;;  %3077 = vmatpush.bf16.msra.mxu1 %v5341_v14 }
 0x259   : > { %v1554_v26 = vpop.f32.mrf.mxu2  ;;  %v1905_v0 = vpop.f32.mrf.mxu3 }
 0x25a   : > { %v4454_v6 = vrot.slane %v1554_v26, 1  ;;  %v7224_v45 = vpop.f32.mrf.mxu0  ;;  %v6253_v26 = vld [vmem:[%s6670_s21 + $0x58] sm:$0xff] }
 0x25b   : > { %v5118_v0 = vld [vmem:[#allocation6 + $0x188] sm:$0xf] }
 0x25c   : > { %v7227_v48 = vsel %vm2218_vm0, %v4452_v24, %v4454_v6  ;;  %v5735_v24 = vld [vmem:[#allocation6 + $0x190] sm:$0xf0] }
 0x25d   : > { %8413 = vst [vmem:[#allocation105_spill] sm:$0xff] %v7227_v48  ;;  %v5119_v48 = vor.u32 %v5735_v24, %v5118_v0 }
 0x25f   : > { %2021 = vmatpush.bf16.msrb.mxu0 %v5119_v48 }
 0x261   : > { %v1556_v32 = vpop.f32.mrf.mxu2  ;;  %v7229_v46 = vpop.f32.mrf.mxu3 }
 0x262   : > { %8414 = vst [vmem:[#allocation106_spill] sm:$0xff] %v7229_v46  ;;  %v7231_v28 = vpop.f32.mrf.mxu0  ;;  %v4456_v6 = vrot.slane %v1556_v32, 1 }
 0x264   : > { %1302 = vmatmul.bf16.gmra.mxu0 %v6253_v26 }
 0x266   : > { %1973 = vmatmul.bf16.gmra.mxu2 %v7031_v13 }
 0x269   : > { %v1559_v59 = vpop.f32.mrf.mxu2  ;;  %v1910_v43 = vpop.f32.mrf.mxu3 }
 0x26a   : > { %v4457_v62 = vrot.slane %v1559_v59, 1  ;;  %v7235_v25 = vpop.f32.mrf.mxu0  ;;  %v7238_v17 = vadd.f32 %v1910_v43, %v7012_v58  ;;  %v1249_v59 = vadd.f32 %v7191_v50, %v7082_v27  ;;  %v5823_v43 = vld [vmem:[#allocation8 + $0x154] sm:$0xf] }
 0x26c   : > { %v7241_v49 = vsel %vm2218_vm0, %v4456_v6, %v4457_v62 }
 0x26d   : > { %8415 = vst [vmem:[#allocation107_spill] sm:$0xff] %v7241_v49 }
 0x271   : > { %v1561_v20 = vpop.f32.mrf.mxu2  ;;  %v1912_v26 = vpop.f32.mrf.mxu3 }
 0x272   : > { %v4459_v14 = vrot.slane %v1561_v20, 1  ;;  %v7243_v46 = vpop.f32.mrf.mxu0  ;;  %v5330_v20 = vld [vmem:[#allocation8 + $0x15c] sm:$0xf0]  ;;  %v5328_v26 = vld [vmem:[#allocation8 + $0x150] sm:$0xf] }
 0x274   : > { %v7246_v32 = vsel %vm2218_vm0, %v4457_v62, %v4459_v14  ;;  %1307 = vmatmul.bf16.gmra.mxu0 %v6850_v9  ;;  %v1251_v62 = vadd.f32 %v7195_v52, %v7093_v7  ;;  %v5333_v9 = vor.u32 %v5823_v43, %v5330_v20  ;;  %v5824_v14 = vld [vmem:[#allocation8 + $0x158] sm:$0xf0]  ;;  %v1167_v52 = vadd.f32 %v7172_v53, %v6815_v60 }
 0x275   : > { %8416 = vst [vmem:[#allocation108_spill] sm:$0xff] %v7246_v32  ;;  %v1165_v32 = vadd.f32 %v7158_v55, %v6800_v54  ;;  %v5329_v50 = vor.u32 %v5824_v14, %v5328_v26  ;;  %v1254_v55 = vadd.f32 %v7203_v29, %v7101_v40  ;;  %v5820_v53 = vld [vmem:[#allocation8 + $0x13c] sm:$0xf]  ;;  %v5318_v14 = vld [vmem:[#allocation8 + $0x144] sm:$0xf0] }
 0x276   : > { %1978 = vmatmul.bf16.gmra.mxu2 %v7048_v44  ;;  %3147 = vmatpush.bf16.msra.mxu3 %v5333_v9 }
 0x277   : > { %3078 = vmatpush.bf16.msra.mxu1 %v5329_v50  ;;  %v1172_v50 = vadd.f32 %v7184_v41, %v6836_v23  ;;  %v1261_v23 = vadd.f32 %v7224_v45, %v6817_v61  ;;  %v1264_v61 = vadd.f32 %v7231_v28, %v6824_v4  ;;  %v5817_v28 = vld [vmem:[#allocation8 + $0x124] sm:$0xf] }
 0x279   : > { %v1939_v58 = vpop.f32.mrf.mxu2  ;;  %v1915_v48 = vpop.f32.mrf.mxu3 }
 0x27a   : > { %v2099_v0 = vadd.f32 %v1939_v58, %v1249_v59  ;;  %v7252_v24 = vpop.f32.mrf.mxu0  ;;  %v7255_v6 = vadd.f32 %v1915_v48, %v7027_v1 }
 0x27c   : > { %8417 = vst [vmem:[#allocation109_spill] sm:$0xff] %v7255_v6  ;;  %v2219_v1 = vrot.slane %v2099_v0, 1  ;;  %v2098_v6 = vadd.f32 %v7053_v63, %v1165_v32 }
 0x281   : > { %v1941_v27 = vpop.f32.mrf.mxu2  ;;  %v7261_v49 = vpop.f32.mrf.mxu3 }
 0x282   : > { %v2102_v59 = vadd.f32 %v1941_v27, %v1251_v62  ;;  %v7263_v58 = vpop.f32.mrf.mxu0  ;;  %v5321_v27 = vor.u32 %v5820_v53, %v5318_v14 }
 0x284   : > { %v2220_v48 = vrot.slane %v2102_v59, 1  ;;  %1312 = vmatmul.bf16.gmra.mxu0 %v6869_v30  ;;  %v2101_v30 = vadd.f32 %v7059_v34, %v1167_v52  ;;  %v1259_v34 = vadd.f32 %v7217_v21, %v6805_v56  ;;  %3148 = vmatpush.bf16.msra.mxu3 %v5321_v27  ;;  %v5316_v21 = vld [vmem:[#allocation8 + $0x138] sm:$0xf]  ;;  %v5821_v52 = vld [vmem:[#allocation8 + $0x140] sm:$0xf0] }
 0x285   : > { %v5317_v41 = vor.u32 %v5821_v52, %v5316_v21 }
 0x286   : > { %v2221_v7 = vsel %vm2218_vm0, %v2219_v1, %v2220_v48  ;;  %1983 = vmatmul.bf16.gmra.mxu2 %v7065_v10 }
 0x287   : > { %v7269_v54 = vadd.f32 %v2221_v7, %v2098_v6  ;;  %v1256_v6 = vadd.f32 %v7210_v16, %v7113_v3  ;;  %v2107_v7 = vadd.f32 %v7080_v38, %v1172_v50  ;;  %3079 = vmatpush.bf16.msra.mxu1 %v5317_v41 }
 0x289   : > { %v1944_v43 = vpop.f32.mrf.mxu2  ;;  %v1920_v20 = vpop.f32.mrf.mxu3 }
 0x28a   : > { %v2105_v0 = vadd.f32 %v1944_v43, %v1254_v55  ;;  %v7275_v26 = vpop.f32.mrf.mxu0 }
 0x28c   : > { %v2222_v63 = vrot.slane %v2105_v0, 1 }
 0x28e   : > { %v2223_v32 = vsel %vm2218_vm0, %v2220_v48, %v2222_v63 }
 0x28f   : > { %v7279_v62 = vadd.f32 %v2223_v32, %v2101_v30 }
 0x291   : > { %v1946_v9 = vpop.f32.mrf.mxu2  ;;  %v7283_v40 = vpop.f32.mrf.mxu3 }
 0x292   : > { %v2108_v29 = vadd.f32 %v1946_v9, %v1256_v6  ;;  %v7285_v60 = vpop.f32.mrf.mxu0  ;;  %v1266_v9 = vadd.f32 %v7235_v25, %v6838_v37  ;;  %v1269_v37 = vadd.f32 %v7243_v46, %v6855_v19  ;;  %v1271_v46 = vadd.f32 %v7252_v24, %v6860_v2  ;;  %v8420_v2 = vld [vmem:[#allocation31_spill] sm:$0xff] }
 0x294   : > { %1317 = vmatmul.bf16.gmra.mxu0 %v6884_v8  ;;  %v2224_v8 = vrot.slane %v2108_v29, 1 }
 0x296   : > { %1988 = vmatmul.bf16.gmra.mxu2 %v7086_v33 }
 0x299   : > { %v1949_v3 = vpop.f32.mrf.mxu2  ;;  %v1925_v16 = vpop.f32.mrf.mxu3 }
 0x29a   : > { %v2111_v59 = vadd.f32 %v1949_v3, %v1259_v34  ;;  %v7293_v1 = vpop.f32.mrf.mxu0  ;;  %v7296_v48 = vadd.f32 %v1925_v16, %v7061_v22 }
 0x29c   : > { %v2225_v33 = vrot.slane %v2111_v59, 1  ;;  %v5818_v59 = vld [vmem:[#allocation8 + $0x128] sm:$0xf0] }
 0x29e   : > { %v2226_v55 = vsel %vm2218_vm0, %v2224_v8, %v2225_v33 }
 0x29f   : > { %v7300_v56 = vadd.f32 %v2226_v55, %v2107_v7  ;;  %v1274_v55 = vadd.f32 %v7263_v58, %v6875_v36 }
 0x2a1   : > { %v1951_v43 = vpop.f32.mrf.mxu2  ;;  %v1927_v22 = vpop.f32.mrf.mxu3 }
 0x2a2   : > { %v2114_v20 = vadd.f32 %v1951_v43, %v1261_v23  ;;  %v7304_v0 = vpop.f32.mrf.mxu0  ;;  %v8418_v43 = vld [vmem:[#allocation33_spill] sm:$0xff] }
 0x2a4   : > { %v2227_v63 = vrot.slane %v2114_v20, 1  ;;  %2022 = vmatmul.bf16.vlgmr.msrb.gmra.mxu0 %v6905_v31  ;;  %v8419_v20 = vld [vmem:[#allocation86_spill] sm:$0xff] }
 0x2a5   : > { %v2125_v22 = vadd.f32 %v8419_v20, %v8418_v43 }
 0x2a6   : > { %v2228_v38 = vsel %vm2218_vm0, %v2225_v33, %v2227_v63  ;;  %1993 = vmatmul.bf16.gmra.mxu2 %v7105_v15 }
 0x2a7   : > { %v7310_v30 = vadd.f32 %v2228_v38, %v7096_v35  ;;  %v5306_v35 = vld [vmem:[#allocation8 + $0x12c] sm:$0xf0] }
 0x2a8   : > { %v5309_v25 = vor.u32 %v5817_v28, %v5306_v35 }
 0x2a9   : > { %v1954_v45 = vpop.f32.mrf.mxu2 }
 0x2aa   : > { %v2117_v32 = vadd.f32 %v1954_v45, %v1264_v61  ;;  %v7314_v6 = vpop.f32.mrf.mxu0  ;;  %3149 = vmatpush.bf16.msra.mxu3 %v5309_v25  ;;  %v5814_v61 = vld [vmem:[#allocation8 + $0x10c] sm:$0xf]  ;;  %v5294_v45 = vld [vmem:[#allocation8 + $0x114] sm:$0xf0] }
 0x2ac   : > { %v2229_v14 = vrot.slane %v2117_v32, 1  ;;  %v5297_v32 = vor.u32 %v5814_v61, %v5294_v45  ;;  %v5280_v61 = vld [vmem:[#allocation8 + $0xf0] sm:$0xf]  ;;  %v8431_v45 = vld [vmem:[#allocation44_spill] sm:$0xff] }
 0x2ae   : > { %3150 = vmatpush.bf16.msra.mxu3 %v5297_v32 }
 0x2b1   : > { %v1956_v29 = vpop.f32.mrf.mxu2 }
 0x2b2   : > { %v2120_v53 = vadd.f32 %v1956_v29, %v1266_v9  ;;  %v7318_v31 = vpop.f32.mrf.mxu0  ;;  %v5292_v9 = vld [vmem:[#allocation8 + $0x108] sm:$0xf]  ;;  %v5815_v29 = vld [vmem:[#allocation8 + $0x110] sm:$0xf0] }
 0x2b3   : > { %v1289_v32 = vadd.f32 %v7318_v31, %v8431_v45 }
 0x2b4   : > { %v2230_v34 = vrot.slane %v2120_v53, 1  ;;  %2027 = vmatmul.bf16.gmra.mxu0 %v6924_v42  ;;  %v5304_v42 = vld [vmem:[#allocation8 + $0x120] sm:$0xf] }
 0x2b5   : > { %v5305_v8 = vor.u32 %v5818_v59, %v5304_v42 }
 0x2b6   : > { %v2231_v15 = vsel %vm2218_vm0, %v2229_v14, %v2230_v34  ;;  %1998 = vmatmul.bf16.gmra.mxu2 %v7123_v18  ;;  %v2119_v18 = vadd.f32 %v7118_v5, %v6878_v39  ;;  %v5293_v14 = vor.u32 %v5815_v29, %v5292_v9 }
 0x2b7   : > { %v7324_v4 = vadd.f32 %v2231_v15, %v7116_v57  ;;  %3080 = vmatpush.bf16.msra.mxu1 %v5305_v8 }
 0x2b9   : > { %v1959_v27 = vpop.f32.mrf.mxu2 }
 0x2ba   : > { %v2123_v50 = vadd.f32 %v1959_v27, %v1269_v37  ;;  %v7328_v3 = vpop.f32.mrf.mxu0 }
 0x2bb   : > { %3081 = vmatpush.bf16.msra.mxu1 %v5293_v14 }
 0x2bc   : > { %v2232_v16 = vrot.slane %v2123_v50, 1 }
 0x2be   : > { %v2233_v57 = vsel %vm2218_vm0, %v2230_v34, %v2232_v16  ;;  %v8421_v34 = vld [vmem:[#allocation88_spill] sm:$0xff] }
 0x2bf   : > { %v7333_v33 = vadd.f32 %v2233_v57, %v2119_v18  ;;  %v8424_v18 = vld [vmem:[#allocation52_spill] sm:$0xff]  ;;  %v8425_v57 = vld [vmem:[#allocation94_spill] sm:$0xff] }
 0x2c1   : > { %v1961_v7 = vpop.f32.mrf.mxu2 }
 0x2c2   : > { %v7335_v19 = vpop.f32.mrf.mxu0  ;;  %v2126_v39 = vadd.f32 %v1961_v7, %v1271_v46  ;;  %v8426_v7 = vld [vmem:[#allocation39_spill] sm:$0xff] }
 0x2c3   : > { %v1284_v46 = vadd.f32 %v7304_v0, %v8426_v7  ;;  %v8430_v0 = vld [vmem:[#allocation42_spill] sm:$0xff] }
 0x2c4   : > { %2032 = vmatmul.bf16.gmra.mxu0 %v6938_v47  ;;  %v2234_v23 = vrot.slane %v2126_v39, 1 }
 0x2c6   : > { %2003 = vmatmul.bf16.gmra.mxu2 %v7142_v51  ;;  %v1276_v51 = vadd.f32 %v7275_v26, %v8420_v2  ;;  %v8422_v26 = vld [vmem:[#allocation34_spill] sm:$0xff] }
 0x2c7   : > { %v1279_v28 = vadd.f32 %v7285_v60, %v8422_v26 }
 0x2c9   : > { %v1964_v5 = vpop.f32.mrf.mxu2 }
 0x2ca   : > { %v2129_v21 = vadd.f32 %v1964_v5, %v1274_v55  ;;  %v7343_v52 = vpop.f32.mrf.mxu0 }
 0x2cc   : > { %v2235_v41 = vrot.slane %v2129_v21, 1  ;;  %v8427_v21 = vld [vmem:[#allocation41_spill] sm:$0xff] }
 0x2ce   : > { %v2236_v47 = vsel %vm2218_vm0, %v2234_v23, %v2235_v41  ;;  %v8428_v23 = vld [vmem:[#allocation95_spill] sm:$0xff] }
 0x2cf   : > { %v7348_v63 = vadd.f32 %v2236_v47, %v2125_v22  ;;  %v7382_v22 = vpop.f32.mrf.mxu1 }
 0x2d1   : > { %v1966_v24 = vpop.f32.mrf.mxu2 }
 0x2d2   : > { %v2132_v38 = vadd.f32 %v1966_v24, %v1276_v51  ;;  %v7352_v36 = vpop.f32.mrf.mxu0  ;;  %v8429_v51 = vld [vmem:[#allocation58_spill] sm:$0xff]  ;;  %v1286_v24 = vadd.f32 %v7314_v6, %v8430_v0  ;;  %v5791_v0 = vld [vmem:[#allocation8 + $0xb0] sm:$0xf0] }
 0x2d4   : > { %v2237_v58 = vrot.slane %v2132_v38, 1  ;;  %2037 = vmatmul.bf16.gmra.mxu0 %v6960_v12  ;;  %v8423_v12 = vld [vmem:[#allocation36_spill] sm:$0xff]  ;;  %v5811_v38 = vld [vmem:[#allocation8 + $0xf4] sm:$0xf] }
 0x2d5   : > { %v1281_v27 = vadd.f32 %v7293_v1, %v8423_v12  ;;  %v8432_v12 = vld [vmem:[#allocation46_spill] sm:$0xff] }
 0x2d6   : > { %v2238_v53 = vsel %vm2218_vm0, %v2235_v41, %v2237_v58  ;;  %2008 = vmatmul.bf16.gmra.mxu2 %v7161_v11  ;;  %v2137_v41 = vadd.f32 %v8428_v23, %v8427_v21  ;;  %v5282_v58 = vld [vmem:[#allocation8 + $0xfc] sm:$0xf0]  ;;  %v8437_v23 = vld [vmem:[#allocation50_spill] sm:$0xff] }
 0x2d7   : > { %v7358_v15 = vadd.f32 %v2238_v53, %v8421_v34  ;;  %v5285_v29 = vor.u32 %v5811_v38, %v5282_v58  ;;  %v5812_v53 = vld [vmem:[#allocation8 + $0xf8] sm:$0xf0]  ;;  %v5472_v38 = vld [vmem:[#allocation8 + $0x90] sm:$0xf] }
 0x2d8   : > { %v5281_v34 = vor.u32 %v5812_v53, %v5280_v61  ;;  %v5788_v58 = vld [vmem:[#allocation8 + $0x98] sm:$0xf0] }
 0x2d9   : > { %v1969_v35 = vpop.f32.mrf.mxu2  ;;  %3151 = vmatpush.bf16.msra.mxu3 %v5285_v29  ;;  %v5473_v45 = vor.u32 %v5788_v58, %v5472_v38 }
 0x2da   : > { %v2135_v37 = vadd.f32 %v1969_v35, %v1279_v28  ;;  %v7362_v25 = vpop.f32.mrf.mxu0  ;;  %v7393_v35 = vpop.f32.mrf.mxu1  ;;  %3082 = vmatpush.bf16.msra.mxu1 %v5281_v34  ;;  %v5785_v34 = vld [vmem:[#allocation8 + $0x80] sm:$0xf0] }
 0x2dc   : > { %v2239_v11 = vrot.slane %v2135_v37, 1 }
 0x2e1   : > { %v1971_v50 = vpop.f32.mrf.mxu2 }
 0x2e2   : > { %v2138_v16 = vadd.f32 %v1971_v50, %v1281_v27  ;;  %v7366_v42 = vpop.f32.mrf.mxu0  ;;  %v8433_v27 = vld [vmem:[#allocation98_spill] sm:$0xff] }
 0x2e3   : > { %v2143_v50 = vadd.f32 %v8433_v27, %v8432_v12  ;;  %v5808_v12 = vld [vmem:[#allocation8 + $0xdc] sm:$0xf]  ;;  %v5270_v27 = vld [vmem:[#allocation8 + $0xe4] sm:$0xf0] }
 0x2e4   : > { %v2240_v59 = vrot.slane %v2138_v16, 1  ;;  %2042 = vmatmul.bf16.gmra.mxu0 %v8424_v18 }
 0x2e6   : > { %v2241_v8 = vsel %vm2218_vm0, %v2239_v11, %v2240_v59  ;;  %v8434_v11 = vld [vmem:[#allocation47_spill] sm:$0xff] }
 0x2e7   : > { %v7371_v60 = vadd.f32 %v2241_v8, %v8425_v57 }
 0x2e9   : > { %v1974_v55 = vpop.f32.mrf.mxu2 }
 0x2ea   : > { %v2141_v39 = vadd.f32 %v1974_v55, %v1284_v46  ;;  %v7375_v5 = vpop.f32.mrf.mxu0  ;;  %v7404_v46 = vpop.f32.mrf.mxu1  ;;  %v8435_v55 = vld [vmem:[#allocation64_spill] sm:$0xff] }
 0x2ec   : > { %v2242_v1 = vrot.slane %v2141_v39, 1 }
 0x2ee   : > { %v2243_v43 = vsel %vm2218_vm0, %v2240_v59, %v2242_v1  ;;  %v1291_v59 = vadd.f32 %v7328_v3, %v8434_v11  ;;  %v8436_v1 = vld [vmem:[#allocation99_spill] sm:$0xff] }
 0x2ef   : > { %v7380_v20 = vadd.f32 %v2243_v43, %v2137_v41  ;;  %v1294_v41 = vadd.f32 %v7335_v19, %v8437_v23  ;;  %v5448_v11 = vld [vmem:[#allocation8 + $0x60] sm:$0xf] }
 0x2f1   : > { %v1976_v47 = vpop.f32.mrf.mxu2 }
 0x2f2   : > { %v7384_v2 = vpop.f32.mrf.mxu0  ;;  %v2144_v9 = vadd.f32 %v1976_v47, %v1286_v24  ;;  %v7415_v61 = vpop.f32.mrf.mxu1 }
 0x2f4   : > { %2047 = vmatmul.bf16.gmra.mxu0 %v8429_v51  ;;  %v2244_v37 = vrot.slane %v2144_v9, 1  ;;  %v5484_v51 = vld [vmem:[#allocation8 + $0xa8] sm:$0xf] }
 0x2f5   : > { %v5485_v24 = vor.u32 %v5791_v0, %v5484_v51  ;;  %v8441_v0 = vld [vmem:[#allocation55_spill] sm:$0xff] }
 0x2f7   : > { %3476 = vmatpush.bf16.msrb.mxu2 %v5485_v24  ;;  %v8442_v24 = vld [vmem:[#allocation103_spill] sm:$0xff] }
 0x2f8   : > { %v2155_v38 = vadd.f32 %v8442_v24, %v8441_v0 }
 0x2f9   : > { %v1979_v14 = vpop.f32.mrf.mxu2 }
 0x2fa   : > { %v2147_v26 = vadd.f32 %v1979_v14, %v1289_v32  ;;  %v7391_v28 = vpop.f32.mrf.mxu0  ;;  %v8438_v32 = vld [vmem:[#allocation53_spill] sm:$0xff]  ;;  %v5460_v14 = vld [vmem:[#allocation8 + $0x78] sm:$0xf] }
 0x2fb   : > { %v1296_v9 = vadd.f32 %v7343_v52, %v8438_v32  ;;  %3477 = vmatpush.bf16.msrb.mxu2 %v5473_v45  ;;  %v5782_v52 = vld [vmem:[#allocation8 + $0x68] sm:$0xf0]  ;;  %v5424_v45 = vld [vmem:[#allocation8 + $0x30] sm:$0xf]  ;;  %v5776_v32 = vld [vmem:[#allocation8 + $0x38] sm:$0xf0] }
 0x2fc   : > { %v2245_v6 = vrot.slane %v2147_v26, 1  ;;  %v5461_v26 = vor.u32 %v5785_v34, %v5460_v14  ;;  %v5809_v14 = vld [vmem:[#allocation8 + $0xe0] sm:$0xf0] }
 0x2fe   : > { %v2246_v16 = vsel %vm2218_vm0, %v2244_v37, %v2245_v6 }
 0x2ff   : > { %v7398_v31 = vadd.f32 %v2246_v16, %v2143_v50  ;;  %v5273_v50 = vor.u32 %v5808_v12, %v5270_v27  ;;  %3478 = vmatpush.bf16.msrb.mxu2 %v5461_v26  ;;  %v5773_v12 = vld [vmem:[#allocation8 + $0x20] sm:$0xf0] }
 0x301   : > { %v1981_v18 = vpop.f32.mrf.mxu2  ;;  %3152 = vmatpush.bf16.msra.mxu3 %v5273_v50 }
 0x302   : > { %v2150_v8 = vadd.f32 %v1981_v18, %v1291_v59  ;;  %v7402_v57 = vpop.f32.mrf.mxu0  ;;  %v8439_v59 = vld [vmem:[#allocation102_spill] sm:$0xff] }
 0x304   : > { %v2247_v7 = vrot.slane %v2150_v8, 1  ;;  %2052 = vmatmul.bf16.gmra.mxu0 %v8435_v55  ;;  %v5449_v8 = vor.u32 %v5782_v52, %v5448_v11  ;;  %v5400_v11 = vld [vmem:[#allocation8] sm:$0xf]  ;;  %v5770_v52 = vld [vmem:[#allocation8 + $0x8] sm:$0xf0] }
 0x306   : > { %v2248_v39 = vsel %vm2218_vm0, %v2245_v6, %v2247_v7  ;;  %v8440_v7 = vld [vmem:[#allocation56_spill] sm:$0xff]  ;;  %3479 = vmatpush.bf16.msrb.mxu2 %v5449_v8  ;;  %v8444_v8 = vld [vmem:[#allocation63_spill] sm:$0xff] }
 0x307   : > { %v7409_v21 = vadd.f32 %v2248_v39, %v8436_v1  ;;  %v1299_v55 = vadd.f32 %v7352_v36, %v8440_v7  ;;  %v7428_v39 = vpop.f32.mrf.mxu1  ;;  %v1304_v7 = vadd.f32 %v7366_v42, %v8444_v8  ;;  %v7464_v8 = vstv %s5205_s7  ;;  %s6402_s7 = scalar_lea.hbm %s8294_s6, 512 }
 0x308   : > { %vm2593_vm2 = vcmp.ge.s32.totalorder %v7464_v8, 0  ;;  %vm2633_vm3 = vcmp.lt.s32.totalorder %v7464_v8, 16 }
 0x309   : > { %v1984_v43 = vpop.f32.mrf.mxu2  ;;  %vm2643_vm4 = vmand %vm2593_vm2, %vm2633_vm3 }
 0x30a   : > { %v2153_v47 = vadd.f32 %v1984_v43, %v1294_v41  ;;  %v7413_v3 = vpop.f32.mrf.mxu0  ;;  %v5436_v41 = vld [vmem:[#allocation8 + $0x48] sm:$0xf]  ;;  %v5779_v43 = vld [vmem:[#allocation8 + $0x50] sm:$0xf0] }
 0x30c   : > { %v2249_v37 = vrot.slane %v2153_v47, 1  ;;  %v5437_v47 = vor.u32 %v5779_v43, %v5436_v41 }
 0x30e   : > { %3480 = vmatpush.bf16.msrb.mxu2 %v5437_v47 }
 0x30f   : > { %v7437_v27 = vpop.f32.mrf.mxu1 }
 0x311   : > { %v1986_v29 = vpop.f32.mrf.mxu2 }
 0x312   : > { %v2156_v53 = vadd.f32 %v1986_v29, %v1296_v9  ;;  %v7419_v19 = vpop.f32.mrf.mxu0  ;;  %v5425_v9 = vor.u32 %v5776_v32, %v5424_v45 }
 0x314   : > { %v2250_v6 = vrot.slane %v2156_v53, 1  ;;  %2057 = vmatmul.bf16.gmra.mxu0 %v7031_v13  ;;  %v5268_v53 = vld [vmem:[#allocation8 + $0xd8] sm:$0xf]  ;;  %3481 = vmatpush.bf16.msrb.mxu2 %v5425_v9 }
 0x315   : > { %v5269_v26 = vor.u32 %v5809_v14, %v5268_v53  ;;  %v8449_v14 = vld [vmem:[#allocation66_spill] sm:$0xff] }
 0x316   : > { %v2251_v16 = vsel %vm2218_vm0, %v2249_v37, %v2250_v6  ;;  %v5412_v37 = vld [vmem:[#allocation8 + $0x18] sm:$0xf] }
 0x317   : > { %v7424_v18 = vadd.f32 %v2251_v16, %v8439_v59  ;;  %v5413_v50 = vor.u32 %v5773_v12, %v5412_v37  ;;  %3083 = vmatpush.bf16.msra.mxu1 %v5269_v26  ;;  %v5401_v59 = vor.u32 %v5770_v52, %v5400_v11  ;;  %v7461_v12 = vld [vmem:[%s8290_s2] ss:$0 sm:$0xff] }
 0x319   : > { %v1989_v1 = vpop.f32.mrf.mxu2  ;;  %3482 = vmatpush.bf16.msrb.mxu2 %v5413_v50 }
 0x31a   : > { %v2159_v23 = vadd.f32 %v1989_v1, %v1299_v55  ;;  %v7430_v13 = vpop.f32.mrf.mxu0  ;;  %v8445_v1 = vld [vmem:[#allocation82_spill] sm:$0xff] }
 0x31c   : > { %v2252_v51 = vrot.slane %v2159_v23, 1 }
 0x31d   : > { %3483 = vmatpush.bf16.msrb.mxu2 %v5401_v59 }
 0x31e   : > { %v2253_v58 = vsel %vm2218_vm0, %v2250_v6, %v2252_v51  ;;  %v8443_v6 = vld [vmem:[#allocation59_spill] sm:$0xff]  ;;  %v8446_v51 = vld [vmem:[#allocation84_spill] sm:$0xff] }
 0x31f   : > { %v7435_v36 = vadd.f32 %v2253_v58, %v2155_v38  ;;  %v1301_v16 = vadd.f32 %v7362_v25, %v8443_v6  ;;  %v7446_v25 = vpop.f32.mrf.mxu1  ;;  %v8447_v38 = vld [vmem:[#allocation61_spill] sm:$0xff]  ;;  %v8448_v58 = vld [vmem:[#allocation106_spill] sm:$0xff] }
 0x320   : > { %v2161_v45 = vadd.f32 %v8448_v58, %v8447_v38 }
 0x321   : > { %v1991_v29 = vpop.f32.mrf.mxu2 }
 0x322   : > { %v2023_v34 = vpop.f32.mrf.mxu0  ;;  %v2162_v55 = vadd.f32 %v1991_v29, %v1301_v16  ;;  %v8450_v16 = vld [vmem:[#allocation87_spill] sm:$0xff] }
 0x323   : > { %v2100_v23 = vadd.f32 %v2023_v34, %v8445_v1  ;;  %v1306_v34 = vadd.f32 %v7375_v5, %v8449_v14 }
 0x324   : > { %2062 = vmatmul.bf16.gmra.mxu0 %v7048_v44  ;;  %v2254_v0 = vrot.slane %v2162_v55, 1 }
 0x325   : > { %v2380_v32 = vrot.slane %v2100_v23, 2  ;;  %v8451_v23 = vld [vmem:[#allocation68_spill] sm:$0xff] }
 0x329   : > { %v1994_v41 = vpop.f32.mrf.mxu2 }
 0x32a   : > { %v2165_v43 = vadd.f32 %v1994_v41, %v1304_v7  ;;  %v2025_v47 = vpop.f32.mrf.mxu0  ;;  %v7469_v7 = vpop.f32.mrf.mxu1  ;;  %v1309_v41 = vadd.f32 %v7384_v2, %v8451_v23  ;;  %v2581_v23 = vadd.s32 1, %v7464_v8 }
 0x32b   : > { %v2103_v44 = vadd.f32 %v2025_v47, %v8446_v51  ;;  %v5805_v47 = vld [vmem:[#allocation8 + $0xc4] sm:$0xf]  ;;  %v5258_v51 = vld [vmem:[#allocation8 + $0xcc] sm:$0xf0] }
 0x32c   : > { %v2255_v24 = vrot.slane %v2165_v43, 1  ;;  %v5261_v58 = vor.u32 %v5805_v47, %v5258_v51  ;;  %v8456_v47 = vld [vmem:[#allocation73_spill] sm:$0xff]  ;;  %vm2594_vm5 = vcmp.ge.s32.totalorder %v2581_v23, 0  ;;  %vm2634_vm6 = vcmp.lt.s32.totalorder %v2581_v23, 16 }
 0x32d   : > { %v2381_v42 = vrot.slane %v2103_v44, 2  ;;  %v5256_v44 = vld [vmem:[#allocation8 + $0xc0] sm:$0xf]  ;;  %v1314_v51 = vadd.f32 %v7402_v57, %v8456_v47  ;;  %vm7506_vm7 = vmand %vm2594_vm5, %vm2634_vm6  ;;  %v5486_v47 = vld [vmem:[#allocation8 + $0xb4] sm:$0xf0] }
 0x32e   : > { %v2256_v9 = vsel %vm2218_vm0, %v2254_v0, %v2255_v24  ;;  %3153 = vmatpush.bf16.msra.mxu3 %v5261_v58  ;;  %v8458_v58 = vld [vmem:[#allocation24_spill] sm:$0xff] }
 0x32f   : > { %v7451_v29 = vadd.f32 %v2256_v9, %v2161_v45  ;;  %v2382_v53 = vsel %vm2379_vm1, %v2380_v32, %v2381_v42  ;;  %v5806_v45 = vld [vmem:[#allocation8 + $0xc8] sm:$0xf0] }
 0x330   : > { %v2480_v26 = vadd.f32 %v2382_v53, %v7269_v54  ;;  %v5257_v32 = vor.u32 %v5806_v45, %v5256_v44  ;;  %v8452_v53 = vld [vmem:[#allocation71_spill] sm:$0xff]  ;;  %v8457_v44 = vld [vmem:[#allocation109_spill] sm:$0xff] }
 0x331   : > { %v1996_v37 = vpop.f32.mrf.mxu2  ;;  %v1311_v14 = vadd.f32 %v7391_v28, %v8452_v53  ;;  %v8459_v45 = vld [vmem:[#allocation93_spill] sm:$0xff] }
 0x332   : > { %v2168_v50 = vadd.f32 %v1996_v37, %v1306_v34  ;;  %v2028_v6 = vpop.f32.mrf.mxu0  ;;  %v2514_v5 = vadd.f32 %v7461_v12, %v2480_v26  ;;  %3084 = vmatpush.bf16.msra.mxu1 %v5257_v32  ;;  %v8453_v34 = vld [vmem:[#allocation23_spill] sm:$0xff]  ;;  %v8454_v26 = vld [vmem:[#allocation90_spill] sm:$0xff]  ;;  %v1345_v32 = vadd.f32 %v8459_v45, %v8458_v58 }
 0x333   : > { %v2106_v11 = vadd.f32 %v2028_v6, %v8450_v16  ;;  %v1343_v37 = vadd.f32 %v8454_v26, %v8453_v34  ;;  %v8455_v6 = vld [vmem:[#allocation89_spill] sm:$0xff] }
 0x334   : > { %v2257_v52 = vrot.slane %v2168_v50, 1  ;;  %2067 = vmatmul.bf16.gmra.mxu0 %v7065_v10  ;;  %v2544_v0 = vmax.f32 %v2514_v5, 0.0  ;;  %v7485_v50 = vpop.f32.mrf.mxu1 }
 0x335   : > { %v2383_v59 = vrot.slane %v2106_v11, 2 }
 0x336   : > { %v2258_v54 = vsel %vm2218_vm0, %v2255_v24, %v2257_v52 }
 0x337   : > { %v7472_v55 = vadd.f32 %v2258_v54, %v7238_v17  ;;  %v2384_v1 = vsel %vm2379_vm1, %v2381_v42, %v2383_v59 }
 0x338   : > { %v2481_v43 = vadd.f32 %v2384_v1, %v7279_v62  ;;  %v2673_v62 = vsel %vm2643_vm4, %v2544_v0, 0.0 }
 0x339   : > { %v1999_v10 = vpop.f32.mrf.mxu2 }
 0x33a   : > { %v2515_v24 = vadd.f32 %v7461_v12, %v2481_v43  ;;  %v2171_v17 = vadd.f32 %v1999_v10, %v1309_v41  ;;  %v2030_v38 = vpop.f32.mrf.mxu0  ;;  %v6254_v10 = vld [vmem:[%s6670_s21 + $0x68] sm:$0xff] }
 0x33b   : > { %v2109_v16 = vadd.f32 %v2030_v38, %v8455_v6  ;;  %v8462_v6 = vld [vmem:[#allocation70_spill] sm:$0xff] }
 0x33c   : > { %v2545_v2 = vmax.f32 %v2515_v24, 0.0  ;;  %v2259_v54 = vrot.slane %v2171_v17, 1  ;;  %v7504_v57 = vpop.f32.mrf.mxu1 }
 0x33d   : > { %v2385_v41 = vrot.slane %v2109_v16, 2  ;;  %v2173_v16 = vadd.f32 %v7261_v49, %v8462_v6 }
 0x33e   : > { %v2674_v42 = vsel %vm2643_vm4, %v2545_v2, 0.0 }
 0x33f   : > { %v5917_v9 = vpack.c.bf16 %v2674_v42, %v2673_v62 }
 0x341   : > { %5918 = vst [vmem:[#allocation2] sm:$0xff] %v5917_v9   ;;  %v2001_v11 = vpop.f32.mrf.mxu2 }
 0x342   : > { %v2174_v52 = vadd.f32 %v2001_v11, %v1311_v14  ;;  %v2033_v59 = vpop.f32.mrf.mxu0 }
 0x343   : > { %v2112_v5 = vadd.f32 %v2033_v59, %v1343_v37 }
 0x344   : > { %v2260_v1 = vrot.slane %v2174_v52, 1  ;;  %2072 = vmatmul.bf16.gmra.mxu0 %v6254_v10  ;;  %v7523_v45 = vpop.f32.mrf.mxu1 }
 0x345   : > { %v2386_v43 = vrot.slane %v2112_v5, 2 }
 0x346   : > { %v2261_v28 = vsel %vm2218_vm0, %v2259_v54, %v2260_v1 }
 0x347   : > { %v7494_v0 = vadd.f32 %v2261_v28, %v8457_v44  ;;  %v2387_v24 = vsel %vm2379_vm1, %v2385_v41, %v2386_v43  ;;  %v5790_v28 = vld [vmem:[#allocation8 + $0xac] sm:$0xf] }
 0x348   : > { %v2483_v38 = vadd.f32 %v2387_v24, %v7300_v56  ;;  %v7498_v17 = vld [vmem:[#allocation2] sm:$0xff]  ;;  %v6497_v56 = vmov 0.0|0.0   ;;  %v5489_v44 = vor.u32 %v5790_v28, %v5486_v47  ;;  %v5348_v24 = vld [vmem:[#allocation8 + $0x170] sm:$0xf] }
 0x349   : > { %v2004_v2 = vpop.f32.mrf.mxu2  ;;  %3484 = vmatmul.bf16.vlgmr.msrb.gmra.mxu2 %v7498_v17  ;;  %v7510_v14 = vunpack.c.l.bf16 %v6497_v56  ;;  %v8464_v56 = vld [vmem:[#allocation25_spill] sm:$0xff] }
 0x34a   : > { %v2517_v62 = vadd.f32 %v7461_v12, %v2483_v38  ;;  %v2177_v42 = vadd.f32 %v2004_v2, %v1314_v51  ;;  %v2035_v9 = vpop.f32.mrf.mxu0  ;;  %v5828_v38 = vld [vmem:[#allocation8 + $0x178] sm:$0xf0]  ;;  %3545 = vmatpush.bf16.msrb.mxu3 %v5489_v44  ;;  %v8463_v2 = vld [vmem:[#allocation76_spill] sm:$0xff] }
 0x34b   : > { %v2115_v34 = vadd.f32 %v2035_v9, %v1345_v32  ;;  %v6255_v32 = vld [vmem:[%s6670_s21 + $0x70] sm:$0xff] }
 0x34c   : > { %v2547_v26 = vmax.f32 %v2517_v62, 0.0  ;;  %v2262_v37 = vrot.slane %v2177_v42, 1  ;;  %v1316_v62 = vadd.f32 %v7413_v3, %v8463_v2  ;;  %v8468_v2 = vld [vmem:[#allocation79_spill] sm:$0xff] }
 0x34d   : > { %v2388_v11 = vrot.slane %v2115_v34, 2  ;;  %v1348_v34 = vadd.f32 %v7382_v22, %v8464_v56 }
 0x34e   : > { %v2676_v52 = vsel %vm7506_vm7, %v2547_v26, 0.0  ;;  %v2263_v59 = vsel %vm2218_vm0, %v2260_v1, %v2262_v37  ;;  %v5349_v1 = vor.u32 %v5828_v38, %v5348_v24  ;;  %v8465_v37 = vld [vmem:[#allocation78_spill] sm:$0xff] }
 0x34f   : > { %v5922_v5 = vpack.c.bf16 %v2676_v52, %v7510_v14  ;;  %v7518_v54 = vadd.f32 %v2263_v59, %v2173_v16  ;;  %v2389_v23 = vsel %vm2379_vm1, %v2386_v43, %v2388_v11  ;;  %v5492_v43 = vld [vmem:[#allocation8 + $0xb0] sm:$0xf]  ;;  %v1319_v6 = vadd.f32 %v7419_v19, %v8465_v37  ;;  %v8466_v52 = vld [vmem:[#allocation26_spill] sm:$0xff]  ;;  %v5783_v37 = vld [vmem:[#allocation8 + $0x70] sm:$0xf0] }
 0x350   : > { %v2484_v41 = vadd.f32 %v2389_v23, %v7310_v30  ;;  %3207 = vmatpush.bf16.msrb.mxu1 %v5349_v1  ;;  %v5792_v30 = vld [vmem:[#allocation8 + $0xb8] sm:$0xf0]  ;;  %v1350_v59 = vadd.f32 %v7393_v35, %v8466_v52  ;;  %v5789_v23 = vld [vmem:[#allocation8 + $0xa0] sm:$0xf0]  ;;  %v5468_v35 = vld [vmem:[#allocation8 + $0x80] sm:$0xf] }
 0x351   : > { %6001 = vst [vmem:[#allocation2 + $0x8] sm:$0xff] %v5922_v5   ;;  %v2006_v10 = vpop.f32.mrf.mxu2  ;;  %v5493_v9 = vor.u32 %v5792_v30, %v5492_v43  ;;  %v5480_v5 = vld [vmem:[#allocation8 + $0x98] sm:$0xf]  ;;  %v5786_v1 = vld [vmem:[#allocation8 + $0x88] sm:$0xf0] }
 0x352   : > { %v2518_v49 = vadd.f32 %v7461_v12, %v2484_v41  ;;  %v2038_v51 = vpop.f32.mrf.mxu0  ;;  %v2180_v16 = vadd.f32 %v2006_v10, %v1316_v62  ;;  %v5481_v22 = vor.u32 %v5789_v23, %v5480_v5  ;;  %v8467_v10 = vld [vmem:[#allocation74_spill] sm:$0xff]  ;;  %v1321_v62 = vadd.f32 %v7430_v13, %v8468_v2  ;;  %v5777_v2 = vld [vmem:[#allocation8 + $0x40] sm:$0xf0] }
 0x353   : > { %3606 = vmatpush.bf16.msra.mxu0 %v5493_v9  ;;  %v2118_v3 = vadd.f32 %v2038_v51, %v1348_v34  ;;  %v2179_v44 = vadd.f32 %v7283_v40, %v8467_v10  ;;  %v8469_v40 = vld [vmem:[#allocation27_spill] sm:$0xff]  ;;  %v6256_v5 = vld [vmem:[%s6670_s21 + $0x78] sm:$0xff] }
 0x354   : > { %v2548_v58 = vmax.f32 %v2518_v49, 0.0  ;;  %2077 = vmatmul.bf16.gmra.mxu0 %v6255_v32  ;;  %v2264_v49 = vrot.slane %v2180_v16, 1  ;;  %v7543_v32 = vpop.f32.mrf.mxu1  ;;  %v1353_v56 = vadd.f32 %v7404_v46, %v8469_v40  ;;  %v5444_v46 = vld [vmem:[#allocation8 + $0x50] sm:$0xf]  ;;  %v5780_v23 = vld [vmem:[#allocation8 + $0x58] sm:$0xf0] }
 0x355   : > { %v2390_v24 = vrot.slane %v2118_v3, 2  ;;  %v2582_v3 = vadd.s32 2, %v7464_v8  ;;  %v5420_v40 = vld [vmem:[#allocation8 + $0x20] sm:$0xf] }
 0x356   : > { %v2677_v42 = vsel %vm7506_vm7, %v2548_v58, 0.0  ;;  %v5469_v58 = vor.u32 %v5786_v1, %v5468_v35  ;;  %v5787_v35 = vld [vmem:[#allocation8 + $0x94] sm:$0xf]  ;;  %v5474_v1 = vld [vmem:[#allocation8 + $0x9c] sm:$0xf0] }
 0x357   : > { %v5927_v26 = vpack.c.bf16 %v7510_v14, %v2677_v42  ;;  %3607 = vmatpush.bf16.msra.mxu0 %v5481_v22  ;;  %vm2595_vm8 = vcmp.ge.s32.totalorder %v2582_v3, 0  ;;  %vm2635_vm9 = vcmp.lt.s32.totalorder %v2582_v3, 16  ;;  %v5408_v3 = vld [vmem:[#allocation8 + $0x8] sm:$0xf] }
 0x358   : > { %v7535_v11 = vld [vmem:[#allocation2 + $0x8] sm:$0xff]  ;;  %vm2649_vm10 = vmand %vm2595_vm8, %vm2635_vm9 }
 0x359   : > { %6002 = vst [vmem:[#allocation2 + $0x10] sm:$0xff] %v5927_v26   ;;  %v2009_v53 = vpop.f32.mrf.mxu2  ;;  %3489 = vmatmul.bf16.gmra.mxu2 %v7535_v11  ;;  %v5456_v26 = vld [vmem:[#allocation8 + $0x68] sm:$0xf] }
 0x35a   : > { %v2183_v41 = vadd.f32 %v2009_v53, %v1319_v6  ;;  %v2040_v28 = vpop.f32.mrf.mxu0  ;;  %v5457_v52 = vor.u32 %v5783_v37, %v5456_v26 }
 0x35b   : > { %v2121_v47 = vadd.f32 %v2040_v28, %v1350_v59  ;;  %3608 = vmatpush.bf16.msra.mxu0 %v5469_v58  ;;  %v5445_v28 = vor.u32 %v5780_v23, %v5444_v46 }
 0x35c   : > { %v2265_v19 = vrot.slane %v2183_v41, 1 }
 0x35d   : > { %v2391_v38 = vrot.slane %v2121_v47, 2 }
 0x35e   : > { %v2266_v51 = vsel %vm2218_vm0, %v2264_v49, %v2265_v19 }
 0x35f   : > { %v7545_v43 = vadd.f32 %v2266_v51, %v2179_v44  ;;  %v2392_v30 = vsel %vm2379_vm1, %v2390_v24, %v2391_v38  ;;  %3609 = vmatpush.bf16.msra.mxu0 %v5457_v52  ;;  %v7568_v24 = vpop.f32.mrf.mxu1  ;;  %v5336_v51 = vld [vmem:[#allocation8 + $0x158] sm:$0xf] }
 0x360   : > { %v2486_v42 = vadd.f32 %v2392_v30, %v7324_v4  ;;  %v7551_v9 = vld [vmem:[#allocation2 + $0xc] sm:$0xff] }
 0x361   : > { %v2011_v34 = vpop.f32.mrf.mxu2  ;;  %3085 = vmatmul.bf16.vlgmr.msra.gmra.mxu1 %v7551_v9  ;;  %3154 = vmatmul.bf16.vlgmr.msra.gmra.mxu3 %v7551_v9  ;;  %v7566_v44 = vld [vmem:[#allocation2 + $0x10] sm:$0xff] }
 0x362   : > { %v2186_v6 = vadd.f32 %v2011_v34, %v1321_v62  ;;  %v2043_v16 = vpop.f32.mrf.mxu0  ;;  %v2520_v4 = vadd.f32 %v7461_v12, %v2486_v42  ;;  %v5432_v30 = vld [vmem:[#allocation8 + $0x38] sm:$0xf] }
 0x363   : > { %v2124_v13 = vadd.f32 %v2043_v16, %v1353_v56  ;;  %3610 = vmatpush.bf16.msra.mxu0 %v5445_v28  ;;  %v5433_v62 = vor.u32 %v5777_v2, %v5432_v30  ;;  %v5774_v56 = vld [vmem:[#allocation8 + $0x28] sm:$0xf0]  ;;  %v2583_v28 = vadd.s32 3, %v7464_v8 }
 0x364   : > { %v2267_v59 = vrot.slane %v2186_v6, 1  ;;  %2082 = vmatmul.bf16.gmra.mxu0 %v6256_v5  ;;  %v2550_v49 = vmax.f32 %v2520_v4, 0.0  ;;  %v5421_v37 = vor.u32 %v5774_v56, %v5420_v40  ;;  %v8470_v6 = vld [vmem:[#allocation28_spill] sm:$0xff]  ;;  %v5784_v56 = vld [vmem:[#allocation8 + $0x7c] sm:$0xf] }
 0x365   : > { %v2393_v53 = vrot.slane %v2124_v13, 2  ;;  %v1355_v16 = vadd.f32 %v7415_v61, %v8470_v6  ;;  %v8471_v13 = vld [vmem:[#allocation29_spill] sm:$0xff]  ;;  %vm2596_vm11 = vcmp.ge.s32.totalorder %v2583_v28, 0  ;;  %vm2636_vm12 = vcmp.lt.s32.totalorder %v2583_v28, 16 }
 0x366   : > { %v2268_v41 = vsel %vm2218_vm0, %v2265_v19, %v2267_v59  ;;  %v2679_v34 = vsel %vm2649_vm10, %v2550_v49, 0.0  ;;  %v1358_v4 = vadd.f32 %v7428_v39, %v8471_v13  ;;  %vm7592_vm13 = vmand %vm2596_vm11, %vm2636_vm12 }
 0x367   : > { %v7562_v22 = vadd.f32 %v2268_v41, %v7296_v48  ;;  %v2394_v47 = vsel %vm2379_vm1, %v2391_v38, %v2393_v53  ;;  %v5477_v48 = vor.u32 %v5787_v35, %v5474_v1  ;;  %v5825_v38 = vld [vmem:[#allocation8 + $0x160] sm:$0xf0]  ;;  %3611 = vmatpush.bf16.msra.mxu0 %v5433_v62  ;;  %v5771_v53 = vld [vmem:[#allocation8 + $0x10] sm:$0xf0]  ;;  %v7577_v23 = vpop.f32.mrf.mxu1 }
 0x368   : > { %v2487_v10 = vadd.f32 %v2394_v47, %v7333_v33  ;;  %v5337_v33 = vor.u32 %v5825_v38, %v5336_v51  ;;  %v5409_v46 = vor.u32 %v5771_v53, %v5408_v3  ;;  %v8472_v51 = vld [vmem:[#allocation30_spill] sm:$0xff]  ;;  %v8475_v53 = vld [vmem:[#allocation32_spill] sm:$0xff] }
 0x369   : > { %3494 = vmatmul.bf16.gmra.mxu2 %v7566_v44  ;;  %3546 = vmatpush.bf16.msrb.mxu3 %v5477_v48 }
 0x36a   : > { %v2521_v19 = vadd.f32 %v7461_v12, %v2487_v10  ;;  %v2045_v58 = vpop.f32.mrf.mxu0  ;;  %3208 = vmatpush.bf16.msrb.mxu1 %v5337_v33  ;;  %v6257_v10 = vld [vmem:[%s6670_s21 + $0x80] sm:$0xff] }
 0x36b   : > { %v2127_v59 = vadd.f32 %v2045_v58, %v1355_v16  ;;  %3612 = vmatpush.bf16.msra.mxu0 %v5421_v37  ;;  %v5324_v16 = vld [vmem:[#allocation8 + $0x140] sm:$0xf] }
 0x36c   : > { %v2551_v42 = vmax.f32 %v2521_v19, 0.0  ;;  %v1360_v19 = vadd.f32 %v7437_v27, %v8472_v51 }
 0x36d   : > { %v2395_v47 = vrot.slane %v2127_v59, 2  ;;  %v6258_v59 = vld [vmem:[%s6670_s21 + $0x88] sm:$0xff]  ;;  %s6396_s21 = sshra.s32 %s4564_s16, 4  ;;  %s6397_s21 = int_to_ptr.hbm [resolvable:$true] %s6396_s21 }
 0x36e   : > { %v2680_v26 = vsel %vm2649_vm10, %v2551_v42, 0.0  ;;  %s6398_s4 = scalar_lea.hbm %s6397_s21, 128  ;;  %p6403_p8 = scmp.lt.s32.totalorder %s6397_s21, %s8294_s6 }
 0x36f   : > { %v5932_v52 = vpack.c.bf16 %v2680_v26, %v2679_v34  ;;  %3613 = vmatpush.bf16.msra.mxu0 %v5409_v46  ;;  %v7597_v2 = vpop.f32.mrf.mxu1  ;;  %v5462_v34 = vld [vmem:[#allocation8 + $0x84] sm:$0xf0]  ;;  %p6399_p1 = scmp.ne.s32.totalorder %s6397_s21, %s6398_s4  ;;  %p6404_p11 = scmp.lt.s32.totalorder %s6402_s7, %s6398_s4 }
 0x370   : > { %v5465_v6 = vor.u32 %v5784_v56, %v5462_v34  ;;  %v5450_v34 = vld [vmem:[#allocation8 + $0x6c] sm:$0xf0] }
 0x371   : > { %6003 = vst [vmem:[#allocation2 + $0x18] sm:$0xff] %v5932_v52   ;;  %v5822_v52 = vld [vmem:[#allocation8 + $0x148] sm:$0xf0]  ;;  %p6400_p2 = pnand %p6399_p1, %p6642_p3  ;;  %p6405_p12 = por %p6404_p11, %p6403_p8 }
 0x372   : > { %v2048_v5 = vpop.f32.mrf.mxu0  ;;  %v5325_v13 = vor.u32 %v5822_v52, %v5324_v16  ;;  %3547 = vmatpush.bf16.msrb.mxu3 %v5465_v6  ;;  %v5819_v52 = vld [vmem:[#allocation8 + $0x130] sm:$0xf0] }
 0x373   : > { %v2130_v41 = vadd.f32 %v2048_v5, %v1358_v4  ;;  %p6401_p4 = pneg %p6400_p2 }
 0x374   : > { %2087 = vmatmul.bf16.gmra.mxu0 %v6257_v10  ;;  %3209 = vmatpush.bf16.msrb.mxu1 %v5325_v13 }
 0x375   : > { %v2396_v49 = vrot.slane %v2130_v41, 2  ;;  %p6406_p13 = pnand %p6405_p12, %p6401_p4 }
 0x377   : > { %v2397_v61 = vsel %vm2379_vm1, %v2395_v47, %v2396_v49  ;;  %v7610_v5 = vpop.f32.mrf.mxu1  ;;  %v8476_v47 = vld [vmem:[#allocation35_spill] sm:$0xff] }
 0x378   : > { %v2489_v39 = vadd.f32 %v2397_v61, %v7348_v63  ;;  %v7583_v35 = vld [vmem:[#allocation2 + $0x14] sm:$0xff] }
 0x379   : > { %v7585_v1 = vld [vmem:[#allocation2 + $0x18] sm:$0xff]  ;;  %3090 = vmatmul.bf16.gmra.mxu1 %v7583_v35  ;;  %3159 = vmatmul.bf16.gmra.mxu3 %v7583_v35 }
 0x37a   : > { %v2523_v58 = vadd.f32 %v7461_v12, %v2489_v39  ;;  %v2050_v48 = vpop.f32.mrf.mxu0  ;;  %3499 = vmatmul.bf16.gmra.mxu2 %v7585_v1 }
 0x37b   : > { %v2133_v63 = vadd.f32 %v2050_v48, %v1360_v19 }
 0x37c   : > { %v2553_v30 = vmax.f32 %v2523_v58, 0.0  ;;  %v8477_v58 = vld [vmem:[#allocation37_spill] sm:$0xff] }
 0x37d   : > { %v2398_v33 = vrot.slane %v2133_v63, 2  ;;  %v1368_v48 = vadd.f32 %v7485_v50, %v8477_v58 }
 0x37e   : > { %v2682_v27 = vsel %vm7592_vm13, %v2553_v30, 0.0 }
 0x37f   : > { %v5937_v62 = vpack.c.bf16 %v2682_v27, %v7510_v14  ;;  %v2399_v42 = vsel %vm2379_vm1, %v2396_v49, %v2398_v33  ;;  %v1365_v49 = vadd.f32 %v7469_v7, %v8476_v47  ;;  %v7625_v38 = vpop.f32.mrf.mxu1  ;;  %v2584_v33 = vadd.s32 4, %v7464_v8  ;;  %v8479_v47 = vld [vmem:[#allocation40_spill] sm:$0xff] }
 0x380   : > { %v2490_v40 = vadd.f32 %v2399_v42, %v7358_v15  ;;  %v1363_v15 = vadd.f32 %v7446_v25, %v8475_v53  ;;  %v8478_v53 = vld [vmem:[#allocation38_spill] sm:$0xff] }
 0x381   : > { %6004 = vst [vmem:[#allocation2 + $0x20] sm:$0xff] %v5937_v62   ;;  %vm2597_vm14 = vcmp.ge.s32.totalorder %v2584_v33, 0  ;;  %vm2637_vm15 = vcmp.lt.s32.totalorder %v2584_v33, 16 }
 0x382   : > { %v2524_v26 = vadd.f32 %v7461_v12, %v2490_v40  ;;  %v2053_v37 = vpop.f32.mrf.mxu0  ;;  %vm2655_vm2 = vmand %vm2597_vm14, %vm2637_vm15 }
 0x383   : > { %v2136_v10 = vadd.f32 %v2053_v37, %v1363_v15  ;;  %v1370_v15 = vadd.f32 %v7504_v57, %v8478_v53 }
 0x384   : > { %v2554_v4 = vmax.f32 %v2524_v26, 0.0  ;;  %2092 = vmatmul.bf16.gmra.mxu0 %v6258_v59  ;;  %v5312_v26 = vld [vmem:[#allocation8 + $0x128] sm:$0xf] }
 0x385   : > { %v2400_v25 = vrot.slane %v2136_v10, 2  ;;  %v5313_v13 = vor.u32 %v5819_v52, %v5312_v26 }
 0x386   : > { %v2683_v3 = vsel %vm7592_vm13, %v2554_v4, 0.0 }
 0x387   : > { %v5942_v46 = vpack.c.bf16 %v7510_v14, %v2683_v3  ;;  %3210 = vmatpush.bf16.msrb.mxu1 %v5313_v13  ;;  %v5300_v13 = vld [vmem:[#allocation8 + $0x110] sm:$0xf] }
 0x388   : > { %v7613_v41 = vld [vmem:[#allocation2 + $0x1c] sm:$0xff] }
 0x389   : > { %v7615_v28 = vld [vmem:[#allocation2 + $0x20] sm:$0xff]  ;;  %6005 = vst [vmem:[#allocation2 + $0x28] sm:$0xff] %v5942_v46   ;;  %3095 = vmatmul.bf16.gmra.mxu1 %v7613_v41  ;;  %3163 = vmatmul.bf16.gmra.mxu3 %v7613_v41 }
 0x38a   : > { %v2055_v61 = vpop.f32.mrf.mxu0  ;;  %3504 = vmatmul.bf16.gmra.mxu2 %v7615_v28 }
 0x38b   : > { %v2139_v39 = vadd.f32 %v2055_v61, %v1365_v49  ;;  %v1373_v49 = vadd.f32 %v7523_v45, %v8479_v47 }
 0x38d   : > { %v2401_v51 = vrot.slane %v2139_v39, 2 }
 0x38f   : > { %v2402_v19 = vsel %vm2379_vm1, %v2400_v25, %v2401_v51  ;;  %v2585_v25 = vadd.s32 5, %v7464_v8 }
 0x390   : > { %v2492_v7 = vadd.f32 %v2402_v19, %v7371_v60  ;;  %v7633_v50 = vld [vmem:[#allocation2 + $0x24] sm:$0xff]  ;;  %v5781_v60 = vld [vmem:[#allocation8 + $0x64] sm:$0xf] }
 0x391   : > { %v7635_v56 = vld [vmem:[#allocation2 + $0x28] sm:$0xff]  ;;  %vm2598_vm3 = vcmp.ge.s32.totalorder %v2585_v25, 0  ;;  %vm2638_vm4 = vcmp.lt.s32.totalorder %v2585_v25, 16 }
 0x392   : > { %v2058_v63 = vpop.f32.mrf.mxu0  ;;  %v2526_v62 = vadd.f32 %v7461_v12, %v2492_v7  ;;  %vm7663_vm5 = vmand %vm2598_vm3, %vm2638_vm4 }
 0x393   : > { %v2142_v30 = vadd.f32 %v2058_v63, %v1368_v48  ;;  %v8480_v63 = vld [vmem:[#allocation43_spill] sm:$0xff] }
 0x394   : > { %3614 = vmatmul.bf16.vlgmr.msra.gmra.mxu0 %v7498_v17  ;;  %v2556_v37 = vmax.f32 %v2526_v62, 0.0  ;;  %v5453_v17 = vor.u32 %v5781_v60, %v5450_v34 }
 0x395   : > { %v2403_v27 = vrot.slane %v2142_v30, 2  ;;  %v1375_v30 = vadd.f32 %v7543_v32, %v8480_v63 }
 0x396   : > { %3548 = vmatpush.bf16.msrb.mxu3 %v5453_v17  ;;  %v2685_v59 = vsel %vm2655_vm2, %v2556_v37, 0.0  ;;  %v5778_v37 = vld [vmem:[#allocation8 + $0x4c] sm:$0xf] }
 0x397   : > { %v2404_v42 = vsel %vm2379_vm1, %v2401_v51, %v2403_v27 }
 0x398   : > { %v2493_v40 = vadd.f32 %v2404_v42, %v7380_v20  ;;  %v7640_v20 = vpop.f32.mrf.mxu1 }
 0x399   : > { %3100 = vmatmul.bf16.gmra.mxu1 %v7633_v50  ;;  %3167 = vmatmul.bf16.gmra.mxu3 %v7633_v50 }
 0x39a   : > { %v2527_v6 = vadd.f32 %v7461_v12, %v2493_v40  ;;  %v2060_v16 = vpop.f32.mrf.mxu0  ;;  %3509 = vmatmul.bf16.gmra.mxu2 %v7635_v56 }
 0x39b   : > { %v2145_v10 = vadd.f32 %v2060_v16, %v1370_v15  ;;  %v8483_v15 = vld [vmem:[#allocation45_spill] sm:$0xff] }
 0x39c   : > { %v2557_v4 = vmax.f32 %v2527_v6, 0.0  ;;  %v5438_v6 = vld [vmem:[#allocation8 + $0x54] sm:$0xf0] }
 0x39d   : > { %v2405_v19 = vrot.slane %v2145_v10, 2  ;;  %v5441_v52 = vor.u32 %v5778_v37, %v5438_v6  ;;  %v8484_v10 = vld [vmem:[#allocation48_spill] sm:$0xff]  ;;  %v5426_v37 = vld [vmem:[#allocation8 + $0x3c] sm:$0xf0]  ;;  %v5288_v6 = vld [vmem:[#allocation8 + $0xf8] sm:$0xf] }
 0x39e   : > { %v2686_v3 = vsel %vm2655_vm2, %v2557_v4, 0.0  ;;  %v5816_v4 = vld [vmem:[#allocation8 + $0x118] sm:$0xf0] }
 0x39f   : > { %v5947_v46 = vpack.c.bf16 %v2686_v3, %v2685_v59  ;;  %v5301_v59 = vor.u32 %v5816_v4, %v5300_v13  ;;  %3549 = vmatpush.bf16.msrb.mxu3 %v5441_v52  ;;  %v5813_v13 = vld [vmem:[#allocation8 + $0x100] sm:$0xf0]  ;;  %v5862_v4 = vld [vmem:[#allocation8 + $0x22c] sm:$0xf] }
 0x3a0   : > { %v7649_v51 = vpop.f32.mrf.mxu1 }
 0x3a1   : > { %6006 = vst [vmem:[#allocation2 + $0x30] sm:$0xff] %v5947_v46   ;;  %3211 = vmatpush.bf16.msrb.mxu1 %v5301_v59  ;;  %v5289_v59 = vor.u32 %v5813_v13, %v5288_v6  ;;  %v8488_v13 = vld [vmem:[#allocation57_spill] sm:$0xff] }
 0x3a2   : > { %v2063_v61 = vpop.f32.mrf.mxu0 }
 0x3a3   : > { %v2148_v39 = vadd.f32 %v2063_v61, %v1373_v49  ;;  %v1380_v61 = vadd.f32 %v7577_v23, %v8484_v10 }
 0x3a4   : > { %3619 = vmatmul.bf16.gmra.mxu0 %v7535_v11 }
 0x3a5   : > { %v2406_v58 = vrot.slane %v2148_v39, 2  ;;  %3212 = vmatpush.bf16.msrb.mxu1 %v5289_v59 }
 0x3a7   : > { %v2407_v48 = vsel %vm2379_vm1, %v2405_v19, %v2406_v58 }
 0x3a8   : > { %v2495_v57 = vadd.f32 %v2407_v48, %v7398_v31  ;;  %v7654_v7 = vld [vmem:[#allocation2 + $0x2c] sm:$0xff]  ;;  %v7670_v32 = vpop.f32.mrf.mxu1 }
 0x3a9   : > { %v7656_v45 = vld [vmem:[#allocation2 + $0x30] sm:$0xff]  ;;  %3105 = vmatmul.bf16.gmra.mxu1 %v7654_v7  ;;  %3172 = vmatmul.bf16.gmra.mxu3 %v7654_v7 }
 0x3aa   : > { %v2529_v33 = vadd.f32 %v7461_v12, %v2495_v57  ;;  %v2065_v27 = vpop.f32.mrf.mxu0  ;;  %3514 = vmatmul.bf16.gmra.mxu2 %v7656_v45 }
 0x3ab   : > { %v2151_v31 = vadd.f32 %v2065_v27, %v1375_v30  ;;  %v8485_v30 = vld [vmem:[#allocation49_spill] sm:$0xff] }
 0x3ac   : > { %v2559_v62 = vmax.f32 %v2529_v33, 0.0  ;;  %v1383_v23 = vadd.f32 %v7597_v2, %v8485_v30 }
 0x3ad   : > { %v2408_v42 = vrot.slane %v2151_v31, 2 }
 0x3ae   : > { %v2688_v40 = vsel %vm7663_vm5, %v2559_v62, 0.0  ;;  %v2586_v62 = vadd.s32 6, %v7464_v8 }
 0x3af   : > { %v5952_v60 = vpack.c.bf16 %v2688_v40, %v7510_v14  ;;  %v2409_v34 = vsel %vm2379_vm1, %v2406_v58, %v2408_v42 }
 0x3b0   : > { %v2496_v26 = vadd.f32 %v2409_v34, %v7409_v21  ;;  %v1378_v21 = vadd.f32 %v7568_v24, %v8483_v15  ;;  %v7688_v39 = vpop.f32.mrf.mxu1  ;;  %vm2599_vm6 = vcmp.ge.s32.totalorder %v2586_v62, 0  ;;  %vm2639_vm7 = vcmp.lt.s32.totalorder %v2586_v62, 16 }
 0x3b1   : > { %6007 = vst [vmem:[#allocation2 + $0x38] sm:$0xff] %v5952_v60   ;;  %vm2661_vm8 = vmand %vm2599_vm6, %vm2639_vm7 }
 0x3b2   : > { %v2530_v16 = vadd.f32 %v7461_v12, %v2496_v26  ;;  %v2068_v17 = vpop.f32.mrf.mxu0  ;;  %v5775_v26 = vld [vmem:[#allocation8 + $0x34] sm:$0xf] }
 0x3b3   : > { %v2154_v25 = vadd.f32 %v2068_v17, %v1378_v21  ;;  %v5429_v52 = vor.u32 %v5775_v26, %v5426_v37  ;;  %v5594_v26 = vld [vmem:[#allocation8 + $0x1ec] sm:$0xf0] }
 0x3b4   : > { %v2560_v3 = vmax.f32 %v2530_v16, 0.0  ;;  %3624 = vmatmul.bf16.gmra.mxu0 %v7566_v44 }
 0x3b5   : > { %v2410_v24 = vrot.slane %v2154_v25, 2  ;;  %3550 = vmatpush.bf16.msrb.mxu3 %v5429_v52  ;;  %v5618_v25 = vld [vmem:[#allocation8 + $0x21c] sm:$0xf0] }
 0x3b6   : > { %v2689_v53 = vsel %vm7663_vm5, %v2560_v3, 0.0 }
 0x3b7   : > { %v5957_v46 = vpack.c.bf16 %v7510_v14, %v2689_v53 }
 0x3b8   : > { %v7682_v47 = vld [vmem:[#allocation2 + $0x34] sm:$0xff]  ;;  %v7697_v27 = vpop.f32.mrf.mxu1 }
 0x3b9   : > { %v7684_v49 = vld [vmem:[#allocation2 + $0x38] sm:$0xff]  ;;  %6008 = vst [vmem:[#allocation2 + $0x40] sm:$0xff] %v5957_v46   ;;  %3110 = vmatmul.bf16.gmra.mxu1 %v7682_v47  ;;  %3176 = vmatmul.bf16.gmra.mxu3 %v7682_v47 }
 0x3ba   : > { %v2070_v19 = vpop.f32.mrf.mxu0  ;;  %3519 = vmatmul.bf16.gmra.mxu2 %v7684_v49 }
 0x3bb   : > { %v2157_v58 = vadd.f32 %v2070_v19, %v1380_v61  ;;  %v5859_v61 = vld [vmem:[#allocation8 + $0x214] sm:$0xf]  ;;  %v8486_v19 = vld [vmem:[#allocation51_spill] sm:$0xff] }
 0x3bd   : > { %v2411_v48 = vrot.slane %v2157_v58, 2  ;;  %v1385_v58 = vadd.f32 %v7610_v5, %v8486_v19 }
 0x3bf   : > { %v2412_v57 = vsel %vm2379_vm1, %v2410_v24, %v2411_v48 }
 0x3c0   : > { %v2498_v63 = vadd.f32 %v2412_v57, %v7424_v18  ;;  %v7704_v18 = vld [vmem:[#allocation2 + $0x3c] sm:$0xff]  ;;  %v7713_v15 = vpop.f32.mrf.mxu1  ;;  %v8487_v57 = vld [vmem:[#allocation54_spill] sm:$0xff] }
 0x3c1   : > { %v7706_v2 = vld [vmem:[#allocation2 + $0x40] sm:$0xff] }
 0x3c2   : > { %v2073_v33 = vpop.f32.mrf.mxu0  ;;  %v2532_v31 = vadd.f32 %v7461_v12, %v2498_v63  ;;  %v1388_v63 = vadd.f32 %v7625_v38, %v8487_v57 }
 0x3c3   : > { %v2160_v11 = vadd.f32 %v2073_v33, %v1383_v23  ;;  %v5856_v33 = vld [vmem:[#allocation8 + $0x1fc] sm:$0xf] }
 0x3c4   : > { %3629 = vmatmul.bf16.gmra.mxu0 %v7585_v1  ;;  %v2562_v60 = vmax.f32 %v2532_v31, 0.0 }
 0x3c5   : > { %v2413_v42 = vrot.slane %v2160_v11, 2  ;;  %v5606_v11 = vld [vmem:[#allocation8 + $0x204] sm:$0xf0] }
 0x3c6   : > { %v2691_v46 = vsel %vm2661_vm8, %v2562_v60, 0.0  ;;  %v5609_v62 = vor.u32 %v5856_v33, %v5606_v11  ;;  %v5772_v11 = vld [vmem:[#allocation8 + $0x1c] sm:$0xf] }
 0x3c7   : > { %v2414_v40 = vsel %vm2379_vm1, %v2411_v48, %v2413_v42  ;;  %v5621_v48 = vor.u32 %v5859_v61, %v5618_v25  ;;  %v2587_v42 = vadd.s32 7, %v7464_v8 }
 0x3c8   : > { %v2499_v34 = vadd.f32 %v2414_v40, %v7435_v36  ;;  %v5630_v36 = vld [vmem:[#allocation8 + $0x234] sm:$0xf0]  ;;  %v7723_v38 = vpop.f32.mrf.mxu1 }
 0x3c9   : > { %3115 = vmatmul.bf16.gmra.mxu1 %v7704_v18  ;;  %3180 = vmatmul.bf16.gmra.mxu3 %v7704_v18  ;;  %v5633_v3 = vor.u32 %v5862_v4, %v5630_v36  ;;  %vm2600_vm9 = vcmp.ge.s32.totalorder %v2587_v42, 0  ;;  %vm2640_vm10 = vcmp.lt.s32.totalorder %v2587_v42, 16  ;;  %v1390_v4 = vadd.f32 %v7640_v20, %v8488_v13 }
 0x3ca   : > { %v2533_v16 = vadd.f32 %v7461_v12, %v2499_v34  ;;  %v2075_v17 = vpop.f32.mrf.mxu0  ;;  %3524 = vmatmul.bf16.gmra.mxu2 %v7706_v2  ;;  %v5853_v34 = vld [vmem:[#allocation8 + $0x1e4] sm:$0xf]  ;;  %vm7736_vm11 = vmand %vm2600_vm9, %vm2640_vm10 }
 0x3cb   : > { %4002 = vmatpush.bf16.msra.mxu2 %v5633_v3  ;;  %v2163_v30 = vadd.f32 %v2075_v17, %v1385_v58  ;;  %v5597_v6 = vor.u32 %v5853_v34, %v5594_v26  ;;  %v5850_v3 = vld [vmem:[#allocation8 + $0x1cc] sm:$0xf]  ;;  %v5847_v58 = vld [vmem:[#allocation8 + $0x1b4] sm:$0xf]  ;;  %v5276_v34 = vld [vmem:[#allocation8 + $0xe0] sm:$0xf] }
 0x3cc   : > { %v2563_v53 = vmax.f32 %v2533_v16, 0.0  ;;  %v3485_v21 = vpop.f32.mrf.mxu2  ;;  %v5810_v26 = vld [vmem:[#allocation8 + $0xe8] sm:$0xf0] }
 0x3cd   : > { %v2415_v40 = vrot.slane %v2163_v30, 2 }
 0x3ce   : > { %v2692_v10 = vsel %vm2661_vm8, %v2563_v53, 0.0  ;;  %v5582_v53 = vld [vmem:[#allocation8 + $0x1d4] sm:$0xf0] }
 0x3cf   : > { %v5962_v24 = vpack.c.bf16 %v2692_v10, %v2691_v46  ;;  %4003 = vmatpush.bf16.msra.mxu2 %v5621_v48  ;;  %v5585_v10 = vor.u32 %v5850_v3, %v5582_v53 }
 0x3d1   : > { %6009 = vst [vmem:[#allocation2 + $0x48] sm:$0xff] %v5962_v24   ;;  %v5570_v24 = vld [vmem:[#allocation8 + $0x1bc] sm:$0xf0] }
 0x3d2   : > { %v2078_v23 = vpop.f32.mrf.mxu0  ;;  %v5573_v30 = vor.u32 %v5847_v58, %v5570_v24 }
 0x3d3   : > { %v2166_v31 = vadd.f32 %v2078_v23, %v1388_v63  ;;  %4004 = vmatpush.bf16.msra.mxu2 %v5609_v62 }
 0x3d4   : > { %3634 = vmatmul.bf16.gmra.mxu0 %v7615_v28  ;;  %v7721_v5 = vpop.f32.mrf.mxu2 }
 0x3d5   : > { %v2416_v60 = vrot.slane %v2166_v31, 2  ;;  %v5414_v31 = vld [vmem:[#allocation8 + $0x24] sm:$0xf0] }
 0x3d7   : > { %v2417_v37 = vsel %vm2379_vm1, %v2415_v40, %v2416_v60  ;;  %4005 = vmatpush.bf16.msra.mxu2 %v5597_v6  ;;  %v5417_v40 = vor.u32 %v5772_v11, %v5414_v31  ;;  %v5277_v6 = vor.u32 %v5810_v26, %v5276_v34 }
 0x3d8   : > { %v2501_v16 = vadd.f32 %v2417_v37, %v7451_v29  ;;  %v7727_v17 = vld [vmem:[#allocation2 + $0x44] sm:$0xff]  ;;  %v5844_v37 = vld [vmem:[#allocation8 + $0x19c] sm:$0xf] }
 0x3d9   : > { %v7729_v52 = vld [vmem:[#allocation2 + $0x48] sm:$0xff]  ;;  %3120 = vmatmul.bf16.gmra.mxu1 %v7727_v17  ;;  %3185 = vmatmul.bf16.gmra.mxu3 %v7727_v17 }
 0x3da   : > { %v2535_v36 = vadd.f32 %v7461_v12, %v2501_v16  ;;  %v2080_v59 = vpop.f32.mrf.mxu0  ;;  %3529 = vmatmul.bf16.gmra.mxu2 %v7729_v52  ;;  %v5558_v16 = vld [vmem:[#allocation8 + $0x1a4] sm:$0xf0]  ;;  %3551 = vmatpush.bf16.msrb.mxu3 %v5417_v40  ;;  %v2588_v40 = vadd.s32 8, %v7464_v8 }
 0x3db   : > { %v2169_v46 = vadd.f32 %v2080_v59, %v1390_v4  ;;  %4006 = vmatpush.bf16.msra.mxu2 %v5585_v10  ;;  %v5561_v13 = vor.u32 %v5844_v37, %v5558_v16  ;;  %3213 = vmatpush.bf16.msrb.mxu1 %v5277_v6  ;;  %v5841_v4 = vld [vmem:[#allocation8 + $0x184] sm:$0xf]  ;;  %v8491_v59 = vld [vmem:[#allocation60_spill] sm:$0xff] }
 0x3dc   : > { %v2565_v61 = vmax.f32 %v2535_v36, 0.0  ;;  %v7741_v25 = vpop.f32.mrf.mxu2  ;;  %v5546_v36 = vld [vmem:[#allocation8 + $0x18c] sm:$0xf0]  ;;  %v1393_v3 = vadd.f32 %v7649_v51, %v8491_v59  ;;  %vm2601_vm12 = vcmp.ge.s32.totalorder %v2588_v40, 0  ;;  %vm2641_vm13 = vcmp.lt.s32.totalorder %v2588_v40, 16 }
 0x3dd   : > { %v2418_v20 = vrot.slane %v2169_v46, 2  ;;  %v5264_v59 = vld [vmem:[#allocation8 + $0xc8] sm:$0xf]  ;;  %vm2667_vm14 = vmand %vm2601_vm12, %vm2641_vm13 }
 0x3de   : > { %v2694_v19 = vsel %vm7736_vm11, %v2565_v61, 0.0  ;;  %v3086_v63 = vpop.f32.mrf.mxu1  ;;  %v5549_v61 = vor.u32 %v5841_v4, %v5546_v36  ;;  %v5769_v4 = vld [vmem:[#allocation8 + $0x4] sm:$0xf]  ;;  %v5402_v36 = vld [vmem:[#allocation8 + $0xc] sm:$0xf0] }
 0x3df   : > { %v5967_v48 = vpack.c.bf16 %v2694_v19, %v7510_v14  ;;  %v2419_v57 = vsel %vm2379_vm1, %v2416_v60, %v2418_v20  ;;  %v7748_v33 = vadd.f32 %v3485_v21, %v3086_v63  ;;  %4007 = vmatpush.bf16.msra.mxu2 %v5573_v30  ;;  %v8492_v20 = vld [vmem:[#allocation62_spill] sm:$0xff] }
 0x3e0   : > { %v2502_v23 = vadd.f32 %v2419_v57, %v7472_v55  ;;  %v1395_v19 = vadd.f32 %v7670_v32, %v8492_v20  ;;  %v5807_v20 = vld [vmem:[#allocation8 + $0xd0] sm:$0xf0] }
 0x3e1   : > { %6010 = vst [vmem:[#allocation2 + $0x50] sm:$0xff] %v5967_v48  }
 0x3e2   : > { %v2536_v62 = vadd.f32 %v7461_v12, %v2502_v23  ;;  %v2083_v42 = vpop.f32.mrf.mxu0  ;;  %v8493_v23 = vld [vmem:[#allocation65_spill] sm:$0xff] }
 0x3e3   : > { %4008 = vmatpush.bf16.msra.mxu2 %v5561_v13  ;;  %v2172_v58 = vadd.f32 %v2083_v42, %v1393_v3  ;;  %v1398_v11 = vadd.f32 %v7688_v39, %v8493_v23 }
 0x3e4   : > { %v2566_v60 = vmax.f32 %v2536_v62, 0.0  ;;  %3639 = vmatmul.bf16.gmra.mxu0 %v7635_v56  ;;  %v7752_v55 = vpop.f32.mrf.mxu2  ;;  %v7767_v24 = vpop.f32.mrf.mxu3 }
 0x3e5   : > { %v2420_v48 = vrot.slane %v2172_v58, 2 }
 0x3e6   : > { %v2695_v21 = vsel %vm7736_vm11, %v2566_v60, 0.0  ;;  %v7770_v30 = vpop.f32.mrf.mxu1 }
 0x3e7   : > { %v5972_v53 = vpack.c.bf16 %v7510_v14, %v2695_v21  ;;  %4009 = vmatpush.bf16.msra.mxu2 %v5549_v61 }
 0x3e8   : > { %v7759_v46 = vld [vmem:[#allocation2 + $0x4c] sm:$0xff] }
 0x3e9   : > { %v7761_v10 = vld [vmem:[#allocation2 + $0x50] sm:$0xff]  ;;  %6011 = vst [vmem:[#allocation2 + $0x58] sm:$0xff] %v5972_v53   ;;  %3125 = vmatmul.bf16.gmra.mxu1 %v7759_v46  ;;  %3189 = vmatmul.bf16.gmra.mxu3 %v7759_v46 }
 0x3ea   : > { %v2085_v29 = vpop.f32.mrf.mxu0  ;;  %3534 = vmatmul.bf16.gmra.mxu2 %v7761_v10 }
 0x3eb   : > { %v2175_v51 = vadd.f32 %v2085_v29, %v1395_v19 }
 0x3ec   : > { %v3495_v63 = vpop.f32.mrf.mxu2  ;;  %v7777_v34 = vpop.f32.mrf.mxu3 }
 0x3ed   : > { %v2421_v57 = vrot.slane %v2175_v51, 2 }
 0x3ef   : > { %v2422_v32 = vsel %vm2379_vm1, %v2420_v48, %v2421_v57 }
 0x3f0   : > { %v2504_v31 = vadd.f32 %v2422_v32, %v7494_v0  ;;  %v7788_v13 = vld [vmem:[#allocation2 + $0x54] sm:$0xff] }
 0x3f1   : > { %v7790_v21 = vld [vmem:[#allocation2 + $0x58] sm:$0xff] }
 0x3f2   : > { %v2088_v62 = vpop.f32.mrf.mxu0  ;;  %v2538_v6 = vadd.f32 %v7461_v12, %v2504_v31  ;;  %v8495_v31 = vld [vmem:[#allocation69_spill] sm:$0xff] }
 0x3f3   : > { %v2178_v42 = vadd.f32 %v2088_v62, %v1398_v11  ;;  %v1403_v62 = vadd.f32 %v7713_v15, %v8495_v31 }
 0x3f4   : > { %3644 = vmatmul.bf16.gmra.mxu0 %v7656_v45  ;;  %v7780_v37 = vpop.f32.mrf.mxu2  ;;  %v2568_v3 = vmax.f32 %v2538_v6, 0.0  ;;  %v2589_v6 = vadd.s32 9, %v7464_v8 }
 0x3f5   : > { %v2423_v26 = vrot.slane %v2178_v42, 2 }
 0x3f6   : > { %v3091_v60 = vpop.f32.mrf.mxu1  ;;  %v2697_v29 = vsel %vm2667_vm14, %v2568_v3, 0.0  ;;  %vm2602_vm15 = vcmp.ge.s32.totalorder %v2589_v6, 0  ;;  %vm2642_vm2 = vcmp.lt.s32.totalorder %v2589_v6, 16  ;;  %v8496_v3 = vld [vmem:[#allocation72_spill] sm:$0xff] }
 0x3f7   : > { %v2424_v16 = vsel %vm2379_vm1, %v2421_v57, %v2423_v26  ;;  %v7786_v0 = vadd.f32 %v7741_v25, %v3091_v60  ;;  %v5265_v25 = vor.u32 %v5807_v20, %v5264_v59  ;;  %v1405_v8 = vadd.f32 %v7723_v38, %v8496_v3  ;;  %vm7823_vm3 = vmand %vm2602_vm15, %vm2642_vm2  ;;  %v5636_v38 = vld [vmem:[#allocation8 + $0x230] sm:$0xf] }
 0x3f8   : > { %v2505_v39 = vadd.f32 %v2424_v16, %v7518_v54  ;;  %v5405_v54 = vor.u32 %v5769_v4, %v5402_v36 }
 0x3f9   : > { %3130 = vmatmul.bf16.gmra.mxu1 %v7788_v13  ;;  %3193 = vmatmul.bf16.gmra.mxu3 %v7788_v13 }
 0x3fa   : > { %v2539_v53 = vadd.f32 %v7461_v12, %v2505_v39  ;;  %v2090_v61 = vpop.f32.mrf.mxu0  ;;  %3539 = vmatmul.bf16.gmra.mxu2 %v7790_v21  ;;  %3552 = vmatpush.bf16.msrb.mxu3 %v5405_v54  ;;  %v8494_v12 = vld [vmem:[#allocation67_spill] sm:$0xff] }
 0x3fb   : > { %3214 = vmatpush.bf16.msrb.mxu1 %v5265_v25  ;;  %v1400_v57 = vadd.f32 %v7697_v27, %v8494_v12  ;;  %v5864_v25 = vld [vmem:[#allocation8 + $0x238] sm:$0xf0] }
 0x3fc   : > { %v2569_v19 = vmax.f32 %v2539_v53, 0.0  ;;  %v3160_v58 = vpop.f32.mrf.mxu3  ;;  %v7816_v53 = vld [vmem:[#allocation2 + $0x18] sm:$0xff] }
 0x3fd   : > { %v3500_v48 = vpop.f32.mrf.mxu2  ;;  %v2181_v42 = vadd.f32 %v2090_v61, %v1400_v57  ;;  %v6259_v61 = vld [vmem:[%s8290_s2] ss:$0 sm:$0xff]  ;;  %v5637_v58 = vor.u32 %v5864_v25, %v5636_v38 }
 0x3fe   : > { %v2698_v51 = vsel %vm2667_vm14, %v2569_v19, 0.0  ;;  %v3093_v23 = vpop.f32.mrf.mxu1 }
 0x3ff   : > { %v5977_v32 = vpack.c.bf16 %v2698_v51, %v2697_v29  ;;  %v7800_v11 = vadd.f32 %v7752_v55, %v3093_v23  ;;  %v2425_v16 = vrot.slane %v2181_v42, 2  ;;  %4063 = vmatpush.bf16.msra.mxu3 %v5637_v58  ;;  %v5863_v23 = vld [vmem:[#allocation8 + $0x230] sm:$0xf0]  ;;  %v5616_v58 = vld [vmem:[#allocation8 + $0x210] sm:$0xf] }
 0x401   : > { %6012 = vst [vmem:[#allocation2 + $0x60] sm:$0xff] %v5977_v32   ;;  %v5628_v32 = vld [vmem:[#allocation8 + $0x228] sm:$0xf] }
 0x402   : > { %v2093_v40 = vpop.f32.mrf.mxu0 }
 0x403   : > { %v2184_v26 = vadd.f32 %v2093_v40, %v1403_v62  ;;  %v5629_v40 = vor.u32 %v5863_v23, %v5628_v32 }
 0x404   : > { %3649 = vmatmul.bf16.gmra.mxu0 %v7684_v49  ;;  %v7806_v39 = vpop.f32.mrf.mxu3 }
 0x405   : > { %v2426_v60 = vrot.slane %v2184_v26, 2  ;;  %v3502_v27 = vpop.f32.mrf.mxu2  ;;  %3933 = vmatpush.bf16.msra.mxu1 %v5629_v40 }
 0x406   : > { %v3096_v55 = vpop.f32.mrf.mxu1 }
 0x407   : > { %v2427_v4 = vsel %vm2379_vm1, %v2425_v16, %v2426_v60  ;;  %v7810_v15 = vadd.f32 %v3495_v63, %v3096_v55 }
 0x408   : > { %v2507_v36 = vadd.f32 %v2427_v4, %v7545_v43  ;;  %v7812_v59 = vld [vmem:[#allocation2 + $0x5c] sm:$0xff] }
 0x409   : > { %3135 = vmatmul.bf16.gmra.mxu1 %v7812_v59  ;;  %3198 = vmatmul.bf16.gmra.mxu3 %v7812_v59 }
 0x40a   : > { %v2541_v54 = vadd.f32 %v6259_v61, %v2507_v36  ;;  %v2095_v20 = vpop.f32.mrf.mxu0  ;;  %4010 = vmatmul.bf16.vlgmr.msra.gmra.mxu2 %v7816_v53 }
 0x40b   : > { %v2187_v63 = vadd.f32 %v2095_v20, %v1405_v8 }
 0x40c   : > { %v2571_v19 = vmax.f32 %v2541_v54, 0.0  ;;  %v7828_v51 = vpop.f32.mrf.mxu3 }
 0x40d   : > { %v2428_v29 = vrot.slane %v2187_v63, 2  ;;  %v3505_v57 = vpop.f32.mrf.mxu2 }
 0x40e   : > { %v2700_v12 = vsel %vm7823_vm3, %v2571_v19, 0.0  ;;  %v3098_v42 = vpop.f32.mrf.mxu1 }
 0x40f   : > { %v5982_v31 = vpack.c.bf16 %v2700_v12, %v7510_v14  ;;  %v2429_v62 = vsel %vm2379_vm1, %v2426_v60, %v2428_v29  ;;  %v7836_v6 = vadd.f32 %v7780_v37, %v3098_v42  ;;  %v7846_v37 = vld [vmem:[#allocation2 + $0x20] sm:$0xff]  ;;  %v5860_v29 = vld [vmem:[#allocation8 + $0x218] sm:$0xf0]  ;;  %vm4236_vm1 = vcmask 1040384  }
 0x410   : > { %v2508_v26 = vadd.f32 %v2429_v62, %v7562_v22  ;;  %v5617_v32 = vor.u32 %v5860_v29, %v5616_v58 }
 0x411   : > { %6013 = vst [vmem:[#allocation2 + $0x68] sm:$0xff] %v5982_v31   ;;  %v7860_v31 = vld [vmem:[#allocation2 + $0x28] sm:$0xff] }
 0x412   : > { %v2542_v16 = vadd.f32 %v6259_v61, %v2508_v26  ;;  %3934 = vmatpush.bf16.msra.mxu1 %v5617_v32 }
 0x414   : > { %v2572_v4 = vmax.f32 %v2542_v16, 0.0  ;;  %3654 = vmatmul.bf16.gmra.mxu0 %v7706_v2  ;;  %v3166_v55 = vpop.f32.mrf.mxu3 }
 0x415   : > { %v3507_v3 = vpop.f32.mrf.mxu2 }
 0x416   : > { %v2701_v36 = vsel %vm7823_vm3, %v2572_v4, 0.0  ;;  %v3101_v8 = vpop.f32.mrf.mxu1 }
 0x417   : > { %v5987_v60 = vpack.c.bf16 %v7510_v14, %v2701_v36  ;;  %v7842_v54 = vadd.f32 %v3500_v48, %v3101_v8  ;;  %v5624_v14 = vld [vmem:[#allocation8 + $0x218] sm:$0xf]  ;;  %v5861_v48 = vld [vmem:[#allocation8 + $0x220] sm:$0xf0]  ;;  %v5858_v8 = vld [vmem:[#allocation8 + $0x208] sm:$0xf0] }
 0x418   : > { %v7844_v22 = vld [vmem:[#allocation2 + $0x64] sm:$0xff]  ;;  %v5625_v38 = vor.u32 %v5861_v48, %v5624_v14  ;;  %v7871_v36 = vld [vmem:[#allocation2 + $0x30] sm:$0xff] }
 0x419   : > { %6014 = vst [vmem:[#allocation2 + $0x70] sm:$0xff] %v5987_v60   ;;  %3140 = vmatmul.bf16.gmra.mxu1 %v7844_v22  ;;  %3202 = vmatmul.bf16.gmra.mxu3 %v7844_v22  ;;  %v5612_v60 = vld [vmem:[#allocation8 + $0x200] sm:$0xf]  ;;  %v5604_v48 = vld [vmem:[#allocation8 + $0x1f8] sm:$0xf] }
 0x41a   : > { %4015 = vmatmul.bf16.gmra.mxu2 %v7846_v37  ;;  %4064 = vmatpush.bf16.msra.mxu3 %v5625_v38  ;;  %v5857_v38 = vld [vmem:[#allocation8 + $0x200] sm:$0xf0] }
 0x41c   : > { %v7851_v61 = vpop.f32.mrf.mxu3 }
 0x41d   : > { %v3510_v20 = vpop.f32.mrf.mxu2 }
 0x41e   : > { %v3103_v43 = vpop.f32.mrf.mxu1 }
 0x41f   : > { %v7853_v63 = vadd.f32 %v3502_v27, %v3103_v43  ;;  %v6260_v27 = vld [vmem:[#allocation2] sm:$0xff] }
 0x424   : > { %3659 = vmatmul.bf16.gmra.mxu0 %v7729_v52  ;;  %v7856_v25 = vpop.f32.mrf.mxu3 }
 0x425   : > { %v3512_v19 = vpop.f32.mrf.mxu2 }
 0x426   : > { %v3106_v12 = vpop.f32.mrf.mxu1 }
 0x427   : > { %v7858_v23 = vadd.f32 %v3505_v57, %v3106_v12 }
 0x429   : > { %3215 = vmatmul.bf16.vlgmr.msrb.gmra.mxu1 %v7551_v9  ;;  %3553 = vmatmul.bf16.vlgmr.msrb.gmra.mxu3 %v6260_v27  ;;  %v6261_v9 = vld [vmem:[#allocation2 + $0x8] sm:$0xff] }
 0x42a   : > { %4019 = vmatmul.bf16.gmra.mxu2 %v7860_v31 }
 0x42c   : > { %v3173_v62 = vpop.f32.mrf.mxu3 }
 0x42d   : > { %v3515_v42 = vpop.f32.mrf.mxu2  ;;  %v7882_v62 = vld [vmem:[#allocation2 + $0x38] sm:$0xff] }
 0x42e   : > { %v3108_v40 = vpop.f32.mrf.mxu1 }
 0x42f   : > { %v7864_v26 = vadd.f32 %v3507_v3, %v3108_v40  ;;  %v5613_v3 = vor.u32 %v5858_v8, %v5612_v60  ;;  %v5600_v60 = vld [vmem:[#allocation8 + $0x1e8] sm:$0xf]  ;;  %v5855_v8 = vld [vmem:[#allocation8 + $0x1f0] sm:$0xf0] }
 0x431   : > { %4065 = vmatpush.bf16.msra.mxu3 %v5613_v3  ;;  %v5601_v3 = vor.u32 %v5855_v8, %v5600_v60 }
 0x434   : > { %3664 = vmatmul.bf16.gmra.mxu0 %v7761_v10  ;;  %v7867_v16 = vpop.f32.mrf.mxu3 }
 0x435   : > { %v3517_v57 = vpop.f32.mrf.mxu2  ;;  %4066 = vmatpush.bf16.msra.mxu3 %v5601_v3 }
 0x436   : > { %v3111_v4 = vpop.f32.mrf.mxu1 }
 0x437   : > { %v7869_v55 = vadd.f32 %v3510_v20, %v3111_v4  ;;  %v5605_v20 = vor.u32 %v5857_v38, %v5604_v48  ;;  %v5592_v38 = vld [vmem:[#allocation8 + $0x1e0] sm:$0xf] }
 0x439   : > { %8499 = vst [vmem:[#allocation33_spill] sm:$0xff] %v7869_v55  ;;  %3220 = vmatmul.bf16.gmra.mxu1 %v7583_v35  ;;  %3558 = vmatmul.bf16.gmra.mxu3 %v6261_v9 }
 0x43a   : > { %4023 = vmatmul.bf16.gmra.mxu2 %v7871_v36  ;;  %3935 = vmatpush.bf16.msra.mxu1 %v5605_v20 }
 0x43c   : > { %v7875_v43 = vpop.f32.mrf.mxu3 }
 0x43d   : > { %v3520_v14 = vpop.f32.mrf.mxu2 }
 0x43e   : > { %v3113_v58 = vpop.f32.mrf.mxu1 }
 0x43f   : > { %v7877_v29 = vadd.f32 %v3512_v19, %v3113_v58  ;;  %v5854_v58 = vld [vmem:[#allocation8 + $0x1e8] sm:$0xf0] }
 0x440   : > { %v5593_v20 = vor.u32 %v5854_v58, %v5592_v38  ;;  %v7906_v58 = vld [vmem:[#allocation2 + $0x48] sm:$0xff] }
 0x441   : > { %8500 = vst [vmem:[#allocation86_spill] sm:$0xff] %v7877_v29 }
 0x442   : > { %3936 = vmatpush.bf16.msra.mxu1 %v5593_v20 }
 0x444   : > { %3669 = vmatmul.bf16.gmra.mxu0 %v7790_v21  ;;  %v3179_v35 = vpop.f32.mrf.mxu3 }
 0x445   : > { %v3522_v12 = vpop.f32.mrf.mxu2  ;;  %v7895_v35 = vld [vmem:[#allocation2 + $0x40] sm:$0xff] }
 0x446   : > { %v3116_v32 = vpop.f32.mrf.mxu1 }
 0x447   : > { %v7880_v27 = vadd.f32 %v3515_v42, %v3116_v32 }
 0x449   : > { %8501 = vst [vmem:[#allocation31_spill] sm:$0xff] %v7880_v27  ;;  %3225 = vmatmul.bf16.gmra.mxu1 %v7613_v41  ;;  %3562 = vmatmul.bf16.gmra.mxu3 %v7566_v44 }
 0x44a   : > { %4028 = vmatmul.bf16.gmra.mxu2 %v7882_v62 }
 0x44c   : > { %v7887_v40 = vpop.f32.mrf.mxu3 }
 0x44d   : > { %v3525_v19 = vpop.f32.mrf.mxu2 }
 0x44e   : > { %v3118_v4 = vpop.f32.mrf.mxu1 }
 0x44f   : > { %v7889_v9 = vadd.f32 %v3517_v57, %v3118_v4 }
 0x451   : > { %8502 = vst [vmem:[#allocation88_spill] sm:$0xff] %v7889_v9  ;;  %v7917_v9 = vld [vmem:[#allocation2 + $0x50] sm:$0xff] }
 0x454   : > { %v7891_v48 = vpop.f32.mrf.mxu3 }
 0x455   : > { %v3527_v42 = vpop.f32.mrf.mxu2 }
 0x456   : > { %v3121_v41 = vpop.f32.mrf.mxu1 }
 0x457   : > { %v7893_v44 = vadd.f32 %v3520_v14, %v3121_v41 }
 0x459   : > { %8503 = vst [vmem:[#allocation34_spill] sm:$0xff] %v7893_v44  ;;  %3230 = vmatmul.bf16.gmra.mxu1 %v7633_v50  ;;  %3566 = vmatmul.bf16.gmra.mxu3 %v7585_v1  ;;  %v5588_v1 = vld [vmem:[#allocation8 + $0x1d0] sm:$0xf]  ;;  %v5852_v50 = vld [vmem:[#allocation8 + $0x1d8] sm:$0xf0] }
 0x45a   : > { %4032 = vmatmul.bf16.gmra.mxu2 %v7895_v35  ;;  %v5589_v41 = vor.u32 %v5852_v50, %v5588_v1 }
 0x45c   : > { %v3186_v57 = vpop.f32.mrf.mxu3  ;;  %4067 = vmatpush.bf16.msra.mxu3 %v5589_v41 }
 0x45d   : > { %v3530_v32 = vpop.f32.mrf.mxu2  ;;  %v5580_v57 = vld [vmem:[#allocation8 + $0x1c8] sm:$0xf] }
 0x45e   : > { %v3123_v4 = vpop.f32.mrf.mxu1 }
 0x45f   : > { %v7900_v60 = vadd.f32 %v3522_v12, %v3123_v4  ;;  %v5851_v4 = vld [vmem:[#allocation8 + $0x1d0] sm:$0xf0] }
 0x461   : > { %8504 = vst [vmem:[#allocation36_spill] sm:$0xff] %v7900_v60 }
 0x464   : > { %v7902_v8 = vpop.f32.mrf.mxu3 }
 0x465   : > { %v3532_v3 = vpop.f32.mrf.mxu2 }
 0x466   : > { %v3126_v38 = vpop.f32.mrf.mxu1 }
 0x467   : > { %v7904_v14 = vadd.f32 %v3525_v19, %v3126_v38  ;;  %v5581_v19 = vor.u32 %v5851_v4, %v5580_v57 }
 0x469   : > { %8505 = vst [vmem:[#allocation52_spill] sm:$0xff] %v7904_v14  ;;  %3235 = vmatmul.bf16.gmra.mxu1 %v7654_v7  ;;  %3571 = vmatmul.bf16.gmra.mxu3 %v7615_v28 }
 0x46a   : > { %4036 = vmatmul.bf16.gmra.mxu2 %v7906_v58  ;;  %3937 = vmatpush.bf16.msra.mxu1 %v5581_v19  ;;  %v5848_v19 = vld [vmem:[#allocation8 + $0x1b8] sm:$0xf0] }
 0x46c   : > { %v7911_v20 = vpop.f32.mrf.mxu3 }
 0x46d   : > { %v3535_v12 = vpop.f32.mrf.mxu2 }
 0x46e   : > { %v3128_v60 = vpop.f32.mrf.mxu1 }
 0x46f   : > { %v7913_v38 = vadd.f32 %v3527_v42, %v3128_v60  ;;  %v5576_v60 = vld [vmem:[#allocation8 + $0x1b8] sm:$0xf] }
 0x471   : > { %8506 = vst [vmem:[#allocation94_spill] sm:$0xff] %v7913_v38  ;;  %v7930_v38 = vld [vmem:[#allocation2 + $0x58] sm:$0xff] }
 0x474   : > { %v3192_v14 = vpop.f32.mrf.mxu3 }
 0x475   : > { %v3537_v7 = vpop.f32.mrf.mxu2  ;;  %v5849_v14 = vld [vmem:[#allocation8 + $0x1c0] sm:$0xf0] }
 0x476   : > { %v3131_v44 = vpop.f32.mrf.mxu1  ;;  %v5577_v57 = vor.u32 %v5849_v14, %v5576_v60 }
 0x477   : > { %v7915_v28 = vadd.f32 %v3530_v32, %v3131_v44  ;;  %v5568_v32 = vld [vmem:[#allocation8 + $0x1b0] sm:$0xf] }
 0x478   : > { %4068 = vmatpush.bf16.msra.mxu3 %v5577_v57 }
 0x479   : > { %8507 = vst [vmem:[#allocation39_spill] sm:$0xff] %v7915_v28  ;;  %3240 = vmatmul.bf16.gmra.mxu1 %v7682_v47  ;;  %3575 = vmatmul.bf16.gmra.mxu3 %v7635_v56  ;;  %v5569_v28 = vor.u32 %v5848_v19, %v5568_v32  ;;  %v7941_v19 = vld [vmem:[#allocation2 + $0x60] sm:$0xff] }
 0x47a   : > { %4041 = vmatmul.bf16.gmra.mxu2 %v7917_v9 }
 0x47b   : > { %3938 = vmatpush.bf16.msra.mxu1 %v5569_v28 }
 0x47c   : > { %v7922_v1 = vpop.f32.mrf.mxu3 }
 0x47d   : > { %v3540_v50 = vpop.f32.mrf.mxu2 }
 0x47e   : > { %v3133_v41 = vpop.f32.mrf.mxu1 }
 0x47f   : > { %v7924_v42 = vadd.f32 %v3532_v3, %v3133_v41 }
 0x481   : > { %8508 = vst [vmem:[#allocation41_spill] sm:$0xff] %v7924_v42 }
 0x484   : > { %v7926_v4 = vpop.f32.mrf.mxu3 }
 0x485   : > { %v3542_v44 = vpop.f32.mrf.mxu2 }
 0x486   : > { %v3136_v47 = vpop.f32.mrf.mxu1 }
 0x487   : > { %v7928_v56 = vadd.f32 %v3535_v12, %v3136_v47 }
 0x489   : > { %8509 = vst [vmem:[#allocation95_spill] sm:$0xff] %v7928_v56  ;;  %3245 = vmatmul.bf16.gmra.mxu1 %v7704_v18  ;;  %3579 = vmatmul.bf16.gmra.mxu3 %v7656_v45  ;;  %v5564_v45 = vld [vmem:[#allocation8 + $0x1a0] sm:$0xf]  ;;  %v5846_v18 = vld [vmem:[#allocation8 + $0x1a8] sm:$0xf0] }
 0x48a   : > { %4045 = vmatmul.bf16.gmra.mxu2 %v7930_v38  ;;  %v5565_v28 = vor.u32 %v5846_v18, %v5564_v45 }
 0x48c   : > { %v3199_v3 = vpop.f32.mrf.mxu3  ;;  %4069 = vmatpush.bf16.msra.mxu3 %v5565_v28 }
 0x48d   : > { %v4011_v41 = vpop.f32.mrf.mxu2  ;;  %v5556_v3 = vld [vmem:[#allocation8 + $0x198] sm:$0xf] }
 0x48e   : > { %v3138_v60 = vpop.f32.mrf.mxu1 }
 0x48f   : > { %v7935_v14 = vadd.f32 %v3537_v7, %v3138_v60  ;;  %v5845_v60 = vld [vmem:[#allocation8 + $0x1a0] sm:$0xf0] }
 0x491   : > { %8510 = vst [vmem:[#allocation58_spill] sm:$0xff] %v7935_v14 }
 0x494   : > { %v7937_v57 = vpop.f32.mrf.mxu3 }
 0x495   : > { %v4013_v42 = vpop.f32.mrf.mxu2 }
 0x496   : > { %v3141_v32 = vpop.f32.mrf.mxu1 }
 0x497   : > { %v7939_v12 = vadd.f32 %v3540_v50, %v3141_v32  ;;  %v5557_v50 = vor.u32 %v5845_v60, %v5556_v3 }
 0x499   : > { %8511 = vst [vmem:[#allocation42_spill] sm:$0xff] %v7939_v12  ;;  %3250 = vmatmul.bf16.gmra.mxu1 %v7727_v17  ;;  %3584 = vmatmul.bf16.gmra.mxu3 %v7684_v49  ;;  %v7952_v49 = vld [vmem:[#allocation2 + $0x68] sm:$0xff] }
 0x49a   : > { %4049 = vmatmul.bf16.gmra.mxu2 %v7941_v19  ;;  %3939 = vmatpush.bf16.msra.mxu1 %v5557_v50 }
 0x49c   : > { %v7946_v47 = vpop.f32.mrf.mxu3 }
 0x49d   : > { %v4016_v7 = vpop.f32.mrf.mxu2 }
 0x49e   : > { %v3143_v14 = vpop.f32.mrf.mxu1 }
 0x49f   : > { %v7948_v32 = vadd.f32 %v3542_v44, %v3143_v14  ;;  %v5552_v14 = vld [vmem:[#allocation8 + $0x188] sm:$0xf] }
 0x4a1   : > { %8512 = vst [vmem:[#allocation44_spill] sm:$0xff] %v7948_v32  ;;  %v5544_v32 = vld [vmem:[#allocation8 + $0x180] sm:$0xf] }
 0x4a4   : > { %v3205_v12 = vpop.f32.mrf.mxu3 }
 0x4a5   : > { %v4017_v17 = vpop.f32.mrf.mxu2  ;;  %v5843_v12 = vld [vmem:[#allocation8 + $0x190] sm:$0xf0] }
 0x4a6   : > { %v7950_v56 = vpop.f32.mrf.mxu1  ;;  %v5553_v3 = vor.u32 %v5843_v12, %v5552_v14 }
 0x4a8   : > { %4070 = vmatpush.bf16.msra.mxu3 %v5553_v3 }
 0x4a9   : > { %3255 = vmatmul.bf16.gmra.mxu1 %v7759_v46  ;;  %3588 = vmatmul.bf16.gmra.mxu3 %v7706_v2  ;;  %v5842_v2 = vld [vmem:[#allocation8 + $0x188] sm:$0xf0] }
 0x4aa   : > { %4054 = vmatmul.bf16.gmra.mxu2 %v7952_v49  ;;  %v5545_v29 = vor.u32 %v5842_v2, %v5544_v32 }
 0x4ac   : > { %v3554_v45 = vpop.f32.mrf.mxu3  ;;  %3940 = vmatpush.bf16.msra.mxu1 %v5545_v29 }
 0x4ad   : > { %v3555_v18 = vadd.f32 %v3554_v45, %v7767_v24  ;;  %v4020_v28 = vpop.f32.mrf.mxu2  ;;  %v7967_v24 = vld [vmem:[#allocation2 + $0x70] sm:$0xff] }
 0x4ae   : > { %v7958_v7 = vpop.f32.mrf.mxu1 }
 0x4af   : > { %v7960_v44 = vadd.f32 %v4011_v41, %v3555_v18 }
 0x4b4   : > { %v3556_v60 = vpop.f32.mrf.mxu3 }
 0x4b5   : > { %v3557_v50 = vadd.f32 %v3556_v60, %v7777_v34  ;;  %v4022_v46 = vpop.f32.mrf.mxu2 }
 0x4b6   : > { %v7963_v27 = vpop.f32.mrf.mxu1 }
 0x4b7   : > { %v7965_v55 = vadd.f32 %v4013_v42, %v3557_v50 }
 0x4b9   : > { %3260 = vmatmul.bf16.gmra.mxu1 %v7788_v13  ;;  %3592 = vmatmul.bf16.gmra.mxu3 %v7729_v52 }
 0x4ba   : > { %4058 = vmatmul.bf16.gmra.mxu2 %v7967_v24 }
 0x4bc   : > { %v3559_v41 = vpop.f32.mrf.mxu3 }
 0x4bd   : > { %v4024_v45 = vpop.f32.mrf.mxu2 }
 0x4be   : > { %v7972_v34 = vpop.f32.mrf.mxu1 }
 0x4c4   : > { %v3560_v18 = vpop.f32.mrf.mxu3 }
 0x4c5   : > { %v3561_v14 = vadd.f32 %v3560_v18, %v7806_v39  ;;  %v4026_v12 = vpop.f32.mrf.mxu2 }
 0x4c6   : > { %v7975_v32 = vpop.f32.mrf.mxu1 }
 0x4c7   : > { %v7977_v42 = vadd.f32 %v4017_v17, %v3561_v14 }
 0x4c9   : > { %3265 = vmatmul.bf16.gmra.mxu1 %v7812_v59  ;;  %3597 = vmatmul.bf16.gmra.mxu3 %v7761_v10 }
 0x4cc   : > { %v3563_v13 = vpop.f32.mrf.mxu3 }
 0x4cd   : > { %v3564_v52 = vadd.f32 %v3563_v13, %v7828_v51  ;;  %v4029_v29 = vpop.f32.mrf.mxu2 }
 0x4ce   : > { %v7982_v3 = vpop.f32.mrf.mxu1 }
 0x4cf   : > { %v7984_v60 = vadd.f32 %v4020_v28, %v3564_v52 }
 0x4d4   : > { %v3565_v50 = vpop.f32.mrf.mxu3 }
 0x4d5   : > { %v4030_v46 = vpop.f32.mrf.mxu2 }
 0x4d6   : > { %v7986_v39 = vpop.f32.mrf.mxu1 }
 0x4d9   : > { %3270 = vmatmul.bf16.gmra.mxu1 %v7844_v22  ;;  %3601 = vmatmul.bf16.gmra.mxu3 %v7790_v21 }
 0x4dc   : > { %v3567_v17 = vpop.f32.mrf.mxu3 }
 0x4dd   : > { %v3568_v59 = vadd.f32 %v3567_v17, %v7851_v61  ;;  %v4033_v10 = vpop.f32.mrf.mxu2 }
 0x4de   : > { %v7991_v2 = vpop.f32.mrf.mxu1 }
 0x4df   : > { %v7993_v51 = vadd.f32 %v4024_v45, %v3568_v59 }
 0x4e4   : > { %v3569_v41 = vpop.f32.mrf.mxu3 }
 0x4e5   : > { %v3570_v28 = vadd.f32 %v3569_v41, %v7856_v25  ;;  %v4035_v18 = vpop.f32.mrf.mxu2 }
 0x4e6   : > { %v7996_v14 = vpop.f32.mrf.mxu1 }
 0x4e7   : > { %v7998_v13 = vadd.f32 %v4026_v12, %v3570_v28 }
 0x4e9   : > { %3941 = vmatmul.bf16.vlgmr.msra.gmra.mxu1 %v7816_v53  ;;  %4071 = vmatmul.bf16.vlgmr.msra.gmra.mxu3 %v7816_v53 }
 0x4ec   : > { %v3572_v21 = vpop.f32.mrf.mxu3 }
 0x4ed   : > { %v4037_v22 = vpop.f32.mrf.mxu2 }
 0x4ee   : > { %v8002_v61 = vpop.f32.mrf.mxu1 }
 0x4f4   : > { %v3573_v52 = vpop.f32.mrf.mxu3 }
 0x4f5   : > { %v3574_v45 = vadd.f32 %v3573_v52, %v7867_v16  ;;  %v4039_v29 = vpop.f32.mrf.mxu2 }
 0x4f6   : > { %v8005_v50 = vpop.f32.mrf.mxu1 }
 0x4f7   : > { %v8007_v25 = vadd.f32 %v4030_v46, %v3574_v45 }
 0x4f9   : > { %3946 = vmatmul.bf16.gmra.mxu1 %v7846_v37  ;;  %4076 = vmatmul.bf16.gmra.mxu3 %v7846_v37 }
 0x4fc   : > { %v3576_v12 = vpop.f32.mrf.mxu3 }
 0x4fd   : > { %v3577_v17 = vadd.f32 %v3576_v12, %v7875_v43  ;;  %v4042_v53 = vpop.f32.mrf.mxu2 }
 0x4fe   : > { %v8012_v59 = vpop.f32.mrf.mxu1 }
 0x4ff   : > { %v8014_v41 = vadd.f32 %v4033_v10, %v3577_v17 }
 0x504   : > { %v3578_v28 = vpop.f32.mrf.mxu3 }
 0x505   : > { %v4043_v18 = vpop.f32.mrf.mxu2 }
 0x506   : > { %v8016_v16 = vpop.f32.mrf.mxu1 }
 0x509   : > { %3951 = vmatmul.bf16.gmra.mxu1 %v7860_v31  ;;  %4081 = vmatmul.bf16.gmra.mxu3 %v7860_v31 }
 0x50c   : > { %v3580_v46 = vpop.f32.mrf.mxu3 }
 0x50d   : > { %v3581_v21 = vadd.f32 %v3580_v46, %v7887_v40  ;;  %v4046_v37 = vpop.f32.mrf.mxu2 }
 0x50e   : > { %v8021_v52 = vpop.f32.mrf.mxu1 }
 0x50f   : > { %v8023_v43 = vadd.f32 %v4037_v22, %v3581_v21 }
 0x511   : > { %8513 = vst [vmem:[#allocation46_spill] sm:$0xff] %v8023_v43 }
 0x514   : > { %v3582_v45 = vpop.f32.mrf.mxu3 }
 0x515   : > { %v3583_v10 = vadd.f32 %v3582_v45, %v7891_v48  ;;  %v4048_v12 = vpop.f32.mrf.mxu2 }
 0x516   : > { %v8026_v17 = vpop.f32.mrf.mxu1 }
 0x517   : > { %v8028_v53 = vadd.f32 %v4039_v29, %v3583_v10 }
 0x519   : > { %3956 = vmatmul.bf16.gmra.mxu1 %v7871_v36  ;;  %4086 = vmatmul.bf16.gmra.mxu3 %v7871_v36 }
 0x51c   : > { %v3585_v31 = vpop.f32.mrf.mxu3 }
 0x51d   : > { %v4050_v28 = vpop.f32.mrf.mxu2 }
 0x51e   : > { %v8032_v40 = vpop.f32.mrf.mxu1 }
 0x51f   : > { %8514 = vst [vmem:[#allocation98_spill] sm:$0xff] %v8032_v40 }
 0x524   : > { %v3586_v46 = vpop.f32.mrf.mxu3 }
 0x525   : > { %v3587_v22 = vadd.f32 %v3586_v46, %v7902_v8  ;;  %v4052_v21 = vpop.f32.mrf.mxu2 }
 0x526   : > { %v8035_v43 = vpop.f32.mrf.mxu1 }
 0x527   : > { %v8037_v48 = vadd.f32 %v4043_v18, %v3587_v22  ;;  %v3615_v18 = vpop.f32.mrf.mxu0 }
 0x529   : > { %8515 = vst [vmem:[#allocation47_spill] sm:$0xff] %v8037_v48  ;;  %3961 = vmatmul.bf16.gmra.mxu1 %v7882_v62  ;;  %4091 = vmatmul.bf16.gmra.mxu3 %v7882_v62 }
 0x52c   : > { %v3589_v29 = vpop.f32.mrf.mxu3 }
 0x52d   : > { %v3590_v45 = vadd.f32 %v3589_v29, %v7911_v20  ;;  %v4055_v36 = vpop.f32.mrf.mxu2 }
 0x52e   : > { %v8042_v10 = vpop.f32.mrf.mxu1 }
 0x52f   : > { %v8044_v12 = vadd.f32 %v4046_v37, %v3590_v45  ;;  %v3617_v36 = vpop.f32.mrf.mxu0 }
 0x534   : > { %v3591_v31 = vpop.f32.mrf.mxu3 }
 0x535   : > { %v4056_v40 = vpop.f32.mrf.mxu2 }
 0x536   : > { %v8046_v8 = vpop.f32.mrf.mxu1 }
 0x537   : > { %8516 = vst [vmem:[#allocation64_spill] sm:$0xff] %v8046_v8 }
 0x539   : > { %3966 = vmatmul.bf16.gmra.mxu1 %v7895_v35  ;;  %4096 = vmatmul.bf16.gmra.mxu3 %v7895_v35 }
 0x53c   : > { %v3593_v46 = vpop.f32.mrf.mxu3 }
 0x53d   : > { %v3594_v62 = vadd.f32 %v3593_v46, %v7922_v1  ;;  %v4059_v22 = vpop.f32.mrf.mxu2  ;;  %v3620_v46 = vpop.f32.mrf.mxu0 }
 0x53e   : > { %v8051_v48 = vpop.f32.mrf.mxu1 }
 0x53f   : > { %8517 = vst [vmem:[#allocation99_spill] sm:$0xff] %v8051_v48  ;;  %v8053_v20 = vadd.f32 %v4050_v28, %v3594_v62 }
 0x541   : > { %8518 = vst [vmem:[#allocation50_spill] sm:$0xff] %v8053_v20 }
 0x544   : > { %v3595_v29 = vpop.f32.mrf.mxu3 }
 0x545   : > { %v3596_v37 = vadd.f32 %v3595_v29, %v7926_v4  ;;  %v4061_v45 = vpop.f32.mrf.mxu2 }
 0x546   : > { %v8056_v31 = vpop.f32.mrf.mxu1 }
 0x547   : > { %v8058_v8 = vadd.f32 %v4052_v21, %v3596_v37  ;;  %v3622_v21 = vpop.f32.mrf.mxu0 }
 0x549   : > { %3971 = vmatmul.bf16.gmra.mxu1 %v7906_v58  ;;  %4101 = vmatmul.bf16.gmra.mxu3 %v7906_v58 }
 0x54c   : > { %v3598_v35 = vpop.f32.mrf.mxu3 }
 0x54e   : > { %v8062_v1 = vpop.f32.mrf.mxu1 }
 0x54f   : > { %8519 = vst [vmem:[#allocation53_spill] sm:$0xff] %v8062_v1  ;;  %v3625_v35 = vpop.f32.mrf.mxu0 }
 0x554   : > { %v3599_v48 = vpop.f32.mrf.mxu3 }
 0x555   : > { %v3600_v28 = vadd.f32 %v3599_v48, %v7937_v57 }
 0x556   : > { %v8065_v62 = vpop.f32.mrf.mxu1 }
 0x557   : > { %v8067_v4 = vadd.f32 %v4056_v40, %v3600_v28  ;;  %v3488_v40 = vadd.f32 %v7721_v5, %v7770_v30  ;;  %v8081_v48 = vpop.f32.mrf.mxu0 }
 0x559   : > { %8520 = vst [vmem:[#allocation102_spill] sm:$0xff] %v8067_v4  ;;  %3976 = vmatmul.bf16.gmra.mxu1 %v7917_v9  ;;  %4106 = vmatmul.bf16.gmra.mxu3 %v7917_v9 }
 0x55c   : > { %v3602_v29 = vpop.f32.mrf.mxu3 }
 0x55d   : > { %v3603_v37 = vadd.f32 %v3602_v29, %v7946_v47 }
 0x55e   : > { %v8072_v58 = vpop.f32.mrf.mxu1 }
 0x55f   : > { %8521 = vst [vmem:[#allocation56_spill] sm:$0xff] %v8072_v58  ;;  %v8074_v45 = vadd.f32 %v4059_v22, %v3603_v37  ;;  %v3616_v22 = vadd.f32 %v3615_v18, %v7950_v56  ;;  %v3618_v37 = vadd.f32 %v3617_v36, %v7958_v7  ;;  %v3621_v7 = vadd.f32 %v3620_v46, %v7963_v27 }
 0x561   : > { %8522 = vst [vmem:[#allocation55_spill] sm:$0xff] %v8074_v45 }
 0x564   : > { %v3604_v1 = vpop.f32.mrf.mxu3 }
 0x566   : > { %v3942_v20 = vpop.f32.mrf.mxu1 }
 0x567   : > { %v4132_v9 = vadd.f32 %v3942_v20, %v7748_v33 }
 0x569   : > { %3981 = vmatmul.bf16.gmra.mxu1 %v7930_v38  ;;  %4111 = vmatmul.bf16.gmra.mxu3 %v7930_v38  ;;  %v4237_v29 = vrot.slane %v4132_v9, 7 }
 0x56c   : > { %v4072_v57 = vpop.f32.mrf.mxu3 }
 0x56d   : > { %v4134_v4 = vadd.f32 %v4072_v57, %v3616_v22  ;;  %v8523_v22 = vld [vmem:[#allocation75_spill] sm:$0xff] }
 0x56e   : > { %v3944_v47 = vpop.f32.mrf.mxu1 }
 0x56f   : > { %v4135_v28 = vadd.f32 %v3944_v47, %v3488_v40  ;;  %v4325_v33 = vrot.slane %v4134_v4, 1  ;;  %v8088_v47 = vpop.f32.mrf.mxu0 }
 0x571   : > { %v4238_v1 = vrot.slane %v4135_v28, 7 }
 0x573   : > { %v4239_v38 = vsel %vm4236_vm1, %v4237_v29, %v4238_v1 }
 0x574   : > { %v4286_v58 = vadd.f32 %v4239_v38, %v7965_v55  ;;  %v4074_v45 = vpop.f32.mrf.mxu3 }
 0x575   : > { %v4137_v5 = vadd.f32 %v4074_v45, %v3618_v37  ;;  %v8524_v37 = vld [vmem:[#allocation77_spill] sm:$0xff] }
 0x576   : > { %v3947_v30 = vpop.f32.mrf.mxu1 }
 0x577   : > { %v4326_v20 = vrot.slane %v4137_v5, 1  ;;  %v4138_v40 = vadd.f32 %v3947_v30, %v7786_v0  ;;  %v8099_v0 = vld [vmem:[%s8293_s5] ss:$0 sm:$0xff]  ;;  %v3632_v27 = vpop.f32.mrf.mxu0 }
 0x579   : > { %v4327_v56 = vsel %vm2218_vm0, %v4325_v33, %v4326_v20  ;;  %v4204_v18 = vrot.slane %v4138_v40, 7  ;;  %3986 = vmatmul.bf16.gmra.mxu1 %v7941_v19  ;;  %4116 = vmatmul.bf16.gmra.mxu3 %v7941_v19 }
 0x57b   : > { %v4277_v55 = vsel %vm4236_vm1, %v4204_v18, %v4237_v29  ;;  %v3623_v18 = vadd.f32 %v3622_v21, %v7972_v34 }
 0x57c   : > { %v4285_v36 = vadd.f32 %v4277_v55, %v7960_v44  ;;  %v4077_v4 = vpop.f32.mrf.mxu3 }
 0x57d   : > { %v4139_v45 = vadd.f32 %v4077_v4, %v3621_v7 }
 0x57e   : > { %v4381_v57 = vadd.f32 %v4327_v56, %v4285_v36  ;;  %v3949_v9 = vpop.f32.mrf.mxu1 }
 0x57f   : > { %v4328_v28 = vrot.slane %v4139_v45, 1  ;;  %v4140_v30 = vadd.f32 %v3949_v9, %v7800_v11  ;;  %v3626_v11 = vadd.f32 %v3625_v35, %v7975_v32  ;;  %v3635_v4 = vpop.f32.mrf.mxu0 }
 0x580   : > { %v4477_v1 = vadd.f32 %v8523_v22, %v4381_v57 }
 0x581   : > { %v4329_v19 = vsel %vm2218_vm0, %v4326_v20, %v4328_v28 }
 0x582   : > { %v4497_v46 = vadd.f32 %v8099_v0, %v4477_v1  ;;  %v4382_v29 = vadd.f32 %v4329_v19, %v4286_v58  ;;  %v4240_v58 = vrot.slane %v4140_v30, 7  ;;  %v8526_v30 = vld [vmem:[#allocation81_spill] sm:$0xff] }
 0x584   : > { %v4513_v44 = vmax.f32 %v4497_v46, 0.0  ;;  %v4478_v38 = vadd.f32 %v8524_v37, %v4382_v29  ;;  %v4079_v5 = vpop.f32.mrf.mxu3 }
 0x585   : > { %v4142_v55 = vadd.f32 %v4079_v5, %v3623_v18 }
 0x586   : > { %4529 = vst [vmem:[%s8107_s17] sm:$0xff] %v4513_v44  ;;  %v4498_v33 = vadd.f32 %v8099_v0, %v4478_v38  ;;  %v3952_v40 = vpop.f32.mrf.mxu1  ;;  %v8525_v38 = vld [vmem:[#allocation80_spill] sm:$0xff] }
 0x587   : > { %v4143_v20 = vadd.f32 %v3952_v40, %v7810_v15  ;;  %v4330_v28 = vrot.slane %v4142_v55, 1  ;;  %v3637_v46 = vpop.f32.mrf.mxu0 }
 0x588   : > { %v4514_v56 = vmax.f32 %v4498_v33, 0.0 }
 0x589   : > { %v4241_v7 = vrot.slane %v4143_v20, 7  ;;  %3991 = vmatmul.bf16.gmra.mxu1 %v7952_v49  ;;  %4121 = vmatmul.bf16.gmra.mxu3 %v7952_v49  ;;  %v3628_v49 = vadd.f32 %v8081_v48, %v7982_v3 }
 0x58a   : > { %4530 = vst [vmem:[%s8107_s17 + $0x8] sm:$0xff] %v4514_v56 }
 0x58b   : > { %v4242_v36 = vsel %vm4236_vm1, %v4240_v58, %v4241_v7 }
 0x58c   : > { %v4288_v45 = vadd.f32 %v4242_v36, %v7984_v60  ;;  %v4082_v57 = vpop.f32.mrf.mxu3 }
 0x58d   : > { %v4145_v15 = vadd.f32 %v4082_v57, %v3626_v11 }
 0x58e   : > { %v3954_v9 = vpop.f32.mrf.mxu1 }
 0x58f   : > { %v4331_v34 = vrot.slane %v4145_v15, 1  ;;  %v4146_v21 = vadd.f32 %v3954_v9, %v7836_v6  ;;  %v3640_v7 = vpop.f32.mrf.mxu0 }
 0x591   : > { %v4332_v22 = vsel %vm2218_vm0, %v4330_v28, %v4331_v34  ;;  %v4205_v1 = vrot.slane %v4146_v21, 7 }
 0x593   : > { %v4278_v32 = vsel %vm4236_vm1, %v4205_v1, %v4240_v58 }
 0x594   : > { %v4287_v35 = vadd.f32 %v4278_v32, %v7977_v42  ;;  %v4084_v19 = vpop.f32.mrf.mxu3 }
 0x595   : > { %v4147_v60 = vadd.f32 %v4084_v19, %v3628_v49  ;;  %v3636_v49 = vadd.f32 %v3635_v4, %v7996_v14  ;;  %v8528_v4 = vld [vmem:[#allocation85_spill] sm:$0xff] }
 0x596   : > { %v4383_v29 = vadd.f32 %v4332_v22, %v4287_v35  ;;  %v3957_v44 = vpop.f32.mrf.mxu1 }
 0x597   : > { %v4333_v37 = vrot.slane %v4147_v60, 1  ;;  %v4148_v20 = vadd.f32 %v3957_v44, %v7842_v54 }
 0x598   : > { %v4479_v5 = vadd.f32 %v8525_v38, %v4383_v29  ;;  %v8527_v29 = vld [vmem:[#allocation83_spill] sm:$0xff] }
 0x599   : > { %v4334_v6 = vsel %vm2218_vm0, %v4331_v34, %v4333_v37  ;;  %3996 = vmatmul.bf16.gmra.mxu1 %v7967_v24  ;;  %4126 = vmatmul.bf16.gmra.mxu3 %v7967_v24  ;;  %v3631_v24 = vadd.f32 %v8088_v47, %v7986_v39  ;;  %v4243_v55 = vrot.slane %v4148_v20, 7  ;;  %v3642_v47 = vpop.f32.mrf.mxu0  ;;  %v3638_v20 = vadd.f32 %v3637_v46, %v8002_v61 }
 0x59a   : > { %v4499_v3 = vadd.f32 %v8099_v0, %v4479_v5  ;;  %v4384_v48 = vadd.f32 %v4334_v6, %v4288_v45  ;;  %v3633_v45 = vadd.f32 %v3632_v27, %v7991_v2 }
 0x59c   : > { %v4515_v42 = vmax.f32 %v4499_v3, 0.0  ;;  %v4480_v33 = vadd.f32 %v8526_v30, %v4384_v48  ;;  %v4087_v40 = vpop.f32.mrf.mxu3  ;;  %v8529_v30 = vld [vmem:[#allocation33_spill] sm:$0xff] }
 0x59d   : > { %v4150_v57 = vadd.f32 %v4087_v40, %v3631_v24 }
 0x59e   : > { %4531 = vst [vmem:[%s8107_s17 + $0x10] sm:$0xff] %v4515_v42  ;;  %v4500_v56 = vadd.f32 %v8099_v0, %v4480_v33  ;;  %v3959_v18 = vpop.f32.mrf.mxu1 }
 0x59f   : > { %v4151_v58 = vadd.f32 %v3959_v18, %v7853_v63  ;;  %v4335_v21 = vrot.slane %v4150_v57, 1 }
 0x5a0   : > { %v4516_v11 = vmax.f32 %v4500_v56, 0.0 }
 0x5a1   : > { %v4244_v36 = vrot.slane %v4151_v58, 7  ;;  %v3645_v5 = vpop.f32.mrf.mxu0  ;;  %v3641_v58 = vadd.f32 %v3640_v7, %v8005_v50 }
 0x5a2   : > { %4532 = vst [vmem:[%s8107_s17 + $0x18] sm:$0xff] %v4516_v11 }
 0x5a3   : > { %v4245_v15 = vsel %vm4236_vm1, %v4243_v55, %v4244_v36 }
 0x5a4   : > { %v4290_v54 = vadd.f32 %v4245_v15, %v7998_v13  ;;  %v4089_v9 = vpop.f32.mrf.mxu3 }
 0x5a5   : > { %v4153_v28 = vadd.f32 %v4089_v9, %v3633_v45  ;;  %v8530_v9 = vld [vmem:[#allocation86_spill] sm:$0xff] }
 0x5a6   : > { %v3962_v34 = vpop.f32.mrf.mxu1 }
 0x5a7   : > { %v4336_v63 = vrot.slane %v4153_v28, 1  ;;  %v4154_v22 = vadd.f32 %v3962_v34, %v7858_v23  ;;  %v3643_v34 = vadd.f32 %v3642_v47, %v8012_v59  ;;  %v8532_v47 = vld [vmem:[#allocation92_spill] sm:$0xff] }
 0x5a9   : > { %v4337_v1 = vsel %vm2218_vm0, %v4335_v21, %v4336_v63  ;;  %v4206_v39 = vrot.slane %v4154_v22, 7  ;;  %v3647_v45 = vpop.f32.mrf.mxu0 }
 0x5ab   : > { %v4279_v2 = vsel %vm4236_vm1, %v4206_v39, %v4243_v55 }
 0x5ac   : > { %v4289_v27 = vadd.f32 %v4279_v2, %v7993_v51  ;;  %v4092_v32 = vpop.f32.mrf.mxu3 }
 0x5ad   : > { %v4155_v13 = vadd.f32 %v4092_v32, %v3636_v49  ;;  %v8531_v49 = vld [vmem:[#allocation91_spill] sm:$0xff] }
 0x5ae   : > { %v4385_v35 = vadd.f32 %v4337_v1, %v4289_v27  ;;  %v3964_v19 = vpop.f32.mrf.mxu1 }
 0x5af   : > { %v4338_v60 = vrot.slane %v4155_v13, 1  ;;  %v4156_v51 = vadd.f32 %v3964_v19, %v7864_v26 }
 0x5b0   : > { %v4481_v44 = vadd.f32 %v8527_v29, %v4385_v35 }
 0x5b1   : > { %v4339_v23 = vsel %vm2218_vm0, %v4336_v63, %v4338_v60  ;;  %v4246_v56 = vrot.slane %v4156_v51, 7  ;;  %v3650_v39 = vpop.f32.mrf.mxu0  ;;  %v8533_v60 = vld [vmem:[#allocation31_spill] sm:$0xff]  ;;  %v3648_v51 = vadd.f32 %v3647_v45, %v8021_v52 }
 0x5b2   : > { %v4501_v37 = vadd.f32 %v8099_v0, %v4481_v44  ;;  %v4386_v38 = vadd.f32 %v4339_v23, %v4290_v54  ;;  %v8534_v23 = vld [vmem:[#allocation88_spill] sm:$0xff] }
 0x5b4   : > { %v4517_v14 = vmax.f32 %v4501_v37, 0.0  ;;  %v4482_v6 = vadd.f32 %v8528_v4, %v4386_v38  ;;  %v4094_v3 = vpop.f32.mrf.mxu3 }
 0x5b5   : > { %v4158_v11 = vadd.f32 %v4094_v3, %v3638_v20 }
 0x5b6   : > { %4533 = vst [vmem:[%s8107_s17 + $0x20] sm:$0xff] %v4517_v14  ;;  %v4502_v48 = vadd.f32 %v8099_v0, %v4482_v6  ;;  %v3967_v42 = vpop.f32.mrf.mxu1  ;;  %v3646_v14 = vadd.f32 %v3645_v5, %v8016_v16 }
 0x5b7   : > { %v4159_v33 = vadd.f32 %v3967_v42, %v8529_v30  ;;  %v4340_v15 = vrot.slane %v4158_v11, 1 }
 0x5b8   : > { %v4518_v40 = vmax.f32 %v4502_v48, 0.0 }
 0x5b9   : > { %v4247_v18 = vrot.slane %v4159_v33, 7  ;;  %v3652_v3 = vpop.f32.mrf.mxu0 }
 0x5ba   : > { %4534 = vst [vmem:[%s8107_s17 + $0x28] sm:$0xff] %v4518_v40 }
 0x5bb   : > { %v4248_v24 = vsel %vm4236_vm1, %v4246_v56, %v4247_v18 }
 0x5bc   : > { %v4292_v55 = vadd.f32 %v4248_v24, %v8014_v41  ;;  %v4097_v26 = vpop.f32.mrf.mxu3  ;;  %v3651_v24 = vadd.f32 %v3650_v39, %v8026_v17 }
 0x5bd   : > { %v4161_v36 = vadd.f32 %v4097_v26, %v3641_v58  ;;  %v8535_v58 = vld [vmem:[#allocation34_spill] sm:$0xff] }
 0x5be   : > { %v3969_v57 = vpop.f32.mrf.mxu1  ;;  %v8536_v26 = vld [vmem:[#allocation46_spill] sm:$0xff] }
 0x5bf   : > { %v4341_v54 = vrot.slane %v4161_v36, 1  ;;  %v4162_v28 = vadd.f32 %v3969_v57, %v8530_v9  ;;  %v8537_v9 = vld [vmem:[#allocation96_spill] sm:$0xff] }
 0x5c1   : > { %v4342_v61 = vsel %vm2218_vm0, %v4340_v15, %v4341_v54  ;;  %v4207_v46 = vrot.slane %v4162_v28, 7  ;;  %v3655_v52 = vpop.f32.mrf.mxu0 }
 0x5c3   : > { %v4280_v50 = vsel %vm4236_vm1, %v4207_v46, %v4246_v56 }
 0x5c4   : > { %v4291_v7 = vadd.f32 %v4280_v50, %v8007_v25  ;;  %v4099_v21 = vpop.f32.mrf.mxu3  ;;  %v8538_v50 = vld [vmem:[#allocation97_spill] sm:$0xff] }
 0x5c5   : > { %v4163_v41 = vadd.f32 %v4099_v21, %v3643_v34 }
 0x5c6   : > { %v4387_v63 = vadd.f32 %v4342_v61, %v4291_v7  ;;  %v3972_v22 = vpop.f32.mrf.mxu1 }
 0x5c7   : > { %v4343_v1 = vrot.slane %v4163_v41, 1  ;;  %v4164_v25 = vadd.f32 %v3972_v22, %v8533_v60  ;;  %v8539_v41 = vld [vmem:[#allocation36_spill] sm:$0xff] }
 0x5c8   : > { %v4483_v2 = vadd.f32 %v8531_v49, %v4387_v63  ;;  %v8540_v49 = vld [vmem:[#allocation52_spill] sm:$0xff] }
 0x5c9   : > { %v4344_v27 = vsel %vm2218_vm0, %v4341_v54, %v4343_v1  ;;  %v4249_v4 = vrot.slane %v4164_v25, 7  ;;  %v3657_v22 = vpop.f32.mrf.mxu0 }
 0x5ca   : > { %v4503_v32 = vadd.f32 %v8099_v0, %v4483_v2  ;;  %v4388_v13 = vadd.f32 %v4344_v27, %v4292_v55 }
 0x5cc   : > { %v4519_v59 = vmax.f32 %v4503_v32, 0.0  ;;  %v4484_v35 = vadd.f32 %v8532_v47, %v4388_v13  ;;  %v4102_v19 = vpop.f32.mrf.mxu3  ;;  %v8541_v32 = vld [vmem:[#allocation98_spill] sm:$0xff] }
 0x5cd   : > { %v4166_v48 = vadd.f32 %v4102_v19, %v3646_v14  ;;  %v3653_v13 = vadd.f32 %v3652_v3, %v8541_v32  ;;  %v8542_v14 = vld [vmem:[#allocation94_spill] sm:$0xff] }
 0x5ce   : > { %4535 = vst [vmem:[%s8107_s17 + $0x30] sm:$0xff] %v4519_v59  ;;  %v4504_v29 = vadd.f32 %v8099_v0, %v4484_v35  ;;  %v3974_v44 = vpop.f32.mrf.mxu1  ;;  %v3656_v35 = vadd.f32 %v3655_v52, %v8035_v43 }
 0x5cf   : > { %v4167_v37 = vadd.f32 %v3974_v44, %v8534_v23  ;;  %v4345_v56 = vrot.slane %v4166_v48, 1  ;;  %v3658_v48 = vadd.f32 %v3657_v22, %v8042_v10 }
 0x5d0   : > { %v4520_v38 = vmax.f32 %v4504_v29, 0.0 }
 0x5d1   : > { %v4250_v6 = vrot.slane %v4167_v37, 7 }
 0x5d2   : > { %4536 = vst [vmem:[%s8107_s17 + $0x38] sm:$0xff] %v4520_v38 }
 0x5d3   : > { %v4251_v42 = vsel %vm4236_vm1, %v4249_v4, %v4250_v6  ;;  %v3660_v6 = vpop.f32.mrf.mxu0 }
 0x5d4   : > { %v4294_v30 = vadd.f32 %v4251_v42, %v8028_v53  ;;  %v4104_v33 = vpop.f32.mrf.mxu3  ;;  %v8543_v42 = vld [vmem:[#allocation47_spill] sm:$0xff] }
 0x5d5   : > { %v4169_v40 = vadd.f32 %v4104_v33, %v3648_v51 }
 0x5d6   : > { %v3977_v20 = vpop.f32.mrf.mxu1 }
 0x5d7   : > { %v4346_v18 = vrot.slane %v4169_v40, 1  ;;  %v4170_v11 = vadd.f32 %v3977_v20, %v8535_v58 }
 0x5d9   : > { %v4347_v16 = vsel %vm2218_vm0, %v4345_v56, %v4346_v18  ;;  %v4208_v5 = vrot.slane %v4170_v11, 7 }
 0x5db   : > { %v4281_v55 = vsel %vm4236_vm1, %v4208_v5, %v4249_v4 }
 0x5dc   : > { %v4293_v36 = vadd.f32 %v4281_v55, %v8536_v26  ;;  %v4107_v45 = vpop.f32.mrf.mxu3  ;;  %v8545_v55 = vld [vmem:[#allocation101_spill] sm:$0xff] }
 0x5dd   : > { %v4171_v53 = vadd.f32 %v4107_v45, %v3651_v24 }
 0x5de   : > { %v4389_v57 = vadd.f32 %v4347_v16, %v4293_v36  ;;  %v3979_v15 = vpop.f32.mrf.mxu1  ;;  %v3662_v16 = vpop.f32.mrf.mxu0  ;;  %v8546_v36 = vld [vmem:[#allocation39_spill] sm:$0xff] }
 0x5df   : > { %v4348_v54 = vrot.slane %v4171_v53, 1  ;;  %v4172_v63 = vadd.f32 %v3979_v15, %v8539_v41  ;;  %v8547_v15 = vld [vmem:[#allocation41_spill] sm:$0xff] }
 0x5e0   : > { %v4485_v28 = vadd.f32 %v8537_v9, %v4389_v57 }
 0x5e1   : > { %v4349_v61 = vsel %vm2218_vm0, %v4346_v18, %v4348_v54  ;;  %v4252_v59 = vrot.slane %v4172_v63, 7  ;;  %v8544_v18 = vld [vmem:[#allocation100_spill] sm:$0xff] }
 0x5e2   : > { %v4505_v46 = vadd.f32 %v8099_v0, %v4485_v28  ;;  %v4390_v34 = vadd.f32 %v4349_v61, %v4294_v30  ;;  %v8548_v28 = vld [vmem:[#allocation64_spill] sm:$0xff] }
 0x5e3   : > { %v3661_v61 = vadd.f32 %v3660_v6, %v8548_v28 }
 0x5e4   : > { %v4521_v17 = vmax.f32 %v4505_v46, 0.0  ;;  %v4486_v7 = vadd.f32 %v8538_v50, %v4390_v34  ;;  %v4109_v21 = vpop.f32.mrf.mxu3 }
 0x5e5   : > { %v4174_v19 = vadd.f32 %v4109_v21, %v3653_v13 }
 0x5e6   : > { %4537 = vst [vmem:[%s8107_s17 + $0x40] sm:$0xff] %v4521_v17  ;;  %v4506_v1 = vadd.f32 %v8099_v0, %v4486_v7  ;;  %v3982_v39 = vpop.f32.mrf.mxu1  ;;  %v8549_v17 = vld [vmem:[#allocation99_spill] sm:$0xff]  ;;  %v3665_v41 = vpop.f32.mrf.mxu0 }
 0x5e7   : > { %v4175_v2 = vadd.f32 %v3982_v39, %v8540_v49  ;;  %v4350_v37 = vrot.slane %v4174_v19, 1  ;;  %v3663_v50 = vadd.f32 %v3662_v16, %v8549_v17  ;;  %v8551_v19 = vld [vmem:[#allocation50_spill] sm:$0xff] }
 0x5e8   : > { %v4522_v27 = vmax.f32 %v4506_v1, 0.0 }
 0x5e9   : > { %v4253_v47 = vrot.slane %v4175_v2, 7 }
 0x5ea   : > { %4538 = vst [vmem:[%s8107_s17 + $0x48] sm:$0xff] %v4522_v27  ;;  %v8550_v27 = vld [vmem:[#allocation95_spill] sm:$0xff] }
 0x5eb   : > { %v4254_v60 = vsel %vm4236_vm1, %v4252_v59, %v4253_v47  ;;  %v3666_v47 = vadd.f32 %v3665_v41, %v8056_v31 }
 0x5ec   : > { %v4296_v25 = vadd.f32 %v4254_v60, %v8044_v12  ;;  %v4112_v29 = vpop.f32.mrf.mxu3 }
 0x5ed   : > { %v4177_v44 = vadd.f32 %v4112_v29, %v3656_v35 }
 0x5ee   : > { %v3984_v23 = vpop.f32.mrf.mxu1 }
 0x5ef   : > { %v4351_v38 = vrot.slane %v4177_v44, 1  ;;  %v4178_v4 = vadd.f32 %v3984_v23, %v8542_v14 }
 0x5f1   : > { %v4352_v3 = vsel %vm2218_vm0, %v4350_v37, %v4351_v38  ;;  %v4209_v51 = vrot.slane %v4178_v4, 7 }
 0x5f3   : > { %v4282_v43 = vsel %vm4236_vm1, %v4209_v51, %v4252_v59  ;;  %v8553_v51 = vld [vmem:[#allocation105_spill] sm:$0xff] }
 0x5f4   : > { %v4295_v30 = vadd.f32 %v4282_v43, %v8543_v42  ;;  %v4114_v33 = vpop.f32.mrf.mxu3  ;;  %v8554_v42 = vld [vmem:[#allocation58_spill] sm:$0xff] }
 0x5f5   : > { %v4179_v12 = vadd.f32 %v4114_v33, %v3658_v48 }
 0x5f6   : > { %v4391_v40 = vadd.f32 %v4352_v3, %v4295_v30  ;;  %v3987_v20 = vpop.f32.mrf.mxu1 }
 0x5f7   : > { %v4353_v56 = vrot.slane %v4179_v12, 1  ;;  %v4180_v45 = vadd.f32 %v3987_v20, %v8546_v36 }
 0x5f8   : > { %v4487_v58 = vadd.f32 %v8544_v18, %v4391_v40  ;;  %v8555_v40 = vld [vmem:[#allocation42_spill] sm:$0xff] }
 0x5f9   : > { %v4354_v11 = vsel %vm2218_vm0, %v4351_v38, %v4353_v56  ;;  %v4255_v46 = vrot.slane %v4180_v45, 7  ;;  %v8552_v38 = vld [vmem:[#allocation104_spill] sm:$0xff] }
 0x5fa   : > { %v4507_v5 = vadd.f32 %v8099_v0, %v4487_v58  ;;  %v4392_v24 = vadd.f32 %v4354_v11, %v4296_v25  ;;  %v8556_v58 = vld [vmem:[#allocation53_spill] sm:$0xff] }
 0x5fc   : > { %v4523_v10 = vmax.f32 %v4507_v5, 0.0  ;;  %v4488_v52 = vadd.f32 %v8545_v55, %v4392_v24  ;;  %v4117_v26 = vpop.f32.mrf.mxu3 }
 0x5fd   : > { %v4182_v7 = vadd.f32 %v4117_v26, %v3661_v61 }
 0x5fe   : > { %4539 = vst [vmem:[%s8107_s17 + $0x50] sm:$0xff] %v4523_v10  ;;  %v4508_v53 = vadd.f32 %v8099_v0, %v4488_v52  ;;  %v3989_v57 = vpop.f32.mrf.mxu1  ;;  %v8557_v52 = vld [vmem:[#allocation55_spill] sm:$0xff] }
 0x5ff   : > { %v4183_v54 = vadd.f32 %v3989_v57, %v8547_v15  ;;  %v4355_v49 = vrot.slane %v4182_v7, 1 }
 0x600   : > { %v4524_v9 = vmax.f32 %v4508_v53, 0.0 }
 0x601   : > { %v4256_v34 = vrot.slane %v4183_v54, 7  ;;  %v8558_v54 = vld [vmem:[#allocation44_spill] sm:$0xff] }
 0x602   : > { %4540 = vst [vmem:[%s8107_s17 + $0x58] sm:$0xff] %v4524_v9 }
 0x603   : > { %v4257_v21 = vsel %vm4236_vm1, %v4255_v46, %v4256_v34  ;;  %v8559_v34 = vld [vmem:[#allocation56_spill] sm:$0xff] }
 0x604   : > { %v4298_v63 = vadd.f32 %v4257_v21, %v8058_v8  ;;  %v4119_v22 = vpop.f32.mrf.mxu3  ;;  %v3667_v8 = vpop.f32.mrf.mxu0 }
 0x605   : > { %v4185_v1 = vadd.f32 %v4119_v22, %v3663_v50  ;;  %v3668_v11 = vadd.f32 %v3667_v8, %v8556_v58  ;;  %v8560_v50 = vld [vmem:[#allocation102_spill] sm:$0xff] }
 0x606   : > { %v3992_v39 = vpop.f32.mrf.mxu1 }
 0x607   : > { %v4356_v2 = vrot.slane %v4185_v1, 1  ;;  %v4186_v32 = vadd.f32 %v3992_v39, %v8550_v27  ;;  %v8561_v1 = vld [vmem:[#allocation107_spill] sm:$0xff] }
 0x609   : > { %v4357_v13 = vsel %vm2218_vm0, %v4355_v49, %v4356_v2  ;;  %v4210_v59 = vrot.slane %v4186_v32, 7 }
 0x60b   : > { %v4283_v35 = vsel %vm4236_vm1, %v4210_v59, %v4255_v46 }
 0x60c   : > { %v4297_v60 = vadd.f32 %v4283_v35, %v8551_v19  ;;  %v4122_v25 = vpop.f32.mrf.mxu3  ;;  %v3670_v56 = vpop.f32.mrf.mxu0 }
 0x60d   : > { %v4187_v29 = vadd.f32 %v4122_v25, %v3666_v47  ;;  %v3671_v24 = vadd.f32 %v3670_v56, %v8065_v62 }
 0x60e   : > { %v4393_v44 = vadd.f32 %v4357_v13, %v4297_v60  ;;  %v3994_v23 = vpop.f32.mrf.mxu1  ;;  %v8563_v13 = vld [vmem:[#allocation108_spill] sm:$0xff] }
 0x60f   : > { %v4358_v37 = vrot.slane %v4187_v29, 1  ;;  %v4188_v30 = vadd.f32 %v3994_v23, %v8554_v42 }
 0x610   : > { %v4489_v14 = vadd.f32 %v8552_v38, %v4393_v44 }
 0x611   : > { %v4359_v4 = vsel %vm2218_vm0, %v4356_v2, %v4358_v37  ;;  %v4258_v16 = vrot.slane %v4188_v30, 7 }
 0x612   : > { %v4509_v6 = vadd.f32 %v8099_v0, %v4489_v14  ;;  %v4394_v3 = vadd.f32 %v4359_v4, %v4298_v63 }
 0x614   : > { %v4525_v31 = vmax.f32 %v4509_v6, 0.0  ;;  %v4490_v48 = vadd.f32 %v8553_v51, %v4394_v3  ;;  %v4124_v43 = vpop.f32.mrf.mxu3  ;;  %v3672_v46 = vpop.f32.mrf.mxu0 }
 0x615   : > { %v4190_v10 = vadd.f32 %v4124_v43, %v3668_v11  ;;  %v3673_v62 = vadd.f32 %v3672_v46, %v8559_v34 }
 0x616   : > { %4541 = vst [vmem:[%s8107_s17 + $0x60] sm:$0xff] %v4525_v31  ;;  %v4510_v33 = vadd.f32 %v8099_v0, %v4490_v48  ;;  %v3997_v12 = vpop.f32.mrf.mxu1 }
 0x617   : > { %v4191_v20 = vadd.f32 %v3997_v12, %v8555_v40  ;;  %v4360_v57 = vrot.slane %v4190_v10, 1 }
 0x618   : > { %v4526_v18 = vmax.f32 %v4510_v33, 0.0 }
 0x619   : > { %v4259_v5 = vrot.slane %v4191_v20, 7 }
 0x61a   : > { %4542 = vst [vmem:[%s8107_s17 + $0x68] sm:$0xff] %v4526_v18 }
 0x61b   : > { %v4260_v55 = vsel %vm4236_vm1, %v4258_v16, %v4259_v5 }
 0x61c   : > { %v4300_v26 = vadd.f32 %v4260_v55, %v8557_v52  ;;  %v4127_v36 = vpop.f32.mrf.mxu3 }
 0x61d   : > { %v4193_v45 = vadd.f32 %v4127_v36, %v3671_v24 }
 0x61e   : > { %v3999_v53 = vpop.f32.mrf.mxu1 }
 0x61f   : > { %v4361_v15 = vrot.slane %v4193_v45, 1  ;;  %v4194_v9 = vadd.f32 %v3999_v53, %v8558_v54 }
 0x621   : > { %v4362_v28 = vsel %vm2218_vm0, %v4360_v57, %v4361_v15  ;;  %v4211_v61 = vrot.slane %v4194_v9, 7 }
 0x623   : > { %v4284_v17 = vsel %vm4236_vm1, %v4211_v61, %v4258_v16 }
 0x624   : > { %v4299_v7 = vadd.f32 %v4284_v17, %v8560_v50  ;;  %v4129_v21 = vpop.f32.mrf.mxu3 }
 0x625   : > { %v4195_v41 = vadd.f32 %v4129_v21, %v3673_v62 }
 0x626   : > { %v4395_v63 = vadd.f32 %v4362_v28, %v4299_v7 }
 0x627   : > { %v4363_v22 = vrot.slane %v4195_v41, 1 }
 0x628   : > { %v4491_v39 = vadd.f32 %v8561_v1, %v4395_v63 }
 0x629   : > { %v4364_v49 = vsel %vm2218_vm0, %v4361_v15, %v4363_v22 }
 0x62a   : > { %v4511_v2 = vadd.f32 %v8099_v0, %v4491_v39  ;;  %v4396_v27 = vadd.f32 %v4364_v49, %v4300_v26 }
 0x62c   : > { %v4527_v32 = vmax.f32 %v4511_v2, 0.0  ;;  %v4492_v59 = vadd.f32 %v8563_v13, %v4396_v27 }
 0x62e   : > { %4543 = vst [vmem:[%s8107_s17 + $0x70] sm:$0xff] %v4527_v32  ;;  %v4512_v47 = vadd.f32 %v8099_v0, %v4492_v59 }
 0x630   : > { %v4528_v35 = vmax.f32 %v4512_v47, 0.0 }
 0x632   : > { %4544 = vst [vmem:[%s8107_s17 + $0x78] sm:$0xff] %v4528_v35 }
 0x633   : > { %6409 = shalt.err (!%p6406_p13)
}
 0x634   : > { %s6498_s15 = smov 128   ;;  %s6499_s14 = smov 8  }
 0x635   : > { %6146 = dma.vmem_to_hbm [thread:$0]  (%p6642_p3), %s4562_s20, 2048, %s4564_s16, %s4546_s29, %s6498_s15, %s6498_s15, %s6499_s14  }
 0x636 PF: > { %s8564_s1 = sld [smem:[#allocation18_spill]] }
 0x637   : > { %s8565_s11 = sld [smem:[#allocation16_spill]] }
 0x63c   : > { %p6173_p0 = scmp.ge.s32.totalorder %s8564_s1, 2 }
 0x63d   : > { %s4578_s3 = sand.u32 1, %s8565_s11  }
 0x63e   : > { %p6163_p5 = pnand %p6173_p0, %p6594_p6  ;;  %s4579_s30 = scalar_lea.sflag [#allocation5], %s4578_s3 }
 0x640   : > { %p6164_p7 = pneg %p6163_p5 }
 0x642   : > { %6455 = dma.done.wait (%p6164_p7), %s4579_s30, 2048  }
 0x643   : > { %6457 = vsyncadd (%p6164_p7), %s4579_s30, 4294965248  ;;  %s24_s28 = sadd.s32 1, %s8564_s1   ;;  %s8567_s24 = sld [smem:[#allocation17_spill]] }
 0x644   : > { %p21_p9 = scmp.ge.s32.totalorder %s24_s28, 6   ;;  %s8568_s26 = sld [smem:[#allocation20_spill]] }
 0x645   : > { %s8569_s12 = sld [smem:[#allocation22_spill]]  ;;  %s8570_s21 = smov %s6464_s22 }
 0x646   : > { %s8571_s22 = smov %s6468_s23  ;;  %s8572_s23 = smov %s6655_s13 }
 0x647   : > { %s8573_s25 = smov %s6484_s27  ;;  %23 = sbr.rel (!%p21_p9) target bundleno = 13 (0xd), region = 109 }
 0x64b   : > { %s8574_s27 = smov %s8569_s12 }
 0x64c   :  { %4585 = vsyncpa [#allocation4], 1 }
 0x64d   :  { %4587 = vsyncpa [#allocation4 + $0x1], 1 }
 0x64e   :  { %4588 = vsyncpa [#allocation7], 1 }
 0x64f   :  { %4589 = vsyncpa [#allocation10], 1 }
 0x650   :  { %4590 = vsyncpa [#allocation5], 1 }
 0x651   :  { %4592 = vsyncpa [#allocation5 + $0x1], 1 }

</bundles_post_ra>
